<compile_context>
chip_gen: v6e
topology: v6e:2x2x1
jax: 0.10.0
libtpu: 0.0.40
codegen_flags: <defaults>
</compile_context>

<pallas_src>
import functools

import jax
import jax.numpy as jnp
from jax.experimental import pallas as pl
from jax.experimental.pallas import tpu as pltpu


def _leaky_relu(x, slope=0.01):
    return jnp.where(x > 0, x, slope * x)


# ---------------------------------------------------------------------------
# Fully fused forward kernel
# ---------------------------------------------------------------------------
def gcn_fused_kernel(x_ref, specT_ref, adj_ref,
                     wc1_ref, b1_ref, mu1_ref, sg1_ref,
                     wc2_ref, b2_ref, mu2_ref, sg2_ref,
                     wc3_ref, b3_ref, mu3_ref, sg3_ref,
                     wc4_ref, b4_ref, mu4_ref, sg4_ref,
                     hw1_ref, hb1_ref, hw2_ref, hb2_ref, hw3_ref, hb3_ref,
                     o_ref, *, ker_size, emb_size):
    x0 = x_ref[...]                       # [N, feat]
    adj = adj_ref[...]                    # [N, N]
    n = x0.shape[0]

    # Hoisted pairwise spectral differences (spec = original x[:, :emb_size]):
    # diff_d[i, j] = spec[j, d] - spec[i, d].  Only 3 broadcasts for the whole
    # forward (shared by all 4 layers and all K Gaussian kernels).
    diffs = []
    for d in range(emb_size):             # static unroll (emb_size = 3)
        row = specT_ref[d:d + 1, :]       # [1, N] -> spec[j, d]
        col = x_ref[:, d:d + 1]           # [N, 1] -> spec[i, d]
        diffs.append(row - col)           # [N, N]

    def graph_conv(x_in, wcat_ref, b_ref, mu_ref, sig_ref):
        f_out = b_ref.shape[1]
        # All K weight matmuls in one MXU call: [N, F_in] @ [F_in, K*F_out].
        wx_all = jnp.dot(x_in, wcat_ref[...],
                         preferred_element_type=jnp.float32)
        q_blocks, wx_blocks = [], []
        for k in range(ker_size):                    # static unroll (K small)
            dist = jnp.zeros((n, n), jnp.float32)
            for d in range(emb_size):                # static unroll (E = 3)
                mu = mu_ref[k * emb_size + d]        # scalar from SMEM
                s = sig_ref[k * emb_size + d]        # scalar from SMEM
                dd = diffs[d] - mu
                dist = dist + (dd * dd) * (1.0 / (s * s))   # scalar recip
            q_blocks.append(jnp.exp(-dist) * adj)                   # [N, N]
            wx_blocks.append(wx_all[:, k * f_out:(k + 1) * f_out])  # [N, O]
        # Single aggregation matmul, contraction dim K*N (=128 for K=4, N=32).
        q_cat = jnp.concatenate(q_blocks, axis=1)        # [N, K*N]
        wx_stack = jnp.concatenate(wx_blocks, axis=0)    # [K*N, F_out]
        out = jnp.dot(q_cat, wx_stack, preferred_element_type=jnp.float32)
        return _leaky_relu(out + b_ref[...], 0.01)       # fused gc*_2 LReLU

    # DenseNet-style growth, newest features first (matches torch.cat order).
    x1 = graph_conv(x0, wc1_ref, b1_ref, mu1_ref, sg1_ref)          # [N, hid1]
    xc = jnp.concatenate([x1, x0], axis=1)
    x2 = graph_conv(xc, wc2_ref, b2_ref, mu2_ref, sg2_ref)          # [N, hid2]
    xc = jnp.concatenate([x2, xc], axis=1)
    x3 = graph_conv(xc, wc3_ref, b3_ref, mu3_ref, sg3_ref)          # [N, hid3]
    xc = jnp.concatenate([x3, xc], axis=1)
    x4 = graph_conv(xc, wc4_ref, b4_ref, mu4_ref, sg4_ref)          # [N, par]

    # AdaptiveAvgPool2d((1, par)) on [1, N, par]: identity along width,
    # mean over the node (height) axis.
    pooled = jnp.mean(x4, axis=0, keepdims=True)                    # [1, par]
    h = jnp.dot(pooled, hw1_ref[...],
                preferred_element_type=jnp.float32) + hb1_ref[...]
    h = _leaky_relu(h, 0.01)
    h = jnp.dot(h, hw2_ref[...],
                preferred_element_type=jnp.float32) + hb2_ref[...]
    h = _leaky_relu(h, 0.01)
    h = jnp.dot(h, hw3_ref[...],
                preferred_element_type=jnp.float32) + hb3_ref[...]
    o_ref[...] = h                        # reference does NOT apply lin3act


# ---------------------------------------------------------------------------
# Wrapper: one pallas_call for the whole forward
# ---------------------------------------------------------------------------
def gcn_forward(x, adj, gc1, gc2, gc3, gc4, head_params):
    ker_size = gc1[0].shape[0]
    emb_size = gc1[2].shape[1]
    specT = jnp.transpose(x[:, :emb_size])        # [E, N], once per forward

    def prep(gc):
        w, b, mu, sig = gc                        # w: [K, F_in, F_out]
        k, f_in, f_out = w.shape
        # [K, F_in, F_out] -> [F_in, K*F_out] so the K weight matmuls batch
        # into one MXU call inside the kernel (one-time param transform).
        w_cat = jnp.transpose(w, (1, 0, 2)).reshape(f_in, k * f_out)
        return w_cat, b, mu.reshape(-1), sig.reshape(-1)

    layer_args = []
    for gc in (gc1, gc2, gc3, gc4):
        layer_args.extend(prep(gc))

    kernel = functools.partial(gcn_fused_kernel,
                               ker_size=ker_size, emb_size=emb_size)
    vmem = pl.BlockSpec(memory_space=pltpu.MemorySpace.VMEM)
    smem = pl.BlockSpec(memory_space=pltpu.MemorySpace.SMEM)
    in_specs = ([vmem, vmem, vmem]                        # x, specT, adj
                + [vmem, vmem, smem, smem] * 4            # (w_cat, b, mu, sig)
                + [vmem] * 6)                             # head params

    out = pl.pallas_call(
        kernel,
        out_shape=jax.ShapeDtypeStruct((1, 1), jnp.float32),
        in_specs=in_specs,
        out_specs=vmem,
    )(x, specT, adj, *layer_args, *head_params)
    return out.reshape((1,))                      # matches squeeze()+lin3 path


# ---------------------------------------------------------------------------
if __name__ == "__main__":
    key = jax.random.PRNGKey(0)
    N = 32               # number of graph nodes
    feat = 8             # node feature size (first 3 = spectral coords)
    hid1, hid2, hid3 = 16, 16, 16
    par = 8
    emb_size = 3
    ker_size = 4

    keys = iter(jax.random.split(key, 32))

    x = jax.random.normal(next(keys), (N, feat), jnp.float32)
    a = (jax.random.uniform(next(keys), (N, N)) < 0.2).astype(jnp.float32)
    adj = jnp.clip(a + a.T + jnp.eye(N, dtype=jnp.float32), 0.0, 1.0)

    def init_gc(k, f_in, f_out):
        k1, k2, k3, k4 = jax.random.split(k, 4)
        w = jax.random.normal(k1, (ker_size, f_in, f_out), jnp.float32) * 0.1
        b = jax.random.normal(k2, (1, f_out), jnp.float32) * 0.1
        mu = jax.random.normal(k3, (ker_size, emb_size), jnp.float32) * 0.1
        sig = jnp.abs(jax.random.normal(k4, (ker_size, emb_size),
                                        jnp.float32)) * 0.5 + 0.5
        return w, b, mu, sig

    gc1 = init_gc(next(keys), feat, hid1)
    gc2 = init_gc(next(keys), feat + hid1, hid2)
    gc3 = init_gc(next(keys), feat + hid1 + hid2, hid3)
    gc4 = init_gc(next(keys), feat + hid1 + hid2 + hid3, par)

    # nn.Linear weights stored directly as [in, out] (synthetic init).
    w1 = jax.random.normal(next(keys), (par, 16), jnp.float32) * 0.1
    b1 = jax.random.normal(next(keys), (1, 16), jnp.float32) * 0.1
    w2 = jax.random.normal(next(keys), (16, 8), jnp.float32) * 0.1
    b2 = jax.random.normal(next(keys), (1, 8), jnp.float32) * 0.1
    w3 = jax.random.normal(next(keys), (8, 1), jnp.float32) * 0.1
    b3 = jax.random.normal(next(keys), (1, 1), jnp.float32) * 0.1
    head_params = (w1, b1, w2, b2, w3, b3)

    fwd = jax.jit(gcn_forward)
    out = fwd(x, adj, gc1, gc2, gc3, gc4, head_params)
    out = jax.block_until_ready(out)
    assert out.shape == (1,)
    print("KERNEL_OK")
</pallas_src>

<mosaic_0001>
module attributes {stable_mosaic.version = 11 : i64} {
  func.func @gcn_fused_kernel(%arg0: memref<32x8xf32, #tpu.memory_space<vmem>>, %arg1: memref<3x32xf32, #tpu.memory_space<vmem>>, %arg2: memref<32x32xf32, #tpu.memory_space<vmem>>, %arg3: memref<8x64xf32, #tpu.memory_space<vmem>>, %arg4: memref<1x16xf32, #tpu.memory_space<vmem>>, %arg5: memref<12xf32, #tpu.memory_space<smem>>, %arg6: memref<12xf32, #tpu.memory_space<smem>>, %arg7: memref<24x64xf32, #tpu.memory_space<vmem>>, %arg8: memref<1x16xf32, #tpu.memory_space<vmem>>, %arg9: memref<12xf32, #tpu.memory_space<smem>>, %arg10: memref<12xf32, #tpu.memory_space<smem>>, %arg11: memref<40x64xf32, #tpu.memory_space<vmem>>, %arg12: memref<1x16xf32, #tpu.memory_space<vmem>>, %arg13: memref<12xf32, #tpu.memory_space<smem>>, %arg14: memref<12xf32, #tpu.memory_space<smem>>, %arg15: memref<56x32xf32, #tpu.memory_space<vmem>>, %arg16: memref<1x8xf32, #tpu.memory_space<vmem>>, %arg17: memref<12xf32, #tpu.memory_space<smem>>, %arg18: memref<12xf32, #tpu.memory_space<smem>>, %arg19: memref<8x16xf32, #tpu.memory_space<vmem>>, %arg20: memref<1x16xf32, #tpu.memory_space<vmem>>, %arg21: memref<16x8xf32, #tpu.memory_space<vmem>>, %arg22: memref<1x8xf32, #tpu.memory_space<vmem>>, %arg23: memref<8x1xf32, #tpu.memory_space<vmem>>, %arg24: memref<1x1xf32, #tpu.memory_space<vmem>>, %arg25: memref<1x1xf32, #tpu.memory_space<vmem>>) attributes {dimension_semantics = [], scalar_prefetch = 0 : i64, scratch_operands = 0 : i64, tpu.core_type = #tpu.core_type<tc>} {
    %c0 = arith.constant 0 : index
    %c0_0 = arith.constant 0 : index
    %0 = vector.load %arg0[%c0, %c0_0] : memref<32x8xf32, #tpu.memory_space<vmem>>, vector<32x8xf32>
    %c0_1 = arith.constant 0 : index
    %c0_2 = arith.constant 0 : index
    %1 = vector.load %arg2[%c0_1, %c0_2] : memref<32x32xf32, #tpu.memory_space<vmem>>, vector<32x32xf32>
    %c0_3 = arith.constant 0 : index
    %c0_4 = arith.constant 0 : index
    %2 = vector.load %arg1[%c0_3, %c0_4] : memref<3x32xf32, #tpu.memory_space<vmem>>, vector<1x32xf32>
    %c0_5 = arith.constant 0 : index
    %c0_6 = arith.constant 0 : index
    %3 = vector.load %arg0[%c0_5, %c0_6] : memref<32x8xf32, #tpu.memory_space<vmem>>, vector<32x1xf32>
    %4 = vector.broadcast %2 : vector<1x32xf32> to vector<32x32xf32>
    %5 = vector.broadcast %3 : vector<32x1xf32> to vector<32x32xf32>
    %6 = arith.subf %4, %5 : vector<32x32xf32>
    %c1 = arith.constant 1 : index
    %c0_7 = arith.constant 0 : index
    %7 = vector.load %arg1[%c1, %c0_7] : memref<3x32xf32, #tpu.memory_space<vmem>>, vector<1x32xf32>
    %c0_8 = arith.constant 0 : index
    %c1_9 = arith.constant 1 : index
    %8 = vector.load %arg0[%c0_8, %c1_9] : memref<32x8xf32, #tpu.memory_space<vmem>>, vector<32x1xf32>
    %9 = vector.broadcast %7 : vector<1x32xf32> to vector<32x32xf32>
    %10 = vector.broadcast %8 : vector<32x1xf32> to vector<32x32xf32>
    %11 = arith.subf %9, %10 : vector<32x32xf32>
    %c2 = arith.constant 2 : index
    %c0_10 = arith.constant 0 : index
    %12 = vector.load %arg1[%c2, %c0_10] : memref<3x32xf32, #tpu.memory_space<vmem>>, vector<1x32xf32>
    %c0_11 = arith.constant 0 : index
    %c2_12 = arith.constant 2 : index
    %13 = vector.load %arg0[%c0_11, %c2_12] : memref<32x8xf32, #tpu.memory_space<vmem>>, vector<32x1xf32>
    %14 = vector.broadcast %12 : vector<1x32xf32> to vector<32x32xf32>
    %15 = vector.broadcast %13 : vector<32x1xf32> to vector<32x32xf32>
    %16 = arith.subf %14, %15 : vector<32x32xf32>
    %c0_13 = arith.constant 0 : index
    %c0_14 = arith.constant 0 : index
    %17 = vector.load %arg3[%c0_13, %c0_14] : memref<8x64xf32, #tpu.memory_space<vmem>>, vector<8x64xf32>
    %cst = arith.constant dense<0.000000e+00> : vector<32x64xf32>
    %18 = tpu.matmul %0, %17, %cst {dimension_numbers = #tpu.dot_dimension_numbers<[1], [0], [0], [1], [0, 0, 1, 1], [], []>} : vector<32x8xf32>, vector<8x64xf32>, vector<32x64xf32> -> vector<32x64xf32>
    %cst_15 = arith.constant 0.000000e+00 : f32
    %19 = vector.broadcast %cst_15 : f32 to vector<32x32xf32>
    %c0_16 = arith.constant 0 : index
    %20 = memref.load %arg5[%c0_16] : memref<12xf32, #tpu.memory_space<smem>>
    %c0_17 = arith.constant 0 : index
    %21 = memref.load %arg6[%c0_17] : memref<12xf32, #tpu.memory_space<smem>>
    %22 = vector.broadcast %20 : f32 to vector<32x32xf32>
    %23 = arith.subf %6, %22 : vector<32x32xf32>
    %24 = arith.mulf %23, %23 : vector<32x32xf32>
    %25 = arith.mulf %21, %21 : f32
    %cst_18 = arith.constant 1.000000e+00 : f32
    %26 = arith.divf %cst_18, %25 : f32
    %27 = vector.broadcast %26 : f32 to vector<32x32xf32>
    %28 = arith.mulf %24, %27 : vector<32x32xf32>
    %29 = arith.addf %19, %28 : vector<32x32xf32>
    %c1_19 = arith.constant 1 : index
    %30 = memref.load %arg5[%c1_19] : memref<12xf32, #tpu.memory_space<smem>>
    %c1_20 = arith.constant 1 : index
    %31 = memref.load %arg6[%c1_20] : memref<12xf32, #tpu.memory_space<smem>>
    %32 = vector.broadcast %30 : f32 to vector<32x32xf32>
    %33 = arith.subf %11, %32 : vector<32x32xf32>
    %34 = arith.mulf %33, %33 : vector<32x32xf32>
    %35 = arith.mulf %31, %31 : f32
    %cst_21 = arith.constant 1.000000e+00 : f32
    %36 = arith.divf %cst_21, %35 : f32
    %37 = vector.broadcast %36 : f32 to vector<32x32xf32>
    %38 = arith.mulf %34, %37 : vector<32x32xf32>
    %39 = arith.addf %29, %38 : vector<32x32xf32>
    %c2_22 = arith.constant 2 : index
    %40 = memref.load %arg5[%c2_22] : memref<12xf32, #tpu.memory_space<smem>>
    %c2_23 = arith.constant 2 : index
    %41 = memref.load %arg6[%c2_23] : memref<12xf32, #tpu.memory_space<smem>>
    %42 = vector.broadcast %40 : f32 to vector<32x32xf32>
    %43 = arith.subf %16, %42 : vector<32x32xf32>
    %44 = arith.mulf %43, %43 : vector<32x32xf32>
    %45 = arith.mulf %41, %41 : f32
    %cst_24 = arith.constant 1.000000e+00 : f32
    %46 = arith.divf %cst_24, %45 : f32
    %47 = vector.broadcast %46 : f32 to vector<32x32xf32>
    %48 = arith.mulf %44, %47 : vector<32x32xf32>
    %49 = arith.addf %39, %48 : vector<32x32xf32>
    %cst_25 = arith.constant 0.000000e+00 : f32
    %50 = vector.broadcast %cst_25 : f32 to vector<32x32xf32>
    %51 = arith.subf %50, %49 : vector<32x32xf32>
    %52 = math.exp %51 : vector<32x32xf32>
    %53 = arith.mulf %52, %1 : vector<32x32xf32>
    %54 = vector.extract_strided_slice %18 {offsets = [0, 0], sizes = [32, 16], strides = [1, 1]} : vector<32x64xf32> to vector<32x16xf32>
    %cst_26 = arith.constant 0.000000e+00 : f32
    %55 = vector.broadcast %cst_26 : f32 to vector<32x32xf32>
    %c3 = arith.constant 3 : index
    %56 = memref.load %arg5[%c3] : memref<12xf32, #tpu.memory_space<smem>>
    %c3_27 = arith.constant 3 : index
    %57 = memref.load %arg6[%c3_27] : memref<12xf32, #tpu.memory_space<smem>>
    %58 = vector.broadcast %56 : f32 to vector<32x32xf32>
    %59 = arith.subf %6, %58 : vector<32x32xf32>
    %60 = arith.mulf %59, %59 : vector<32x32xf32>
    %61 = arith.mulf %57, %57 : f32
    %cst_28 = arith.constant 1.000000e+00 : f32
    %62 = arith.divf %cst_28, %61 : f32
    %63 = vector.broadcast %62 : f32 to vector<32x32xf32>
    %64 = arith.mulf %60, %63 : vector<32x32xf32>
    %65 = arith.addf %55, %64 : vector<32x32xf32>
    %c4 = arith.constant 4 : index
    %66 = memref.load %arg5[%c4] : memref<12xf32, #tpu.memory_space<smem>>
    %c4_29 = arith.constant 4 : index
    %67 = memref.load %arg6[%c4_29] : memref<12xf32, #tpu.memory_space<smem>>
    %68 = vector.broadcast %66 : f32 to vector<32x32xf32>
    %69 = arith.subf %11, %68 : vector<32x32xf32>
    %70 = arith.mulf %69, %69 : vector<32x32xf32>
    %71 = arith.mulf %67, %67 : f32
    %cst_30 = arith.constant 1.000000e+00 : f32
    %72 = arith.divf %cst_30, %71 : f32
    %73 = vector.broadcast %72 : f32 to vector<32x32xf32>
    %74 = arith.mulf %70, %73 : vector<32x32xf32>
    %75 = arith.addf %65, %74 : vector<32x32xf32>
    %c5 = arith.constant 5 : index
    %76 = memref.load %arg5[%c5] : memref<12xf32, #tpu.memory_space<smem>>
    %c5_31 = arith.constant 5 : index
    %77 = memref.load %arg6[%c5_31] : memref<12xf32, #tpu.memory_space<smem>>
    %78 = vector.broadcast %76 : f32 to vector<32x32xf32>
    %79 = arith.subf %16, %78 : vector<32x32xf32>
    %80 = arith.mulf %79, %79 : vector<32x32xf32>
    %81 = arith.mulf %77, %77 : f32
    %cst_32 = arith.constant 1.000000e+00 : f32
    %82 = arith.divf %cst_32, %81 : f32
    %83 = vector.broadcast %82 : f32 to vector<32x32xf32>
    %84 = arith.mulf %80, %83 : vector<32x32xf32>
    %85 = arith.addf %75, %84 : vector<32x32xf32>
    %cst_33 = arith.constant 0.000000e+00 : f32
    %86 = vector.broadcast %cst_33 : f32 to vector<32x32xf32>
    %87 = arith.subf %86, %85 : vector<32x32xf32>
    %88 = math.exp %87 : vector<32x32xf32>
    %89 = arith.mulf %88, %1 : vector<32x32xf32>
    %90 = vector.extract_strided_slice %18 {offsets = [0, 16], sizes = [32, 16], strides = [1, 1]} : vector<32x64xf32> to vector<32x16xf32>
    %cst_34 = arith.constant 0.000000e+00 : f32
    %91 = vector.broadcast %cst_34 : f32 to vector<32x32xf32>
    %c6 = arith.constant 6 : index
    %92 = memref.load %arg5[%c6] : memref<12xf32, #tpu.memory_space<smem>>
    %c6_35 = arith.constant 6 : index
    %93 = memref.load %arg6[%c6_35] : memref<12xf32, #tpu.memory_space<smem>>
    %94 = vector.broadcast %92 : f32 to vector<32x32xf32>
    %95 = arith.subf %6, %94 : vector<32x32xf32>
    %96 = arith.mulf %95, %95 : vector<32x32xf32>
    %97 = arith.mulf %93, %93 : f32
    %cst_36 = arith.constant 1.000000e+00 : f32
    %98 = arith.divf %cst_36, %97 : f32
    %99 = vector.broadcast %98 : f32 to vector<32x32xf32>
    %100 = arith.mulf %96, %99 : vector<32x32xf32>
    %101 = arith.addf %91, %100 : vector<32x32xf32>
    %c7 = arith.constant 7 : index
    %102 = memref.load %arg5[%c7] : memref<12xf32, #tpu.memory_space<smem>>
    %c7_37 = arith.constant 7 : index
    %103 = memref.load %arg6[%c7_37] : memref<12xf32, #tpu.memory_space<smem>>
    %104 = vector.broadcast %102 : f32 to vector<32x32xf32>
    %105 = arith.subf %11, %104 : vector<32x32xf32>
    %106 = arith.mulf %105, %105 : vector<32x32xf32>
    %107 = arith.mulf %103, %103 : f32
    %cst_38 = arith.constant 1.000000e+00 : f32
    %108 = arith.divf %cst_38, %107 : f32
    %109 = vector.broadcast %108 : f32 to vector<32x32xf32>
    %110 = arith.mulf %106, %109 : vector<32x32xf32>
    %111 = arith.addf %101, %110 : vector<32x32xf32>
    %c8 = arith.constant 8 : index
    %112 = memref.load %arg5[%c8] : memref<12xf32, #tpu.memory_space<smem>>
    %c8_39 = arith.constant 8 : index
    %113 = memref.load %arg6[%c8_39] : memref<12xf32, #tpu.memory_space<smem>>
    %114 = vector.broadcast %112 : f32 to vector<32x32xf32>
    %115 = arith.subf %16, %114 : vector<32x32xf32>
    %116 = arith.mulf %115, %115 : vector<32x32xf32>
    %117 = arith.mulf %113, %113 : f32
    %cst_40 = arith.constant 1.000000e+00 : f32
    %118 = arith.divf %cst_40, %117 : f32
    %119 = vector.broadcast %118 : f32 to vector<32x32xf32>
    %120 = arith.mulf %116, %119 : vector<32x32xf32>
    %121 = arith.addf %111, %120 : vector<32x32xf32>
    %cst_41 = arith.constant 0.000000e+00 : f32
    %122 = vector.broadcast %cst_41 : f32 to vector<32x32xf32>
    %123 = arith.subf %122, %121 : vector<32x32xf32>
    %124 = math.exp %123 : vector<32x32xf32>
    %125 = arith.mulf %124, %1 : vector<32x32xf32>
    %126 = vector.extract_strided_slice %18 {offsets = [0, 32], sizes = [32, 16], strides = [1, 1]} : vector<32x64xf32> to vector<32x16xf32>
    %cst_42 = arith.constant 0.000000e+00 : f32
    %127 = vector.broadcast %cst_42 : f32 to vector<32x32xf32>
    %c9 = arith.constant 9 : index
    %128 = memref.load %arg5[%c9] : memref<12xf32, #tpu.memory_space<smem>>
    %c9_43 = arith.constant 9 : index
    %129 = memref.load %arg6[%c9_43] : memref<12xf32, #tpu.memory_space<smem>>
    %130 = vector.broadcast %128 : f32 to vector<32x32xf32>
    %131 = arith.subf %6, %130 : vector<32x32xf32>
    %132 = arith.mulf %131, %131 : vector<32x32xf32>
    %133 = arith.mulf %129, %129 : f32
    %cst_44 = arith.constant 1.000000e+00 : f32
    %134 = arith.divf %cst_44, %133 : f32
    %135 = vector.broadcast %134 : f32 to vector<32x32xf32>
    %136 = arith.mulf %132, %135 : vector<32x32xf32>
    %137 = arith.addf %127, %136 : vector<32x32xf32>
    %c10 = arith.constant 10 : index
    %138 = memref.load %arg5[%c10] : memref<12xf32, #tpu.memory_space<smem>>
    %c10_45 = arith.constant 10 : index
    %139 = memref.load %arg6[%c10_45] : memref<12xf32, #tpu.memory_space<smem>>
    %140 = vector.broadcast %138 : f32 to vector<32x32xf32>
    %141 = arith.subf %11, %140 : vector<32x32xf32>
    %142 = arith.mulf %141, %141 : vector<32x32xf32>
    %143 = arith.mulf %139, %139 : f32
    %cst_46 = arith.constant 1.000000e+00 : f32
    %144 = arith.divf %cst_46, %143 : f32
    %145 = vector.broadcast %144 : f32 to vector<32x32xf32>
    %146 = arith.mulf %142, %145 : vector<32x32xf32>
    %147 = arith.addf %137, %146 : vector<32x32xf32>
    %c11 = arith.constant 11 : index
    %148 = memref.load %arg5[%c11] : memref<12xf32, #tpu.memory_space<smem>>
    %c11_47 = arith.constant 11 : index
    %149 = memref.load %arg6[%c11_47] : memref<12xf32, #tpu.memory_space<smem>>
    %150 = vector.broadcast %148 : f32 to vector<32x32xf32>
    %151 = arith.subf %16, %150 : vector<32x32xf32>
    %152 = arith.mulf %151, %151 : vector<32x32xf32>
    %153 = arith.mulf %149, %149 : f32
    %cst_48 = arith.constant 1.000000e+00 : f32
    %154 = arith.divf %cst_48, %153 : f32
    %155 = vector.broadcast %154 : f32 to vector<32x32xf32>
    %156 = arith.mulf %152, %155 : vector<32x32xf32>
    %157 = arith.addf %147, %156 : vector<32x32xf32>
    %cst_49 = arith.constant 0.000000e+00 : f32
    %158 = vector.broadcast %cst_49 : f32 to vector<32x32xf32>
    %159 = arith.subf %158, %157 : vector<32x32xf32>
    %160 = math.exp %159 : vector<32x32xf32>
    %161 = arith.mulf %160, %1 : vector<32x32xf32>
    %162 = vector.extract_strided_slice %18 {offsets = [0, 48], sizes = [32, 16], strides = [1, 1]} : vector<32x64xf32> to vector<32x16xf32>
    %163 = tpu.concatenate %53, %89, %125, %161 in 1 : vector<32x32xf32>, vector<32x32xf32>, vector<32x32xf32>, vector<32x32xf32> -> vector<32x128xf32>
    %164 = tpu.concatenate %54, %90, %126, %162 in 0 : vector<32x16xf32>, vector<32x16xf32>, vector<32x16xf32>, vector<32x16xf32> -> vector<128x16xf32>
    %cst_50 = arith.constant dense<0.000000e+00> : vector<32x16xf32>
    %165 = tpu.matmul %163, %164, %cst_50 {dimension_numbers = #tpu.dot_dimension_numbers<[1], [0], [0], [1], [0, 0, 1, 1], [], []>} : vector<32x128xf32>, vector<128x16xf32>, vector<32x16xf32> -> vector<32x16xf32>
    %c0_51 = arith.constant 0 : index
    %c0_52 = arith.constant 0 : index
    %166 = vector.load %arg4[%c0_51, %c0_52] : memref<1x16xf32, #tpu.memory_space<vmem>>, vector<1x16xf32>
    %167 = vector.broadcast %166 : vector<1x16xf32> to vector<32x16xf32>
    %168 = arith.addf %165, %167 : vector<32x16xf32>
    %cst_53 = arith.constant 0.000000e+00 : f32
    %169 = vector.broadcast %cst_53 : f32 to vector<32x16xf32>
    %170 = arith.cmpf ogt, %168, %169 : vector<32x16xf32>
    %cst_54 = arith.constant 0.00999999977 : f32
    %171 = vector.broadcast %cst_54 : f32 to vector<32x16xf32>
    %172 = arith.mulf %171, %168 : vector<32x16xf32>
    %173 = arith.select %170, %168, %172 : vector<32x16xi1>, vector<32x16xf32>
    %174 = tpu.concatenate %173, %0 in 1 : vector<32x16xf32>, vector<32x8xf32> -> vector<32x24xf32>
    %c0_55 = arith.constant 0 : index
    %c0_56 = arith.constant 0 : index
    %175 = vector.load %arg7[%c0_55, %c0_56] : memref<24x64xf32, #tpu.memory_space<vmem>>, vector<24x64xf32>
    %cst_57 = arith.constant dense<0.000000e+00> : vector<32x64xf32>
    %176 = tpu.matmul %174, %175, %cst_57 {dimension_numbers = #tpu.dot_dimension_numbers<[1], [0], [0], [1], [0, 0, 1, 1], [], []>} : vector<32x24xf32>, vector<24x64xf32>, vector<32x64xf32> -> vector<32x64xf32>
    %cst_58 = arith.constant 0.000000e+00 : f32
    %177 = vector.broadcast %cst_58 : f32 to vector<32x32xf32>
    %c0_59 = arith.constant 0 : index
    %178 = memref.load %arg9[%c0_59] : memref<12xf32, #tpu.memory_space<smem>>
    %c0_60 = arith.constant 0 : index
    %179 = memref.load %arg10[%c0_60] : memref<12xf32, #tpu.memory_space<smem>>
    %180 = vector.broadcast %178 : f32 to vector<32x32xf32>
    %181 = arith.subf %6, %180 : vector<32x32xf32>
    %182 = arith.mulf %181, %181 : vector<32x32xf32>
    %183 = arith.mulf %179, %179 : f32
    %cst_61 = arith.constant 1.000000e+00 : f32
    %184 = arith.divf %cst_61, %183 : f32
    %185 = vector.broadcast %184 : f32 to vector<32x32xf32>
    %186 = arith.mulf %182, %185 : vector<32x32xf32>
    %187 = arith.addf %177, %186 : vector<32x32xf32>
    %c1_62 = arith.constant 1 : index
    %188 = memref.load %arg9[%c1_62] : memref<12xf32, #tpu.memory_space<smem>>
    %c1_63 = arith.constant 1 : index
    %189 = memref.load %arg10[%c1_63] : memref<12xf32, #tpu.memory_space<smem>>
    %190 = vector.broadcast %188 : f32 to vector<32x32xf32>
    %191 = arith.subf %11, %190 : vector<32x32xf32>
    %192 = arith.mulf %191, %191 : vector<32x32xf32>
    %193 = arith.mulf %189, %189 : f32
    %cst_64 = arith.constant 1.000000e+00 : f32
    %194 = arith.divf %cst_64, %193 : f32
    %195 = vector.broadcast %194 : f32 to vector<32x32xf32>
    %196 = arith.mulf %192, %195 : vector<32x32xf32>
    %197 = arith.addf %187, %196 : vector<32x32xf32>
    %c2_65 = arith.constant 2 : index
    %198 = memref.load %arg9[%c2_65] : memref<12xf32, #tpu.memory_space<smem>>
    %c2_66 = arith.constant 2 : index
    %199 = memref.load %arg10[%c2_66] : memref<12xf32, #tpu.memory_space<smem>>
    %200 = vector.broadcast %198 : f32 to vector<32x32xf32>
    %201 = arith.subf %16, %200 : vector<32x32xf32>
    %202 = arith.mulf %201, %201 : vector<32x32xf32>
    %203 = arith.mulf %199, %199 : f32
    %cst_67 = arith.constant 1.000000e+00 : f32
    %204 = arith.divf %cst_67, %203 : f32
    %205 = vector.broadcast %204 : f32 to vector<32x32xf32>
    %206 = arith.mulf %202, %205 : vector<32x32xf32>
    %207 = arith.addf %197, %206 : vector<32x32xf32>
    %cst_68 = arith.constant 0.000000e+00 : f32
    %208 = vector.broadcast %cst_68 : f32 to vector<32x32xf32>
    %209 = arith.subf %208, %207 : vector<32x32xf32>
    %210 = math.exp %209 : vector<32x32xf32>
    %211 = arith.mulf %210, %1 : vector<32x32xf32>
    %212 = vector.extract_strided_slice %176 {offsets = [0, 0], sizes = [32, 16], strides = [1, 1]} : vector<32x64xf32> to vector<32x16xf32>
    %cst_69 = arith.constant 0.000000e+00 : f32
    %213 = vector.broadcast %cst_69 : f32 to vector<32x32xf32>
    %c3_70 = arith.constant 3 : index
    %214 = memref.load %arg9[%c3_70] : memref<12xf32, #tpu.memory_space<smem>>
    %c3_71 = arith.constant 3 : index
    %215 = memref.load %arg10[%c3_71] : memref<12xf32, #tpu.memory_space<smem>>
    %216 = vector.broadcast %214 : f32 to vector<32x32xf32>
    %217 = arith.subf %6, %216 : vector<32x32xf32>
    %218 = arith.mulf %217, %217 : vector<32x32xf32>
    %219 = arith.mulf %215, %215 : f32
    %cst_72 = arith.constant 1.000000e+00 : f32
    %220 = arith.divf %cst_72, %219 : f32
    %221 = vector.broadcast %220 : f32 to vector<32x32xf32>
    %222 = arith.mulf %218, %221 : vector<32x32xf32>
    %223 = arith.addf %213, %222 : vector<32x32xf32>
    %c4_73 = arith.constant 4 : index
    %224 = memref.load %arg9[%c4_73] : memref<12xf32, #tpu.memory_space<smem>>
    %c4_74 = arith.constant 4 : index
    %225 = memref.load %arg10[%c4_74] : memref<12xf32, #tpu.memory_space<smem>>
    %226 = vector.broadcast %224 : f32 to vector<32x32xf32>
    %227 = arith.subf %11, %226 : vector<32x32xf32>
    %228 = arith.mulf %227, %227 : vector<32x32xf32>
    %229 = arith.mulf %225, %225 : f32
    %cst_75 = arith.constant 1.000000e+00 : f32
    %230 = arith.divf %cst_75, %229 : f32
    %231 = vector.broadcast %230 : f32 to vector<32x32xf32>
    %232 = arith.mulf %228, %231 : vector<32x32xf32>
    %233 = arith.addf %223, %232 : vector<32x32xf32>
    %c5_76 = arith.constant 5 : index
    %234 = memref.load %arg9[%c5_76] : memref<12xf32, #tpu.memory_space<smem>>
    %c5_77 = arith.constant 5 : index
    %235 = memref.load %arg10[%c5_77] : memref<12xf32, #tpu.memory_space<smem>>
    %236 = vector.broadcast %234 : f32 to vector<32x32xf32>
    %237 = arith.subf %16, %236 : vector<32x32xf32>
    %238 = arith.mulf %237, %237 : vector<32x32xf32>
    %239 = arith.mulf %235, %235 : f32
    %cst_78 = arith.constant 1.000000e+00 : f32
    %240 = arith.divf %cst_78, %239 : f32
    %241 = vector.broadcast %240 : f32 to vector<32x32xf32>
    %242 = arith.mulf %238, %241 : vector<32x32xf32>
    %243 = arith.addf %233, %242 : vector<32x32xf32>
    %cst_79 = arith.constant 0.000000e+00 : f32
    %244 = vector.broadcast %cst_79 : f32 to vector<32x32xf32>
    %245 = arith.subf %244, %243 : vector<32x32xf32>
    %246 = math.exp %245 : vector<32x32xf32>
    %247 = arith.mulf %246, %1 : vector<32x32xf32>
    %248 = vector.extract_strided_slice %176 {offsets = [0, 16], sizes = [32, 16], strides = [1, 1]} : vector<32x64xf32> to vector<32x16xf32>
    %cst_80 = arith.constant 0.000000e+00 : f32
    %249 = vector.broadcast %cst_80 : f32 to vector<32x32xf32>
    %c6_81 = arith.constant 6 : index
    %250 = memref.load %arg9[%c6_81] : memref<12xf32, #tpu.memory_space<smem>>
    %c6_82 = arith.constant 6 : index
    %251 = memref.load %arg10[%c6_82] : memref<12xf32, #tpu.memory_space<smem>>
    %252 = vector.broadcast %250 : f32 to vector<32x32xf32>
    %253 = arith.subf %6, %252 : vector<32x32xf32>
    %254 = arith.mulf %253, %253 : vector<32x32xf32>
    %255 = arith.mulf %251, %251 : f32
    %cst_83 = arith.constant 1.000000e+00 : f32
    %256 = arith.divf %cst_83, %255 : f32
    %257 = vector.broadcast %256 : f32 to vector<32x32xf32>
    %258 = arith.mulf %254, %257 : vector<32x32xf32>
    %259 = arith.addf %249, %258 : vector<32x32xf32>
    %c7_84 = arith.constant 7 : index
    %260 = memref.load %arg9[%c7_84] : memref<12xf32, #tpu.memory_space<smem>>
    %c7_85 = arith.constant 7 : index
    %261 = memref.load %arg10[%c7_85] : memref<12xf32, #tpu.memory_space<smem>>
    %262 = vector.broadcast %260 : f32 to vector<32x32xf32>
    %263 = arith.subf %11, %262 : vector<32x32xf32>
    %264 = arith.mulf %263, %263 : vector<32x32xf32>
    %265 = arith.mulf %261, %261 : f32
    %cst_86 = arith.constant 1.000000e+00 : f32
    %266 = arith.divf %cst_86, %265 : f32
    %267 = vector.broadcast %266 : f32 to vector<32x32xf32>
    %268 = arith.mulf %264, %267 : vector<32x32xf32>
    %269 = arith.addf %259, %268 : vector<32x32xf32>
    %c8_87 = arith.constant 8 : index
    %270 = memref.load %arg9[%c8_87] : memref<12xf32, #tpu.memory_space<smem>>
    %c8_88 = arith.constant 8 : index
    %271 = memref.load %arg10[%c8_88] : memref<12xf32, #tpu.memory_space<smem>>
    %272 = vector.broadcast %270 : f32 to vector<32x32xf32>
    %273 = arith.subf %16, %272 : vector<32x32xf32>
    %274 = arith.mulf %273, %273 : vector<32x32xf32>
    %275 = arith.mulf %271, %271 : f32
    %cst_89 = arith.constant 1.000000e+00 : f32
    %276 = arith.divf %cst_89, %275 : f32
    %277 = vector.broadcast %276 : f32 to vector<32x32xf32>
    %278 = arith.mulf %274, %277 : vector<32x32xf32>
    %279 = arith.addf %269, %278 : vector<32x32xf32>
    %cst_90 = arith.constant 0.000000e+00 : f32
    %280 = vector.broadcast %cst_90 : f32 to vector<32x32xf32>
    %281 = arith.subf %280, %279 : vector<32x32xf32>
    %282 = math.exp %281 : vector<32x32xf32>
    %283 = arith.mulf %282, %1 : vector<32x32xf32>
    %284 = vector.extract_strided_slice %176 {offsets = [0, 32], sizes = [32, 16], strides = [1, 1]} : vector<32x64xf32> to vector<32x16xf32>
    %cst_91 = arith.constant 0.000000e+00 : f32
    %285 = vector.broadcast %cst_91 : f32 to vector<32x32xf32>
    %c9_92 = arith.constant 9 : index
    %286 = memref.load %arg9[%c9_92] : memref<12xf32, #tpu.memory_space<smem>>
    %c9_93 = arith.constant 9 : index
    %287 = memref.load %arg10[%c9_93] : memref<12xf32, #tpu.memory_space<smem>>
    %288 = vector.broadcast %286 : f32 to vector<32x32xf32>
    %289 = arith.subf %6, %288 : vector<32x32xf32>
    %290 = arith.mulf %289, %289 : vector<32x32xf32>
    %291 = arith.mulf %287, %287 : f32
    %cst_94 = arith.constant 1.000000e+00 : f32
    %292 = arith.divf %cst_94, %291 : f32
    %293 = vector.broadcast %292 : f32 to vector<32x32xf32>
    %294 = arith.mulf %290, %293 : vector<32x32xf32>
    %295 = arith.addf %285, %294 : vector<32x32xf32>
    %c10_95 = arith.constant 10 : index
    %296 = memref.load %arg9[%c10_95] : memref<12xf32, #tpu.memory_space<smem>>
    %c10_96 = arith.constant 10 : index
    %297 = memref.load %arg10[%c10_96] : memref<12xf32, #tpu.memory_space<smem>>
    %298 = vector.broadcast %296 : f32 to vector<32x32xf32>
    %299 = arith.subf %11, %298 : vector<32x32xf32>
    %300 = arith.mulf %299, %299 : vector<32x32xf32>
    %301 = arith.mulf %297, %297 : f32
    %cst_97 = arith.constant 1.000000e+00 : f32
    %302 = arith.divf %cst_97, %301 : f32
    %303 = vector.broadcast %302 : f32 to vector<32x32xf32>
    %304 = arith.mulf %300, %303 : vector<32x32xf32>
    %305 = arith.addf %295, %304 : vector<32x32xf32>
    %c11_98 = arith.constant 11 : index
    %306 = memref.load %arg9[%c11_98] : memref<12xf32, #tpu.memory_space<smem>>
    %c11_99 = arith.constant 11 : index
    %307 = memref.load %arg10[%c11_99] : memref<12xf32, #tpu.memory_space<smem>>
    %308 = vector.broadcast %306 : f32 to vector<32x32xf32>
    %309 = arith.subf %16, %308 : vector<32x32xf32>
    %310 = arith.mulf %309, %309 : vector<32x32xf32>
    %311 = arith.mulf %307, %307 : f32
    %cst_100 = arith.constant 1.000000e+00 : f32
    %312 = arith.divf %cst_100, %311 : f32
    %313 = vector.broadcast %312 : f32 to vector<32x32xf32>
    %314 = arith.mulf %310, %313 : vector<32x32xf32>
    %315 = arith.addf %305, %314 : vector<32x32xf32>
    %cst_101 = arith.constant 0.000000e+00 : f32
    %316 = vector.broadcast %cst_101 : f32 to vector<32x32xf32>
    %317 = arith.subf %316, %315 : vector<32x32xf32>
    %318 = math.exp %317 : vector<32x32xf32>
    %319 = arith.mulf %318, %1 : vector<32x32xf32>
    %320 = vector.extract_strided_slice %176 {offsets = [0, 48], sizes = [32, 16], strides = [1, 1]} : vector<32x64xf32> to vector<32x16xf32>
    %321 = tpu.concatenate %211, %247, %283, %319 in 1 : vector<32x32xf32>, vector<32x32xf32>, vector<32x32xf32>, vector<32x32xf32> -> vector<32x128xf32>
    %322 = tpu.concatenate %212, %248, %284, %320 in 0 : vector<32x16xf32>, vector<32x16xf32>, vector<32x16xf32>, vector<32x16xf32> -> vector<128x16xf32>
    %cst_102 = arith.constant dense<0.000000e+00> : vector<32x16xf32>
    %323 = tpu.matmul %321, %322, %cst_102 {dimension_numbers = #tpu.dot_dimension_numbers<[1], [0], [0], [1], [0, 0, 1, 1], [], []>} : vector<32x128xf32>, vector<128x16xf32>, vector<32x16xf32> -> vector<32x16xf32>
    %c0_103 = arith.constant 0 : index
    %c0_104 = arith.constant 0 : index
    %324 = vector.load %arg8[%c0_103, %c0_104] : memref<1x16xf32, #tpu.memory_space<vmem>>, vector<1x16xf32>
    %325 = vector.broadcast %324 : vector<1x16xf32> to vector<32x16xf32>
    %326 = arith.addf %323, %325 : vector<32x16xf32>
    %cst_105 = arith.constant 0.000000e+00 : f32
    %327 = vector.broadcast %cst_105 : f32 to vector<32x16xf32>
    %328 = arith.cmpf ogt, %326, %327 : vector<32x16xf32>
    %cst_106 = arith.constant 0.00999999977 : f32
    %329 = vector.broadcast %cst_106 : f32 to vector<32x16xf32>
    %330 = arith.mulf %329, %326 : vector<32x16xf32>
    %331 = arith.select %328, %326, %330 : vector<32x16xi1>, vector<32x16xf32>
    %332 = tpu.concatenate %331, %174 in 1 : vector<32x16xf32>, vector<32x24xf32> -> vector<32x40xf32>
    %c0_107 = arith.constant 0 : index
    %c0_108 = arith.constant 0 : index
    %333 = vector.load %arg11[%c0_107, %c0_108] : memref<40x64xf32, #tpu.memory_space<vmem>>, vector<40x64xf32>
    %cst_109 = arith.constant dense<0.000000e+00> : vector<32x64xf32>
    %334 = tpu.matmul %332, %333, %cst_109 {dimension_numbers = #tpu.dot_dimension_numbers<[1], [0], [0], [1], [0, 0, 1, 1], [], []>} : vector<32x40xf32>, vector<40x64xf32>, vector<32x64xf32> -> vector<32x64xf32>
    %cst_110 = arith.constant 0.000000e+00 : f32
    %335 = vector.broadcast %cst_110 : f32 to vector<32x32xf32>
    %c0_111 = arith.constant 0 : index
    %336 = memref.load %arg13[%c0_111] : memref<12xf32, #tpu.memory_space<smem>>
    %c0_112 = arith.constant 0 : index
    %337 = memref.load %arg14[%c0_112] : memref<12xf32, #tpu.memory_space<smem>>
    %338 = vector.broadcast %336 : f32 to vector<32x32xf32>
    %339 = arith.subf %6, %338 : vector<32x32xf32>
    %340 = arith.mulf %339, %339 : vector<32x32xf32>
    %341 = arith.mulf %337, %337 : f32
    %cst_113 = arith.constant 1.000000e+00 : f32
    %342 = arith.divf %cst_113, %341 : f32
    %343 = vector.broadcast %342 : f32 to vector<32x32xf32>
    %344 = arith.mulf %340, %343 : vector<32x32xf32>
    %345 = arith.addf %335, %344 : vector<32x32xf32>
    %c1_114 = arith.constant 1 : index
    %346 = memref.load %arg13[%c1_114] : memref<12xf32, #tpu.memory_space<smem>>
    %c1_115 = arith.constant 1 : index
    %347 = memref.load %arg14[%c1_115] : memref<12xf32, #tpu.memory_space<smem>>
    %348 = vector.broadcast %346 : f32 to vector<32x32xf32>
    %349 = arith.subf %11, %348 : vector<32x32xf32>
    %350 = arith.mulf %349, %349 : vector<32x32xf32>
    %351 = arith.mulf %347, %347 : f32
    %cst_116 = arith.constant 1.000000e+00 : f32
    %352 = arith.divf %cst_116, %351 : f32
    %353 = vector.broadcast %352 : f32 to vector<32x32xf32>
    %354 = arith.mulf %350, %353 : vector<32x32xf32>
    %355 = arith.addf %345, %354 : vector<32x32xf32>
    %c2_117 = arith.constant 2 : index
    %356 = memref.load %arg13[%c2_117] : memref<12xf32, #tpu.memory_space<smem>>
    %c2_118 = arith.constant 2 : index
    %357 = memref.load %arg14[%c2_118] : memref<12xf32, #tpu.memory_space<smem>>
    %358 = vector.broadcast %356 : f32 to vector<32x32xf32>
    %359 = arith.subf %16, %358 : vector<32x32xf32>
    %360 = arith.mulf %359, %359 : vector<32x32xf32>
    %361 = arith.mulf %357, %357 : f32
    %cst_119 = arith.constant 1.000000e+00 : f32
    %362 = arith.divf %cst_119, %361 : f32
    %363 = vector.broadcast %362 : f32 to vector<32x32xf32>
    %364 = arith.mulf %360, %363 : vector<32x32xf32>
    %365 = arith.addf %355, %364 : vector<32x32xf32>
    %cst_120 = arith.constant 0.000000e+00 : f32
    %366 = vector.broadcast %cst_120 : f32 to vector<32x32xf32>
    %367 = arith.subf %366, %365 : vector<32x32xf32>
    %368 = math.exp %367 : vector<32x32xf32>
    %369 = arith.mulf %368, %1 : vector<32x32xf32>
    %370 = vector.extract_strided_slice %334 {offsets = [0, 0], sizes = [32, 16], strides = [1, 1]} : vector<32x64xf32> to vector<32x16xf32>
    %cst_121 = arith.constant 0.000000e+00 : f32
    %371 = vector.broadcast %cst_121 : f32 to vector<32x32xf32>
    %c3_122 = arith.constant 3 : index
    %372 = memref.load %arg13[%c3_122] : memref<12xf32, #tpu.memory_space<smem>>
    %c3_123 = arith.constant 3 : index
    %373 = memref.load %arg14[%c3_123] : memref<12xf32, #tpu.memory_space<smem>>
    %374 = vector.broadcast %372 : f32 to vector<32x32xf32>
    %375 = arith.subf %6, %374 : vector<32x32xf32>
    %376 = arith.mulf %375, %375 : vector<32x32xf32>
    %377 = arith.mulf %373, %373 : f32
    %cst_124 = arith.constant 1.000000e+00 : f32
    %378 = arith.divf %cst_124, %377 : f32
    %379 = vector.broadcast %378 : f32 to vector<32x32xf32>
    %380 = arith.mulf %376, %379 : vector<32x32xf32>
    %381 = arith.addf %371, %380 : vector<32x32xf32>
    %c4_125 = arith.constant 4 : index
    %382 = memref.load %arg13[%c4_125] : memref<12xf32, #tpu.memory_space<smem>>
    %c4_126 = arith.constant 4 : index
    %383 = memref.load %arg14[%c4_126] : memref<12xf32, #tpu.memory_space<smem>>
    %384 = vector.broadcast %382 : f32 to vector<32x32xf32>
    %385 = arith.subf %11, %384 : vector<32x32xf32>
    %386 = arith.mulf %385, %385 : vector<32x32xf32>
    %387 = arith.mulf %383, %383 : f32
    %cst_127 = arith.constant 1.000000e+00 : f32
    %388 = arith.divf %cst_127, %387 : f32
    %389 = vector.broadcast %388 : f32 to vector<32x32xf32>
    %390 = arith.mulf %386, %389 : vector<32x32xf32>
    %391 = arith.addf %381, %390 : vector<32x32xf32>
    %c5_128 = arith.constant 5 : index
    %392 = memref.load %arg13[%c5_128] : memref<12xf32, #tpu.memory_space<smem>>
    %c5_129 = arith.constant 5 : index
    %393 = memref.load %arg14[%c5_129] : memref<12xf32, #tpu.memory_space<smem>>
    %394 = vector.broadcast %392 : f32 to vector<32x32xf32>
    %395 = arith.subf %16, %394 : vector<32x32xf32>
    %396 = arith.mulf %395, %395 : vector<32x32xf32>
    %397 = arith.mulf %393, %393 : f32
    %cst_130 = arith.constant 1.000000e+00 : f32
    %398 = arith.divf %cst_130, %397 : f32
    %399 = vector.broadcast %398 : f32 to vector<32x32xf32>
    %400 = arith.mulf %396, %399 : vector<32x32xf32>
    %401 = arith.addf %391, %400 : vector<32x32xf32>
    %cst_131 = arith.constant 0.000000e+00 : f32
    %402 = vector.broadcast %cst_131 : f32 to vector<32x32xf32>
    %403 = arith.subf %402, %401 : vector<32x32xf32>
    %404 = math.exp %403 : vector<32x32xf32>
    %405 = arith.mulf %404, %1 : vector<32x32xf32>
    %406 = vector.extract_strided_slice %334 {offsets = [0, 16], sizes = [32, 16], strides = [1, 1]} : vector<32x64xf32> to vector<32x16xf32>
    %cst_132 = arith.constant 0.000000e+00 : f32
    %407 = vector.broadcast %cst_132 : f32 to vector<32x32xf32>
    %c6_133 = arith.constant 6 : index
    %408 = memref.load %arg13[%c6_133] : memref<12xf32, #tpu.memory_space<smem>>
    %c6_134 = arith.constant 6 : index
    %409 = memref.load %arg14[%c6_134] : memref<12xf32, #tpu.memory_space<smem>>
    %410 = vector.broadcast %408 : f32 to vector<32x32xf32>
    %411 = arith.subf %6, %410 : vector<32x32xf32>
    %412 = arith.mulf %411, %411 : vector<32x32xf32>
    %413 = arith.mulf %409, %409 : f32
    %cst_135 = arith.constant 1.000000e+00 : f32
    %414 = arith.divf %cst_135, %413 : f32
    %415 = vector.broadcast %414 : f32 to vector<32x32xf32>
    %416 = arith.mulf %412, %415 : vector<32x32xf32>
    %417 = arith.addf %407, %416 : vector<32x32xf32>
    %c7_136 = arith.constant 7 : index
    %418 = memref.load %arg13[%c7_136] : memref<12xf32, #tpu.memory_space<smem>>
    %c7_137 = arith.constant 7 : index
    %419 = memref.load %arg14[%c7_137] : memref<12xf32, #tpu.memory_space<smem>>
    %420 = vector.broadcast %418 : f32 to vector<32x32xf32>
    %421 = arith.subf %11, %420 : vector<32x32xf32>
    %422 = arith.mulf %421, %421 : vector<32x32xf32>
    %423 = arith.mulf %419, %419 : f32
    %cst_138 = arith.constant 1.000000e+00 : f32
    %424 = arith.divf %cst_138, %423 : f32
    %425 = vector.broadcast %424 : f32 to vector<32x32xf32>
    %426 = arith.mulf %422, %425 : vector<32x32xf32>
    %427 = arith.addf %417, %426 : vector<32x32xf32>
    %c8_139 = arith.constant 8 : index
    %428 = memref.load %arg13[%c8_139] : memref<12xf32, #tpu.memory_space<smem>>
    %c8_140 = arith.constant 8 : index
    %429 = memref.load %arg14[%c8_140] : memref<12xf32, #tpu.memory_space<smem>>
    %430 = vector.broadcast %428 : f32 to vector<32x32xf32>
    %431 = arith.subf %16, %430 : vector<32x32xf32>
    %432 = arith.mulf %431, %431 : vector<32x32xf32>
    %433 = arith.mulf %429, %429 : f32
    %cst_141 = arith.constant 1.000000e+00 : f32
    %434 = arith.divf %cst_141, %433 : f32
    %435 = vector.broadcast %434 : f32 to vector<32x32xf32>
    %436 = arith.mulf %432, %435 : vector<32x32xf32>
    %437 = arith.addf %427, %436 : vector<32x32xf32>
    %cst_142 = arith.constant 0.000000e+00 : f32
    %438 = vector.broadcast %cst_142 : f32 to vector<32x32xf32>
    %439 = arith.subf %438, %437 : vector<32x32xf32>
    %440 = math.exp %439 : vector<32x32xf32>
    %441 = arith.mulf %440, %1 : vector<32x32xf32>
    %442 = vector.extract_strided_slice %334 {offsets = [0, 32], sizes = [32, 16], strides = [1, 1]} : vector<32x64xf32> to vector<32x16xf32>
    %cst_143 = arith.constant 0.000000e+00 : f32
    %443 = vector.broadcast %cst_143 : f32 to vector<32x32xf32>
    %c9_144 = arith.constant 9 : index
    %444 = memref.load %arg13[%c9_144] : memref<12xf32, #tpu.memory_space<smem>>
    %c9_145 = arith.constant 9 : index
    %445 = memref.load %arg14[%c9_145] : memref<12xf32, #tpu.memory_space<smem>>
    %446 = vector.broadcast %444 : f32 to vector<32x32xf32>
    %447 = arith.subf %6, %446 : vector<32x32xf32>
    %448 = arith.mulf %447, %447 : vector<32x32xf32>
    %449 = arith.mulf %445, %445 : f32
    %cst_146 = arith.constant 1.000000e+00 : f32
    %450 = arith.divf %cst_146, %449 : f32
    %451 = vector.broadcast %450 : f32 to vector<32x32xf32>
    %452 = arith.mulf %448, %451 : vector<32x32xf32>
    %453 = arith.addf %443, %452 : vector<32x32xf32>
    %c10_147 = arith.constant 10 : index
    %454 = memref.load %arg13[%c10_147] : memref<12xf32, #tpu.memory_space<smem>>
    %c10_148 = arith.constant 10 : index
    %455 = memref.load %arg14[%c10_148] : memref<12xf32, #tpu.memory_space<smem>>
    %456 = vector.broadcast %454 : f32 to vector<32x32xf32>
    %457 = arith.subf %11, %456 : vector<32x32xf32>
    %458 = arith.mulf %457, %457 : vector<32x32xf32>
    %459 = arith.mulf %455, %455 : f32
    %cst_149 = arith.constant 1.000000e+00 : f32
    %460 = arith.divf %cst_149, %459 : f32
    %461 = vector.broadcast %460 : f32 to vector<32x32xf32>
    %462 = arith.mulf %458, %461 : vector<32x32xf32>
    %463 = arith.addf %453, %462 : vector<32x32xf32>
    %c11_150 = arith.constant 11 : index
    %464 = memref.load %arg13[%c11_150] : memref<12xf32, #tpu.memory_space<smem>>
    %c11_151 = arith.constant 11 : index
    %465 = memref.load %arg14[%c11_151] : memref<12xf32, #tpu.memory_space<smem>>
    %466 = vector.broadcast %464 : f32 to vector<32x32xf32>
    %467 = arith.subf %16, %466 : vector<32x32xf32>
    %468 = arith.mulf %467, %467 : vector<32x32xf32>
    %469 = arith.mulf %465, %465 : f32
    %cst_152 = arith.constant 1.000000e+00 : f32
    %470 = arith.divf %cst_152, %469 : f32
    %471 = vector.broadcast %470 : f32 to vector<32x32xf32>
    %472 = arith.mulf %468, %471 : vector<32x32xf32>
    %473 = arith.addf %463, %472 : vector<32x32xf32>
    %cst_153 = arith.constant 0.000000e+00 : f32
    %474 = vector.broadcast %cst_153 : f32 to vector<32x32xf32>
    %475 = arith.subf %474, %473 : vector<32x32xf32>
    %476 = math.exp %475 : vector<32x32xf32>
    %477 = arith.mulf %476, %1 : vector<32x32xf32>
    %478 = vector.extract_strided_slice %334 {offsets = [0, 48], sizes = [32, 16], strides = [1, 1]} : vector<32x64xf32> to vector<32x16xf32>
    %479 = tpu.concatenate %369, %405, %441, %477 in 1 : vector<32x32xf32>, vector<32x32xf32>, vector<32x32xf32>, vector<32x32xf32> -> vector<32x128xf32>
    %480 = tpu.concatenate %370, %406, %442, %478 in 0 : vector<32x16xf32>, vector<32x16xf32>, vector<32x16xf32>, vector<32x16xf32> -> vector<128x16xf32>
    %cst_154 = arith.constant dense<0.000000e+00> : vector<32x16xf32>
    %481 = tpu.matmul %479, %480, %cst_154 {dimension_numbers = #tpu.dot_dimension_numbers<[1], [0], [0], [1], [0, 0, 1, 1], [], []>} : vector<32x128xf32>, vector<128x16xf32>, vector<32x16xf32> -> vector<32x16xf32>
    %c0_155 = arith.constant 0 : index
    %c0_156 = arith.constant 0 : index
    %482 = vector.load %arg12[%c0_155, %c0_156] : memref<1x16xf32, #tpu.memory_space<vmem>>, vector<1x16xf32>
    %483 = vector.broadcast %482 : vector<1x16xf32> to vector<32x16xf32>
    %484 = arith.addf %481, %483 : vector<32x16xf32>
    %cst_157 = arith.constant 0.000000e+00 : f32
    %485 = vector.broadcast %cst_157 : f32 to vector<32x16xf32>
    %486 = arith.cmpf ogt, %484, %485 : vector<32x16xf32>
    %cst_158 = arith.constant 0.00999999977 : f32
    %487 = vector.broadcast %cst_158 : f32 to vector<32x16xf32>
    %488 = arith.mulf %487, %484 : vector<32x16xf32>
    %489 = arith.select %486, %484, %488 : vector<32x16xi1>, vector<32x16xf32>
    %490 = tpu.concatenate %489, %332 in 1 : vector<32x16xf32>, vector<32x40xf32> -> vector<32x56xf32>
    %c0_159 = arith.constant 0 : index
    %c0_160 = arith.constant 0 : index
    %491 = vector.load %arg15[%c0_159, %c0_160] : memref<56x32xf32, #tpu.memory_space<vmem>>, vector<56x32xf32>
    %cst_161 = arith.constant dense<0.000000e+00> : vector<32x32xf32>
    %492 = tpu.matmul %490, %491, %cst_161 {dimension_numbers = #tpu.dot_dimension_numbers<[1], [0], [0], [1], [0, 0, 1, 1], [], []>} : vector<32x56xf32>, vector<56x32xf32>, vector<32x32xf32> -> vector<32x32xf32>
    %cst_162 = arith.constant 0.000000e+00 : f32
    %493 = vector.broadcast %cst_162 : f32 to vector<32x32xf32>
    %c0_163 = arith.constant 0 : index
    %494 = memref.load %arg17[%c0_163] : memref<12xf32, #tpu.memory_space<smem>>
    %c0_164 = arith.constant 0 : index
    %495 = memref.load %arg18[%c0_164] : memref<12xf32, #tpu.memory_space<smem>>
    %496 = vector.broadcast %494 : f32 to vector<32x32xf32>
    %497 = arith.subf %6, %496 : vector<32x32xf32>
    %498 = arith.mulf %497, %497 : vector<32x32xf32>
    %499 = arith.mulf %495, %495 : f32
    %cst_165 = arith.constant 1.000000e+00 : f32
    %500 = arith.divf %cst_165, %499 : f32
    %501 = vector.broadcast %500 : f32 to vector<32x32xf32>
    %502 = arith.mulf %498, %501 : vector<32x32xf32>
    %503 = arith.addf %493, %502 : vector<32x32xf32>
    %c1_166 = arith.constant 1 : index
    %504 = memref.load %arg17[%c1_166] : memref<12xf32, #tpu.memory_space<smem>>
    %c1_167 = arith.constant 1 : index
    %505 = memref.load %arg18[%c1_167] : memref<12xf32, #tpu.memory_space<smem>>
    %506 = vector.broadcast %504 : f32 to vector<32x32xf32>
    %507 = arith.subf %11, %506 : vector<32x32xf32>
    %508 = arith.mulf %507, %507 : vector<32x32xf32>
    %509 = arith.mulf %505, %505 : f32
    %cst_168 = arith.constant 1.000000e+00 : f32
    %510 = arith.divf %cst_168, %509 : f32
    %511 = vector.broadcast %510 : f32 to vector<32x32xf32>
    %512 = arith.mulf %508, %511 : vector<32x32xf32>
    %513 = arith.addf %503, %512 : vector<32x32xf32>
    %c2_169 = arith.constant 2 : index
    %514 = memref.load %arg17[%c2_169] : memref<12xf32, #tpu.memory_space<smem>>
    %c2_170 = arith.constant 2 : index
    %515 = memref.load %arg18[%c2_170] : memref<12xf32, #tpu.memory_space<smem>>
    %516 = vector.broadcast %514 : f32 to vector<32x32xf32>
    %517 = arith.subf %16, %516 : vector<32x32xf32>
    %518 = arith.mulf %517, %517 : vector<32x32xf32>
    %519 = arith.mulf %515, %515 : f32
    %cst_171 = arith.constant 1.000000e+00 : f32
    %520 = arith.divf %cst_171, %519 : f32
    %521 = vector.broadcast %520 : f32 to vector<32x32xf32>
    %522 = arith.mulf %518, %521 : vector<32x32xf32>
    %523 = arith.addf %513, %522 : vector<32x32xf32>
    %cst_172 = arith.constant 0.000000e+00 : f32
    %524 = vector.broadcast %cst_172 : f32 to vector<32x32xf32>
    %525 = arith.subf %524, %523 : vector<32x32xf32>
    %526 = math.exp %525 : vector<32x32xf32>
    %527 = arith.mulf %526, %1 : vector<32x32xf32>
    %528 = vector.extract_strided_slice %492 {offsets = [0, 0], sizes = [32, 8], strides = [1, 1]} : vector<32x32xf32> to vector<32x8xf32>
    %cst_173 = arith.constant 0.000000e+00 : f32
    %529 = vector.broadcast %cst_173 : f32 to vector<32x32xf32>
    %c3_174 = arith.constant 3 : index
    %530 = memref.load %arg17[%c3_174] : memref<12xf32, #tpu.memory_space<smem>>
    %c3_175 = arith.constant 3 : index
    %531 = memref.load %arg18[%c3_175] : memref<12xf32, #tpu.memory_space<smem>>
    %532 = vector.broadcast %530 : f32 to vector<32x32xf32>
    %533 = arith.subf %6, %532 : vector<32x32xf32>
    %534 = arith.mulf %533, %533 : vector<32x32xf32>
    %535 = arith.mulf %531, %531 : f32
    %cst_176 = arith.constant 1.000000e+00 : f32
    %536 = arith.divf %cst_176, %535 : f32
    %537 = vector.broadcast %536 : f32 to vector<32x32xf32>
    %538 = arith.mulf %534, %537 : vector<32x32xf32>
    %539 = arith.addf %529, %538 : vector<32x32xf32>
    %c4_177 = arith.constant 4 : index
    %540 = memref.load %arg17[%c4_177] : memref<12xf32, #tpu.memory_space<smem>>
    %c4_178 = arith.constant 4 : index
    %541 = memref.load %arg18[%c4_178] : memref<12xf32, #tpu.memory_space<smem>>
    %542 = vector.broadcast %540 : f32 to vector<32x32xf32>
    %543 = arith.subf %11, %542 : vector<32x32xf32>
    %544 = arith.mulf %543, %543 : vector<32x32xf32>
    %545 = arith.mulf %541, %541 : f32
    %cst_179 = arith.constant 1.000000e+00 : f32
    %546 = arith.divf %cst_179, %545 : f32
    %547 = vector.broadcast %546 : f32 to vector<32x32xf32>
    %548 = arith.mulf %544, %547 : vector<32x32xf32>
    %549 = arith.addf %539, %548 : vector<32x32xf32>
    %c5_180 = arith.constant 5 : index
    %550 = memref.load %arg17[%c5_180] : memref<12xf32, #tpu.memory_space<smem>>
    %c5_181 = arith.constant 5 : index
    %551 = memref.load %arg18[%c5_181] : memref<12xf32, #tpu.memory_space<smem>>
    %552 = vector.broadcast %550 : f32 to vector<32x32xf32>
    %553 = arith.subf %16, %552 : vector<32x32xf32>
    %554 = arith.mulf %553, %553 : vector<32x32xf32>
    %555 = arith.mulf %551, %551 : f32
    %cst_182 = arith.constant 1.000000e+00 : f32
    %556 = arith.divf %cst_182, %555 : f32
    %557 = vector.broadcast %556 : f32 to vector<32x32xf32>
    %558 = arith.mulf %554, %557 : vector<32x32xf32>
    %559 = arith.addf %549, %558 : vector<32x32xf32>
    %cst_183 = arith.constant 0.000000e+00 : f32
    %560 = vector.broadcast %cst_183 : f32 to vector<32x32xf32>
    %561 = arith.subf %560, %559 : vector<32x32xf32>
    %562 = math.exp %561 : vector<32x32xf32>
    %563 = arith.mulf %562, %1 : vector<32x32xf32>
    %564 = vector.extract_strided_slice %492 {offsets = [0, 8], sizes = [32, 8], strides = [1, 1]} : vector<32x32xf32> to vector<32x8xf32>
    %cst_184 = arith.constant 0.000000e+00 : f32
    %565 = vector.broadcast %cst_184 : f32 to vector<32x32xf32>
    %c6_185 = arith.constant 6 : index
    %566 = memref.load %arg17[%c6_185] : memref<12xf32, #tpu.memory_space<smem>>
    %c6_186 = arith.constant 6 : index
    %567 = memref.load %arg18[%c6_186] : memref<12xf32, #tpu.memory_space<smem>>
    %568 = vector.broadcast %566 : f32 to vector<32x32xf32>
    %569 = arith.subf %6, %568 : vector<32x32xf32>
    %570 = arith.mulf %569, %569 : vector<32x32xf32>
    %571 = arith.mulf %567, %567 : f32
    %cst_187 = arith.constant 1.000000e+00 : f32
    %572 = arith.divf %cst_187, %571 : f32
    %573 = vector.broadcast %572 : f32 to vector<32x32xf32>
    %574 = arith.mulf %570, %573 : vector<32x32xf32>
    %575 = arith.addf %565, %574 : vector<32x32xf32>
    %c7_188 = arith.constant 7 : index
    %576 = memref.load %arg17[%c7_188] : memref<12xf32, #tpu.memory_space<smem>>
    %c7_189 = arith.constant 7 : index
    %577 = memref.load %arg18[%c7_189] : memref<12xf32, #tpu.memory_space<smem>>
    %578 = vector.broadcast %576 : f32 to vector<32x32xf32>
    %579 = arith.subf %11, %578 : vector<32x32xf32>
    %580 = arith.mulf %579, %579 : vector<32x32xf32>
    %581 = arith.mulf %577, %577 : f32
    %cst_190 = arith.constant 1.000000e+00 : f32
    %582 = arith.divf %cst_190, %581 : f32
    %583 = vector.broadcast %582 : f32 to vector<32x32xf32>
    %584 = arith.mulf %580, %583 : vector<32x32xf32>
    %585 = arith.addf %575, %584 : vector<32x32xf32>
    %c8_191 = arith.constant 8 : index
    %586 = memref.load %arg17[%c8_191] : memref<12xf32, #tpu.memory_space<smem>>
    %c8_192 = arith.constant 8 : index
    %587 = memref.load %arg18[%c8_192] : memref<12xf32, #tpu.memory_space<smem>>
    %588 = vector.broadcast %586 : f32 to vector<32x32xf32>
    %589 = arith.subf %16, %588 : vector<32x32xf32>
    %590 = arith.mulf %589, %589 : vector<32x32xf32>
    %591 = arith.mulf %587, %587 : f32
    %cst_193 = arith.constant 1.000000e+00 : f32
    %592 = arith.divf %cst_193, %591 : f32
    %593 = vector.broadcast %592 : f32 to vector<32x32xf32>
    %594 = arith.mulf %590, %593 : vector<32x32xf32>
    %595 = arith.addf %585, %594 : vector<32x32xf32>
    %cst_194 = arith.constant 0.000000e+00 : f32
    %596 = vector.broadcast %cst_194 : f32 to vector<32x32xf32>
    %597 = arith.subf %596, %595 : vector<32x32xf32>
    %598 = math.exp %597 : vector<32x32xf32>
    %599 = arith.mulf %598, %1 : vector<32x32xf32>
    %600 = vector.extract_strided_slice %492 {offsets = [0, 16], sizes = [32, 8], strides = [1, 1]} : vector<32x32xf32> to vector<32x8xf32>
    %cst_195 = arith.constant 0.000000e+00 : f32
    %601 = vector.broadcast %cst_195 : f32 to vector<32x32xf32>
    %c9_196 = arith.constant 9 : index
    %602 = memref.load %arg17[%c9_196] : memref<12xf32, #tpu.memory_space<smem>>
    %c9_197 = arith.constant 9 : index
    %603 = memref.load %arg18[%c9_197] : memref<12xf32, #tpu.memory_space<smem>>
    %604 = vector.broadcast %602 : f32 to vector<32x32xf32>
    %605 = arith.subf %6, %604 : vector<32x32xf32>
    %606 = arith.mulf %605, %605 : vector<32x32xf32>
    %607 = arith.mulf %603, %603 : f32
    %cst_198 = arith.constant 1.000000e+00 : f32
    %608 = arith.divf %cst_198, %607 : f32
    %609 = vector.broadcast %608 : f32 to vector<32x32xf32>
    %610 = arith.mulf %606, %609 : vector<32x32xf32>
    %611 = arith.addf %601, %610 : vector<32x32xf32>
    %c10_199 = arith.constant 10 : index
    %612 = memref.load %arg17[%c10_199] : memref<12xf32, #tpu.memory_space<smem>>
    %c10_200 = arith.constant 10 : index
    %613 = memref.load %arg18[%c10_200] : memref<12xf32, #tpu.memory_space<smem>>
    %614 = vector.broadcast %612 : f32 to vector<32x32xf32>
    %615 = arith.subf %11, %614 : vector<32x32xf32>
    %616 = arith.mulf %615, %615 : vector<32x32xf32>
    %617 = arith.mulf %613, %613 : f32
    %cst_201 = arith.constant 1.000000e+00 : f32
    %618 = arith.divf %cst_201, %617 : f32
    %619 = vector.broadcast %618 : f32 to vector<32x32xf32>
    %620 = arith.mulf %616, %619 : vector<32x32xf32>
    %621 = arith.addf %611, %620 : vector<32x32xf32>
    %c11_202 = arith.constant 11 : index
    %622 = memref.load %arg17[%c11_202] : memref<12xf32, #tpu.memory_space<smem>>
    %c11_203 = arith.constant 11 : index
    %623 = memref.load %arg18[%c11_203] : memref<12xf32, #tpu.memory_space<smem>>
    %624 = vector.broadcast %622 : f32 to vector<32x32xf32>
    %625 = arith.subf %16, %624 : vector<32x32xf32>
    %626 = arith.mulf %625, %625 : vector<32x32xf32>
    %627 = arith.mulf %623, %623 : f32
    %cst_204 = arith.constant 1.000000e+00 : f32
    %628 = arith.divf %cst_204, %627 : f32
    %629 = vector.broadcast %628 : f32 to vector<32x32xf32>
    %630 = arith.mulf %626, %629 : vector<32x32xf32>
    %631 = arith.addf %621, %630 : vector<32x32xf32>
    %cst_205 = arith.constant 0.000000e+00 : f32
    %632 = vector.broadcast %cst_205 : f32 to vector<32x32xf32>
    %633 = arith.subf %632, %631 : vector<32x32xf32>
    %634 = math.exp %633 : vector<32x32xf32>
    %635 = arith.mulf %634, %1 : vector<32x32xf32>
    %636 = vector.extract_strided_slice %492 {offsets = [0, 24], sizes = [32, 8], strides = [1, 1]} : vector<32x32xf32> to vector<32x8xf32>
    %637 = tpu.concatenate %527, %563, %599, %635 in 1 : vector<32x32xf32>, vector<32x32xf32>, vector<32x32xf32>, vector<32x32xf32> -> vector<32x128xf32>
    %638 = tpu.concatenate %528, %564, %600, %636 in 0 : vector<32x8xf32>, vector<32x8xf32>, vector<32x8xf32>, vector<32x8xf32> -> vector<128x8xf32>
    %cst_206 = arith.constant dense<0.000000e+00> : vector<32x8xf32>
    %639 = tpu.matmul %637, %638, %cst_206 {dimension_numbers = #tpu.dot_dimension_numbers<[1], [0], [0], [1], [0, 0, 1, 1], [], []>} : vector<32x128xf32>, vector<128x8xf32>, vector<32x8xf32> -> vector<32x8xf32>
    %c0_207 = arith.constant 0 : index
    %c0_208 = arith.constant 0 : index
    %640 = vector.load %arg16[%c0_207, %c0_208] : memref<1x8xf32, #tpu.memory_space<vmem>>, vector<1x8xf32>
    %641 = vector.broadcast %640 : vector<1x8xf32> to vector<32x8xf32>
    %642 = arith.addf %639, %641 : vector<32x8xf32>
    %cst_209 = arith.constant 0.000000e+00 : f32
    %643 = vector.broadcast %cst_209 : f32 to vector<32x8xf32>
    %644 = arith.cmpf ogt, %642, %643 : vector<32x8xf32>
    %cst_210 = arith.constant 0.00999999977 : f32
    %645 = vector.broadcast %cst_210 : f32 to vector<32x8xf32>
    %646 = arith.mulf %645, %642 : vector<32x8xf32>
    %647 = arith.select %644, %642, %646 : vector<32x8xi1>, vector<32x8xf32>
    %cst_211 = arith.constant dense<0.000000e+00> : vector<8xf32>
    %648 = vector.multi_reduction <add>, %647, %cst_211 [0] : vector<32x8xf32> to vector<8xf32>
    %649 = vector.shape_cast %648 : vector<8xf32> to vector<1x8xf32>
    %cst_212 = arith.constant 3.200000e+01 : f32
    %650 = vector.broadcast %cst_212 : f32 to vector<1x8xf32>
    %651 = arith.divf %649, %650 : vector<1x8xf32>
    %c0_213 = arith.constant 0 : index
    %c0_214 = arith.constant 0 : index
    %652 = vector.load %arg19[%c0_213, %c0_214] : memref<8x16xf32, #tpu.memory_space<vmem>>, vector<8x16xf32>
    %cst_215 = arith.constant dense<0.000000e+00> : vector<1x16xf32>
    %653 = tpu.matmul %651, %652, %cst_215 {dimension_numbers = #tpu.dot_dimension_numbers<[1], [0], [0], [1], [0, 0, 1, 1], [], []>} : vector<1x8xf32>, vector<8x16xf32>, vector<1x16xf32> -> vector<1x16xf32>
    %c0_216 = arith.constant 0 : index
    %c0_217 = arith.constant 0 : index
    %654 = vector.load %arg20[%c0_216, %c0_217] : memref<1x16xf32, #tpu.memory_space<vmem>>, vector<1x16xf32>
    %655 = arith.addf %653, %654 : vector<1x16xf32>
    %cst_218 = arith.constant 0.000000e+00 : f32
    %656 = vector.broadcast %cst_218 : f32 to vector<1x16xf32>
    %657 = arith.cmpf ogt, %655, %656 : vector<1x16xf32>
    %cst_219 = arith.constant 0.00999999977 : f32
    %658 = vector.broadcast %cst_219 : f32 to vector<1x16xf32>
    %659 = arith.mulf %658, %655 : vector<1x16xf32>
    %660 = arith.select %657, %655, %659 : vector<1x16xi1>, vector<1x16xf32>
    %c0_220 = arith.constant 0 : index
    %c0_221 = arith.constant 0 : index
    %661 = vector.load %arg21[%c0_220, %c0_221] : memref<16x8xf32, #tpu.memory_space<vmem>>, vector<16x8xf32>
    %cst_222 = arith.constant dense<0.000000e+00> : vector<1x8xf32>
    %662 = tpu.matmul %660, %661, %cst_222 {dimension_numbers = #tpu.dot_dimension_numbers<[1], [0], [0], [1], [0, 0, 1, 1], [], []>} : vector<1x16xf32>, vector<16x8xf32>, vector<1x8xf32> -> vector<1x8xf32>
    %c0_223 = arith.constant 0 : index
    %c0_224 = arith.constant 0 : index
    %663 = vector.load %arg22[%c0_223, %c0_224] : memref<1x8xf32, #tpu.memory_space<vmem>>, vector<1x8xf32>
    %664 = arith.addf %662, %663 : vector<1x8xf32>
    %cst_225 = arith.constant 0.000000e+00 : f32
    %665 = vector.broadcast %cst_225 : f32 to vector<1x8xf32>
    %666 = arith.cmpf ogt, %664, %665 : vector<1x8xf32>
    %cst_226 = arith.constant 0.00999999977 : f32
    %667 = vector.broadcast %cst_226 : f32 to vector<1x8xf32>
    %668 = arith.mulf %667, %664 : vector<1x8xf32>
    %669 = arith.select %666, %664, %668 : vector<1x8xi1>, vector<1x8xf32>
    %c0_227 = arith.constant 0 : index
    %c0_228 = arith.constant 0 : index
    %670 = vector.load %arg23[%c0_227, %c0_228] : memref<8x1xf32, #tpu.memory_space<vmem>>, vector<8x1xf32>
    %cst_229 = arith.constant dense<0.000000e+00> : vector<1x1xf32>
    %671 = tpu.matmul %669, %670, %cst_229 {dimension_numbers = #tpu.dot_dimension_numbers<[1], [0], [0], [1], [0, 0, 1, 1], [], []>} : vector<1x8xf32>, vector<8x1xf32>, vector<1x1xf32> -> vector<1x1xf32>
    %c0_230 = arith.constant 0 : index
    %c0_231 = arith.constant 0 : index
    %672 = vector.load %arg24[%c0_230, %c0_231] : memref<1x1xf32, #tpu.memory_space<vmem>>, vector<1x1xf32>
    %673 = arith.addf %671, %672 : vector<1x1xf32>
    %c0_232 = arith.constant 0 : index
    %c0_233 = arith.constant 0 : index
    %674 = vector.load %arg25[%c0_232, %c0_233] : memref<1x1xf32, #tpu.memory_space<vmem>>, vector<1x1xf32>
    tpu.vector_store %arg25[%c0_232, %c0_233], %673 {strides = array<i32>} : memref<1x1xf32, #tpu.memory_space<vmem>>, vector<1x1xf32>,
    return
  }
}

</mosaic_0001>

<bundles_post_ra>
// kernel: gcn_forward.1
= control target key start
LH: loop header
LB: loop body
LE: loop exit
PB: predicated region body
PF: predicated region fallthrough
CT: control target
= control target key end

     0   :  { %s6239_s0 = inlined_call_operand.vmem [shape: f32[32,8], index: 0, kind: input, shape index: {}]   ;;  %s6240_s1 = inlined_call_operand.vmem [shape: f32[3,32], index: 1, kind: input, shape index: {}]   ;;  %s6241_s2 = inlined_call_operand.vmem [shape: f32[32,32], index: 2, kind: input, shape index: {}]   ;;  %s6242_s3 = inlined_call_operand.vmem [shape: f32[8,64], index: 3, kind: input, shape index: {}]   ;;  %s6243_s4 = inlined_call_operand.vmem [shape: f32[1,16], index: 4, kind: input, shape index: {}]   ;;  %s6244_s5 = inlined_call_operand.vmem [shape: f32[12], index: 5, kind: input, shape index: {}]   ;;  %s6245_s6 = inlined_call_operand.vmem [shape: f32[12], index: 6, kind: input, shape index: {}]   ;;  %s6246_s7 = inlined_call_operand.vmem [shape: f32[24,64], index: 7, kind: input, shape index: {}]   ;;  %s6247_s8 = inlined_call_operand.vmem [shape: f32[1,16], index: 8, kind: input, shape index: {}]   ;;  %s6248_s9 = inlined_call_operand.vmem [shape: f32[12], index: 9, kind: input, shape index: {}]   ;;  %s6249_s10 = inlined_call_operand.vmem [shape: f32[12], index: 10, kind: input, shape index: {}]   ;;  %s6250_s11 = inlined_call_operand.vmem [shape: f32[40,64], index: 11, kind: input, shape index: {}]   ;;  %s6251_s12 = inlined_call_operand.vmem [shape: f32[1,16], index: 12, kind: input, shape index: {}]   ;;  %s6252_s13 = inlined_call_operand.vmem [shape: f32[12], index: 13, kind: input, shape index: {}]   ;;  %s6253_s14 = inlined_call_operand.vmem [shape: f32[12], index: 14, kind: input, shape index: {}]   ;;  %s6254_s15 = inlined_call_operand.vmem [shape: f32[56,32], index: 15, kind: input, shape index: {}]   ;;  %s6255_s16 = inlined_call_operand.vmem [shape: f32[1,8], index: 16, kind: input, shape index: {}]   ;;  %s6256_s17 = inlined_call_operand.vmem [shape: f32[12], index: 17, kind: input, shape index: {}]   ;;  %s6257_s18 = inlined_call_operand.vmem [shape: f32[12], index: 18, kind: input, shape index: {}]   ;;  %s6258_s19 = inlined_call_operand.vmem [shape: f32[8,16], index: 19, kind: input, shape index: {}]   ;;  %s6259_s20 = inlined_call_operand.vmem [shape: f32[1,16], index: 20, kind: input, shape index: {}]   ;;  %s6260_s21 = inlined_call_operand.vmem [shape: f32[16,8], index: 21, kind: input, shape index: {}]   ;;  %s6261_s22 = inlined_call_operand.vmem [shape: f32[1,8], index: 22, kind: input, shape index: {}]   ;;  %s6262_s23 = inlined_call_operand.vmem [shape: f32[8,1], index: 23, kind: input, shape index: {}]   ;;  %s6263_s24 = inlined_call_operand.<no memory space> [shape: f32[1,1], index: 24, kind: input, shape index: {}]   ;;  %s6264_s25 = inlined_call_operand.hbm [shape: f32[1,1], index: 25, kind: output, shape index: {}]  }
   0x1   :  { %6336 = sst [smem:[#allocation68_spill]] %s6239_s0  ;;  %v30_v0 = vstv %s6263_s24 }
   0x2   :  { %6337 = sst [smem:[#allocation69_spill]] %s6240_s1  ;;  %31 = vst [vmem:[#allocation2] sm:$0x1] %v30_v0 }
   0x3   :  { %6338 = sst [smem:[#allocation70_spill]] %s6241_s2 }
   0x4   :  { %6339 = sst [smem:[#allocation71_spill]] %s6242_s3 }
   0x5   :  { %6340 = sst [smem:[#allocation72_spill]] %s6243_s4 }
   0x6   :  { %6341 = sst [smem:[#allocation73_spill]] %s6244_s5 }
   0x7   :  { %6342 = sst [smem:[#allocation74_spill]] %s6245_s6 }
   0x8   :  { %6343 = sst [smem:[#allocation75_spill]] %s6246_s7 }
   0x9   :  { %6344 = sst [smem:[#allocation76_spill]] %s6247_s8 }
   0xa   :  { %6345 = sst [smem:[#allocation77_spill]] %s6248_s9 }
   0xb   :  { %6346 = sst [smem:[#allocation78_spill]] %s6250_s11 }
   0xc   :  { %6347 = sst [smem:[#allocation79_spill]] %s6251_s12 }
   0xd   :  { %6348 = sst [smem:[#allocation80_spill]] %s6254_s15 }
   0xe   :  { %6349 = sst [smem:[#allocation81_spill]] %s6255_s16 }
   0xf   :  { %6350 = sst [smem:[#allocation82_spill]] %s6258_s19 }
  0x10   :  { %6351 = sst [smem:[#allocation83_spill]] %s6259_s20 }
  0x11   :  { %6352 = sst [smem:[#allocation84_spill]] %s6260_s21 }
  0x12   :  { %6353 = sst [smem:[#allocation85_spill]] %s6261_s22 }
  0x13   :  { %6354 = sst [smem:[#allocation86_spill]] %s6262_s23 }
  0x14   :  { %6355 = sst [smem:[#allocation87_spill]] %s6264_s25 }
  0x15   :  { %32 = vsyncpa [#allocation5], 0 }
  0x16   :  { %33 = vsyncpa [#allocation7], 0 }
  0x17   :  { %34 = vsyncpa [#allocation10], 0 }
  0x18   :  { %35 = vsyncpa [#allocation13], 0 }
  0x19   :  { %36 = vsyncpa [#allocation16], 0  ;;  %s6356_s7 = sld [smem:[#allocation74_spill]] }
  0x1f   :  { %s64_s3 = sshll.u32 %s6356_s7, 4  ;;  %s65_s3 = int_to_ptr.vmem [resolvable:$true] %s64_s3 }
  0x20   :  { %37 = vsyncpa [#allocation4], 0  ;;  %s88_s8 = sshll.u32 %s6249_s10, 4  ;;  %s4153_s27 = scalar_lea.vmem %s65_s3, 16  ;;  %s89_s8 = int_to_ptr.vmem [resolvable:$true] %s88_s8 }
  0x21   :  { %p4154_p0 = scmp.ne.s32.totalorder %s65_s3, %s4153_s27  ;;  %p4158_p1 = scmp.lt.s32.totalorder %s65_s3, %s65_s3 }
  0x22   :  { %p4159_p2 = scmp.lt.s32.totalorder %s4153_s27, %s4153_s27 }
  0x24   :  { %p4160_p3 = por %p4159_p2, %p4158_p1 }
  0x26   :  { %p4161_p4 = pnand %p4160_p3, %p4154_p0 }
  0x28   :  { %4164 = shalt.err (!%p4161_p4)
}
  0x29   :  { %s4281_s24 = smov [#allocation6]   ;;  %s4165_s4 = scalar_lea.vmem %s89_s8, 16 }
  0x2a   :  { %67 = dma.vmem_to_smem %s65_s3, 16, %s4281_s24, [#allocation7]  }
  0x2b   :  { %p4166_p5 = scmp.ne.s32.totalorder %s89_s8, %s4165_s4  ;;  %p4170_p6 = scmp.lt.s32.totalorder %s89_s8, %s89_s8 }
  0x2c   :  { %p4171_p7 = scmp.lt.s32.totalorder %s4165_s4, %s4165_s4 }
  0x2e   :  { %p4172_p8 = por %p4171_p7, %p4170_p6 }
  0x30   :  { %p4173_p9 = pnand %p4172_p8, %p4166_p5 }
  0x32   :  { %4176 = shalt.err (!%p4173_p9)
}
  0x33   :  { %s4282_s28 = smov [#allocation9]   ;;  %s112_s5 = sshll.u32 %s6253_s14, 4  ;;  %s113_s5 = int_to_ptr.vmem [resolvable:$true] %s112_s5 }
  0x34   :  { %91 = dma.vmem_to_smem %s89_s8, 16, %s4282_s28, [#allocation10]  }
  0x35   :  { %s6357_s2 = sld [smem:[#allocation73_spill]]  ;;  %s4177_s30 = scalar_lea.vmem %s113_s5, 16 }
  0x36   :  { %p4178_p10 = scmp.ne.s32.totalorder %s113_s5, %s4177_s30  ;;  %p4182_p11 = scmp.lt.s32.totalorder %s113_s5, %s113_s5 }
  0x37   :  { %p4183_p12 = scmp.lt.s32.totalorder %s4177_s30, %s4177_s30 }
  0x39   :  { %p4184_p13 = por %p4183_p12, %p4182_p11 }
  0x3b   :  { %s54_s6 = sshll.u32 %s6357_s2, 4  ;;  %p4185_p0 = pnand %p4184_p13, %p4178_p10  ;;  %s55_s6 = int_to_ptr.vmem [resolvable:$true] %s54_s6 }
  0x3d   :  { %4188 = shalt.err (!%p4185_p0)
}
  0x3e   :  { %s4283_s7 = smov [#allocation12]   ;;  %s4189_s3 = scalar_lea.vmem %s55_s6, 16 }
  0x3f   :  { %115 = dma.vmem_to_smem %s113_s5, 16, %s4283_s7, [#allocation13]  }
  0x40   :  { %p4190_p1 = scmp.ne.s32.totalorder %s55_s6, %s4189_s3  ;;  %p4194_p2 = scmp.lt.s32.totalorder %s55_s6, %s55_s6 }
  0x41   :  { %p4195_p3 = scmp.lt.s32.totalorder %s4189_s3, %s4189_s3 }
  0x43   :  { %p4196_p4 = por %p4195_p3, %p4194_p2 }
  0x45   :  { %p4197_p5 = pnand %p4196_p4, %p4190_p1 }
  0x47   :  { %4200 = shalt.err (!%p4197_p5)
}
  0x48   :  { %s4284_s14 = smov [#allocation3]   ;;  %s6358_s8 = sld [smem:[#allocation77_spill]] }
  0x49   :  { %57 = dma.vmem_to_smem %s55_s6, 16, %s4284_s14, [#allocation5]  }
  0x4a   :  { %s102_s28 = sshll.u32 %s6252_s13, 4  ;;  %s103_s28 = int_to_ptr.vmem [resolvable:$true] %s102_s28 }
  0x4e   :  { %s78_s27 = sshll.u32 %s6358_s8, 4  ;;  %s79_s27 = int_to_ptr.vmem [resolvable:$true] %s78_s27 }
  0x4f   :  { %s4201_s10 = scalar_lea.vmem %s79_s27, 16  ;;  %p4206_p7 = scmp.lt.s32.totalorder %s79_s27, %s79_s27 }
  0x50   :  { %p4202_p6 = scmp.ne.s32.totalorder %s79_s27, %s4201_s10  ;;  %p4207_p8 = scmp.lt.s32.totalorder %s4201_s10, %s4201_s10 }
  0x52   :  { %p4208_p9 = por %p4207_p8, %p4206_p7 }
  0x54   :  { %p4209_p10 = pnand %p4208_p9, %p4202_p6 }
  0x56   :  { %4212 = shalt.err (!%p4209_p10)
}
  0x57   :  { %s4285_s9 = smov [#allocation8]   ;;  %s4213_s5 = scalar_lea.vmem %s103_s28, 16 }
  0x58   :  { %81 = dma.vmem_to_smem %s79_s27, 16, %s4285_s9, [#allocation7]  }
  0x59   :  { %p4214_p11 = scmp.ne.s32.totalorder %s103_s28, %s4213_s5  ;;  %p4218_p12 = scmp.lt.s32.totalorder %s103_s28, %s103_s28 }
  0x5a   :  { %p4219_p13 = scmp.lt.s32.totalorder %s4213_s5, %s4213_s5 }
  0x5c   :  { %p4220_p0 = por %p4219_p13, %p4218_p12 }
  0x5e   :  { %p4221_p1 = pnand %p4220_p0, %p4214_p11 }
  0x60   :  { %4224 = shalt.err (!%p4221_p1)
}
  0x61   :  { %s4286_s0 = smov [#allocation11]   ;;  %s126_s2 = sshll.u32 %s6256_s17, 4  ;;  %s127_s2 = int_to_ptr.vmem [resolvable:$true] %s126_s2 }
  0x62   :  { %105 = dma.vmem_to_smem %s103_s28, 16, %s4286_s0, [#allocation10]  }
  0x63   :  { %s136_s7 = sshll.u32 %s6257_s18, 4  ;;  %s4225_s3 = scalar_lea.vmem %s127_s2, 16  ;;  %s137_s7 = int_to_ptr.vmem [resolvable:$true] %s136_s7 }
  0x64   :  { %p4226_p2 = scmp.ne.s32.totalorder %s127_s2, %s4225_s3  ;;  %p4230_p3 = scmp.lt.s32.totalorder %s127_s2, %s127_s2 }
  0x65   :  { %p4231_p4 = scmp.lt.s32.totalorder %s4225_s3, %s4225_s3 }
  0x67   :  { %p4232_p5 = por %p4231_p4, %p4230_p3 }
  0x69   :  { %p4233_p6 = pnand %p4232_p5, %p4226_p2 }
  0x6b   :  { %4236 = shalt.err (!%p4233_p6)
}
  0x6c   :  { %s4287_s14 = smov [#allocation14]   ;;  %s4237_s26 = scalar_lea.vmem %s137_s7, 16 }
  0x6d   :  { %129 = dma.vmem_to_smem %s127_s2, 16, %s4287_s14, [#allocation13]  }
  0x6e   :  { %p4238_p7 = scmp.ne.s32.totalorder %s137_s7, %s4237_s26  ;;  %p4242_p8 = scmp.lt.s32.totalorder %s137_s7, %s137_s7 }
  0x6f   :  { %p4243_p9 = scmp.lt.s32.totalorder %s4237_s26, %s4237_s26 }
  0x71   :  { %p4244_p10 = por %p4243_p9, %p4242_p8 }
  0x73   :  { %p4245_p11 = pnand %p4244_p10, %p4238_p7 }
  0x75   :  { %4248 = shalt.err (!%p4245_p11)
}
  0x76   :  { %s4288_s17 = smov [#allocation15]  }
  0x77   :  { %139 = dma.vmem_to_smem %s137_s7, 16, %s4288_s17, [#allocation16]  }
  0x78   :  { %4269 = dma.done.wait [#allocation5], 16  }
  0x79   :  { %4270 = vsyncadd [#allocation5], 4294967280 }
  0x7a   :  { %4271 = dma.done.wait [#allocation7], 32  }
  0x7b   :  { %4272 = vsyncadd [#allocation7], 4294967264 }
  0x7c   :  { %4273 = dma.done.wait [#allocation10], 32  }
  0x7d   :  { %4274 = vsyncadd [#allocation10], 4294967264 }
  0x7e   :  { %4275 = dma.done.wait [#allocation13], 32  }
  0x7f   :  { %4276 = vsyncadd [#allocation13], 4294967264 }
  0x80   :  { %4277 = dma.done.wait [#allocation16], 16  }
  0x81   :  { %4278 = vsyncadd [#allocation16], 4294967280 }
  0x82   :  { %176 = sfence }
  0x83   :  { %s6359_s8 = sld [smem:[#allocation71_spill]]  ;;  %vm265_vm0 = vcmask 64512   ;;  %v4289_v5 = vmov 1   ;;  %v4290_v6 = vmov 0   ;;  %v4291_v12 = vmov 2  }
  0x84   :  { %s6360_s4 = sld [smem:[#allocation68_spill]]  ;;  %3788 = vset.pattern.permute.xlu0 %v4289_v5  ;;  %3790 = vset.pattern.permute.xlu1 %v4290_v6  ;;  %vm759_vm1 = vcmask 261120   ;;  %vm764_vm2 = vcmask 523264   ;;  %vm769_vm3 = vcmask 785408   ;;  %vm930_vm6 = vcmask 130048  }
  0x85   :  { %s360_s0 = sld [smem:[#allocation6]]  ;;  %vm938_vm7 = vcmask 195584   ;;  %vm1613_vm12 = vcmask 326656  }
  0x86   :  { %s3220_s13 = sld [smem:[#allocation6 + $0x1]] }
  0x87   :  { %s3222_s29 = sld [smem:[#allocation6 + $0x2]] }
  0x88   :  { %s3224_s30 = sld [smem:[#allocation6 + $0x3]] }
  0x89   :  { %v264_v1 = vld [vmem:[%s6359_s8] sm:$0xff]  ;;  %s4488_s7 = sld [smem:[#allocation6 + $0x4]] }
  0x8a   :  { %v177_v2 = vld [vmem:[%s6360_s4] sm:$0xff]  ;;  %v4469_v3 = vld [vmem:[%s6360_s4 + $0x8] sm:$0xff]  ;;  %3445 = vmatprep.subr.mxu0 %v264_v1  ;;  %v4475_v4 = vld [vmem:[%s6360_s4 + $0x10] sm:$0xff]  ;;  %s4490_s3 = sld [smem:[#allocation6 + $0x5]] }
  0x8b   :  { %3447 = vmatprep.mubr.msk.f32.mxu0 %vm265_vm0, %v177_v2  ;;  %3446 = vmatpush3.msra.mxu0 %v264_v1  ;;  %v4485_v7 = vld [vmem:[%s6360_s4 + $0x18] sm:$0xff]  ;;  %s370_s14 = smul.f32 %s360_s0, %s360_s0  ;;  %s4494_s26 = sld [smem:[#allocation6 + $0x6]] }
  0x8c   :  { %3448 = vmatmul.mubr.msk.f32.vlgmr.msra.gmra.mxu0 %vm265_vm0, %v4469_v3  ;;  %197 = vperm.xlu1 %3790, %v4469_v3   ;;  %s394_s17 = smul.f32 %s3220_s13, %s3220_s13  ;;  %s4497_s18 = sld [smem:[#allocation6 + $0x7]] }
  0x8d   :  { %3450 = vmatprep.mubr.msk.f32.mxu0 %vm265_vm0, %v4475_v4  ;;  %220 = vperm.xlu0 %3788, %v177_v2   ;;  %v371_v8 = vstv %s370_s14  ;;  %s418_s1 = smul.f32 %s3222_s29, %s3222_s29  ;;  %s4500_s8 = sld [smem:[#allocation6 + $0x8]] }
  0x8e   :  { %3917 = vrcp.f32 %v371_v8  ;;  %v395_v9 = vstv %s394_s17  ;;  %s458_s27 = smul.f32 %s3224_s30, %s3224_s30  ;;  %s4502_s24 = sld [smem:[#allocation6 + $0x9]] }
  0x8f   :  { %3919 = vrcp.f32 %v395_v9  ;;  %v419_v10 = vstv %s418_s1  ;;  %s482_s28 = smul.f32 %s4488_s7, %s4488_s7  ;;  %s4506_s10 = sld [smem:[#allocation6 + $0xa]] }
  0x90   :  { %3451 = vmatmul.mubr.msk.f32.gmra.mxu0 %vm265_vm0, %v4485_v7  ;;  %3791 = vset.pattern.permute.xlu1 %v4289_v5  ;;  %3921 = vrcp.f32 %v419_v10  ;;  %v459_v11 = vstv %s458_s27  ;;  %s506_s9 = smul.f32 %s4490_s3, %s4490_s3  ;;  %s4510_s5 = sld [smem:[#allocation6 + $0xb]] }
  0x91   :  { %3789 = vset.pattern.permute.xlu0 %v4290_v6  ;;  %224 = vperm.xlu1 %3791, %v4469_v3   ;;  %3923 = vrcp.f32 %v459_v11  ;;  %v483_v13 = vstv %s482_s28  ;;  %s546_s0 = smul.f32 %s4494_s26, %s4494_s26  ;;  %s4515_s13 = sld [smem:[#allocation9]] }
  0x92   :  { %192 = vperm.xlu0 %3789, %v177_v2   ;;  %3925 = vrcp.f32 %v483_v13  ;;  %v507_v14 = vstv %s506_s9  ;;  %s570_s29 = smul.f32 %s4497_s18, %s4497_s18  ;;  %s4520_s2 = sld [smem:[#allocation9 + $0x1]] }
  0x93   :  { %3927 = vrcp.f32 %v507_v14  ;;  %v547_v15 = vstv %s546_s0  ;;  %s594_s6 = smul.f32 %s4500_s8, %s4500_s8  ;;  %s4524_s30 = sld [smem:[#allocation9 + $0x2]] }
  0x94   :  { %3929 = vrcp.f32 %v547_v15  ;;  %v571_v16 = vstv %s570_s29  ;;  %s634_s7 = smul.f32 %s4502_s24, %s4502_s24  ;;  %s4528_s3 = sld [smem:[#allocation9 + $0x3]] }
  0x95   :  { %3792 = vset.pattern.permute.xlu1 %v4291_v12  ;;  %3931 = vrcp.f32 %v571_v16  ;;  %v595_v17 = vstv %s594_s6  ;;  %s658_s14 = smul.f32 %s4506_s10, %s4506_s10  ;;  %s4532_s26 = sld [smem:[#allocation9 + $0x4]] }
  0x96   :  { %207 = vperm.xlu0 %3789, %v4485_v7   ;;  %245 = vperm.xlu1 %3792, %v177_v2   ;;  %3933 = vrcp.f32 %v595_v17  ;;  %v635_v18 = vstv %s634_s7  ;;  %s682_s17 = smul.f32 %s4510_s5, %s4510_s5  ;;  %s4537_s18 = sld [smem:[#allocation9 + $0x5]] }
  0x97   :  { %3935 = vrcp.f32 %v635_v18  ;;  %v659_v19 = vstv %s658_s14  ;;  %s1047_s1 = smul.f32 %s4515_s13, %s4515_s13  ;;  %s4543_s8 = sld [smem:[#allocation9 + $0x6]] }
  0x98   :  { %3937 = vrcp.f32 %v659_v19  ;;  %v683_v20 = vstv %s682_s17  ;;  %s1071_s27 = smul.f32 %s4520_s2, %s4520_s2  ;;  %s4547_s24 = sld [smem:[#allocation9 + $0x7]] }
  0x99   :  { %3939 = vrcp.f32 %v683_v20  ;;  %v1048_v21 = vstv %s1047_s1  ;;  %s1095_s28 = smul.f32 %s4524_s30, %s4524_s30  ;;  %s4551_s10 = sld [smem:[#allocation9 + $0x8]] }
  0x9a   :  { %3795 = vset.pattern.permute.xlu0 %v4291_v12  ;;  %3793 = vset.pattern.permute.xlu1 %v4290_v6  ;;  %3941 = vrcp.f32 %v1048_v21  ;;  %v1072_v22 = vstv %s1071_s27  ;;  %s1135_s9 = smul.f32 %s4528_s3, %s4528_s3  ;;  %s4555_s5 = sld [smem:[#allocation9 + $0x9]] }
  0x9b   :  { %249 = vperm.xlu0 %3795, %v4469_v3   ;;  %202 = vperm.xlu1 %3793, %v4475_v4   ;;  %v3918_v23 = vpop.eup %3917  ;;  %3943 = vrcp.f32 %v1072_v22  ;;  %v1096_v24 = vstv %s1095_s28  ;;  %s1159_s0 = smul.f32 %s4532_s26, %s4532_s26  ;;  %s4561_s13 = sld [smem:[#allocation9 + $0xa]] }
  0x9c   :  { %v3920_v25 = vpop.eup %3919  ;;  %3670 = vpush %v3918_v23  ;;  %3945 = vrcp.f32 %v1096_v24  ;;  %v1136_v26 = vstv %s1135_s9  ;;  %s1183_s29 = smul.f32 %s4537_s18, %s4537_s18  ;;  %s4566_s2 = sld [smem:[#allocation9 + $0xb]] }
  0x9d   :  { %v3922_v27 = vpop.eup %3921  ;;  %3672 = vpush %v3920_v25  ;;  %3947 = vrcp.f32 %v1136_v26  ;;  %v1160_v28 = vstv %s1159_s0  ;;  %s1223_s6 = smul.f32 %s4543_s8, %s4543_s8  ;;  %s4570_s30 = sld [smem:[#allocation12]] }
  0x9e   :  { %v3924_v29 = vpop.eup %3923  ;;  %3674 = vpush %v3922_v27  ;;  %3949 = vrcp.f32 %v1160_v28  ;;  %v1184_v30 = vstv %s1183_s29  ;;  %s1247_s7 = smul.f32 %s4547_s24, %s4547_s24  ;;  %s4574_s3 = sld [smem:[#allocation12 + $0x1]] }
  0x9f   :  { %3794 = vset.pattern.permute.xlu1 %v4289_v5  ;;  %257 = vperm.xlu0 %3795, %v4485_v7   ;;  %v3926_v31 = vpop.eup %3925  ;;  %3676 = vpush %v3924_v29  ;;  %3951 = vrcp.f32 %v1184_v30  ;;  %v1224_v32 = vstv %s1223_s6  ;;  %s1271_s14 = smul.f32 %s4551_s10, %s4551_s10  ;;  %s4578_s26 = sld [smem:[#allocation12 + $0x2]] }
  0xa0   :  { %228 = vperm.xlu1 %3794, %v4475_v4   ;;  %v3928_v33 = vpop.eup %3927  ;;  %3678 = vpush %v3926_v31  ;;  %3953 = vrcp.f32 %v1224_v32  ;;  %v1248_v34 = vstv %s1247_s7  ;;  %s1311_s17 = smul.f32 %s4555_s5, %s4555_s5  ;;  %s4583_s18 = sld [smem:[#allocation12 + $0x3]] }
  0xa1   :  { %v3930_v35 = vpop.eup %3929  ;;  %3680 = vpush %v3928_v33  ;;  %3955 = vrcp.f32 %v1248_v34  ;;  %v1272_v36 = vstv %s1271_s14  ;;  %s1335_s1 = smul.f32 %s4561_s13, %s4561_s13  ;;  %s4587_s8 = sld [smem:[#allocation12 + $0x4]] }
  0xa2   :  { %v3932_v37 = vpop.eup %3931  ;;  %3682 = vpush %v3930_v35  ;;  %3957 = vrcp.f32 %v1272_v36  ;;  %v1312_v38 = vstv %s1311_s17  ;;  %s1359_s27 = smul.f32 %s4566_s2, %s4566_s2  ;;  %s4591_s24 = sld [smem:[#allocation12 + $0x5]] }
  0xa3   :  { %v3934_v39 = vpop.eup %3933  ;;  %3684 = vpush %v3932_v37  ;;  %3959 = vrcp.f32 %v1312_v38  ;;  %v1336_v40 = vstv %s1335_s1  ;;  %s1722_s28 = smul.f32 %s4570_s30, %s4570_s30  ;;  %s4595_s10 = sld [smem:[#allocation12 + $0x6]] }
  0xa4   :  { %232 = vperm.xlu1 %3794, %v4485_v7   ;;  %v3936_v41 = vpop.eup %3935  ;;  %3686 = vpush %v3934_v39  ;;  %3961 = vrcp.f32 %v1336_v40  ;;  %v1360_v42 = vstv %s1359_s27  ;;  %s1746_s9 = smul.f32 %s4574_s3, %s4574_s3  ;;  %s4600_s5 = sld [smem:[#allocation12 + $0x7]] }
  0xa5   :  { %v3938_v43 = vpop.eup %3937  ;;  %3688 = vpush %v3936_v41  ;;  %3963 = vrcp.f32 %v1360_v42  ;;  %v1723_v44 = vstv %s1722_s28  ;;  %s1770_s0 = smul.f32 %s4578_s26, %s4578_s26  ;;  %s4605_s13 = sld [smem:[#allocation12 + $0x8]] }
  0xa6   :  { %v3940_v45 = vpop.eup %3939  ;;  %3690 = vpush %v3938_v43  ;;  %3965 = vrcp.f32 %v1723_v44  ;;  %v1747_v46 = vstv %s1746_s9  ;;  %s1810_s29 = smul.f32 %s4583_s18, %s4583_s18  ;;  %s4609_s2 = sld [smem:[#allocation12 + $0x9]] }
  0xa7   :  { %v3942_v47 = vpop.eup %3941  ;;  %3692 = vpush %v3940_v45  ;;  %3967 = vrcp.f32 %v1747_v46  ;;  %v1771_v48 = vstv %s1770_s0  ;;  %s1834_s6 = smul.f32 %s4587_s8, %s4587_s8  ;;  %s4613_s30 = sld [smem:[#allocation12 + $0xa]] }
  0xa8   :  { %3796 = vset.pattern.permute.xlu1 %v4291_v12  ;;  %v3944_v49 = vpop.eup %3943  ;;  %3694 = vpush %v3942_v47  ;;  %3969 = vrcp.f32 %v1771_v48  ;;  %v1811_v50 = vstv %s1810_s29  ;;  %s1858_s7 = smul.f32 %s4591_s24, %s4591_s24  ;;  %s4617_s3 = sld [smem:[#allocation12 + $0xb]] }
  0xa9   :  { %253 = vperm.xlu1 %3796, %v4475_v4   ;;  %v3946_v51 = vpop.eup %3945  ;;  %3696 = vpush %v3944_v49  ;;  %3971 = vrcp.f32 %v1811_v50  ;;  %v1835_v52 = vstv %s1834_s6  ;;  %s1898_s14 = smul.f32 %s4595_s10, %s4595_s10  ;;  %s4621_s26 = sld [smem:[#allocation15]] }
  0xaa   :  { %v3948_v53 = vpop.eup %3947  ;;  %3698 = vpush %v3946_v51  ;;  %3973 = vrcp.f32 %v1835_v52  ;;  %v1859_v54 = vstv %s1858_s7  ;;  %s1922_s17 = smul.f32 %s4600_s5, %s4600_s5  ;;  %s4625_s18 = sld [smem:[#allocation15 + $0x1]] }
  0xab   :  { %v3950_v55 = vpop.eup %3949  ;;  %3700 = vpush %v3948_v53  ;;  %3975 = vrcp.f32 %v1859_v54  ;;  %v1899_v56 = vstv %s1898_s14  ;;  %s1946_s1 = smul.f32 %s4605_s13, %s4605_s13  ;;  %s4629_s8 = sld [smem:[#allocation15 + $0x2]] }
  0xac   :  { %v3952_v57 = vpop.eup %3951  ;;  %3702 = vpush %v3950_v55  ;;  %3977 = vrcp.f32 %v1899_v56  ;;  %v1923_v58 = vstv %s1922_s17  ;;  %s1986_s27 = smul.f32 %s4609_s2, %s4609_s2  ;;  %s4633_s24 = sld [smem:[#allocation15 + $0x3]] }
  0xad   :  { %v3954_v59 = vpop.eup %3953  ;;  %3704 = vpush %v3952_v57  ;;  %3979 = vrcp.f32 %v1923_v58  ;;  %v1947_v60 = vstv %s1946_s1  ;;  %s2010_s28 = smul.f32 %s4613_s30, %s4613_s30  ;;  %s4637_s10 = sld [smem:[#allocation15 + $0x4]] }
  0xae   :  { %v3956_v61 = vpop.eup %3955  ;;  %3706 = vpush %v3954_v59  ;;  %3981 = vrcp.f32 %v1947_v60  ;;  %v1987_v62 = vstv %s1986_s27  ;;  %s2034_s9 = smul.f32 %s4617_s3, %s4617_s3  ;;  %s4641_s5 = sld [smem:[#allocation15 + $0x5]] }
  0xaf   :  { %v3958_v63 = vpop.eup %3957  ;;  %3708 = vpush %v3956_v61  ;;  %3983 = vrcp.f32 %v1987_v62  ;;  %v2011_v0 = vstv %s2010_s28  ;;  %s2399_s0 = smul.f32 %s4621_s26, %s4621_s26  ;;  %s4645_s13 = sld [smem:[#allocation15 + $0x6]] }
  0xb0   :  { %v3960_v1 = vpop.eup %3959  ;;  %3710 = vpush %v3958_v63  ;;  %3985 = vrcp.f32 %v2011_v0  ;;  %v2035_v2 = vstv %s2034_s9  ;;  %s2423_s29 = smul.f32 %s4625_s18, %s4625_s18  ;;  %s4649_s2 = sld [smem:[#allocation15 + $0x7]] }
  0xb1   :  { %v3962_v3 = vpop.eup %3961  ;;  %3712 = vpush %v3960_v1  ;;  %3987 = vrcp.f32 %v2035_v2  ;;  %v2400_v4 = vstv %s2399_s0  ;;  %s2447_s6 = smul.f32 %s4629_s8, %s4629_s8  ;;  %s4653_s30 = sld [smem:[#allocation15 + $0x8]] }
  0xb2   :  { %v3964_v5 = vpop.eup %3963  ;;  %3714 = vpush %v3962_v3  ;;  %3989 = vrcp.f32 %v2400_v4  ;;  %v2424_v6 = vstv %s2423_s29  ;;  %s2487_s7 = smul.f32 %s4633_s24, %s4633_s24  ;;  %s4657_s3 = sld [smem:[#allocation15 + $0x9]] }
  0xb3   :  { %v3966_v7 = vpop.eup %3965  ;;  %3716 = vpush %v3964_v5  ;;  %3991 = vrcp.f32 %v2424_v6  ;;  %v2448_v8 = vstv %s2447_s6  ;;  %s2511_s14 = smul.f32 %s4637_s10, %s4637_s10  ;;  %s4661_s26 = sld [smem:[#allocation15 + $0xa]] }
  0xb4   :  { %v3968_v9 = vpop.eup %3967  ;;  %3718 = vpush %v3966_v7  ;;  %3993 = vrcp.f32 %v2448_v8  ;;  %v2488_v10 = vstv %s2487_s7  ;;  %s2535_s17 = smul.f32 %s4641_s5, %s4641_s5  ;;  %s4665_s18 = sld [smem:[#allocation15 + $0xb]] }
  0xb5   :  { %v3970_v11 = vpop.eup %3969  ;;  %3720 = vpush %v3968_v9  ;;  %3995 = vrcp.f32 %v2488_v10  ;;  %v2512_v12 = vstv %s2511_s14  ;;  %s2575_s1 = smul.f32 %s4645_s13, %s4645_s13  ;;  %s359_s9 = sld [smem:[#allocation3]] }
  0xb6   :  { %v3972_v13 = vpop.eup %3971  ;;  %3722 = vpush %v3970_v11  ;;  %3997 = vrcp.f32 %v2512_v12  ;;  %v2536_v14 = vstv %s2535_s17  ;;  %s2599_s8 = smul.f32 %s4649_s2, %s4649_s2  ;;  %s3219_s5 = sld [smem:[#allocation3 + $0x1]] }
  0xb7   :  { %v3974_v15 = vpop.eup %3973  ;;  %3724 = vpush %v3972_v13  ;;  %3999 = vrcp.f32 %v2536_v14  ;;  %v2576_v16 = vstv %s2575_s1  ;;  %s2623_s27 = smul.f32 %s4653_s30, %s4653_s30  ;;  %s6361_s29 = sld [smem:[#allocation69_spill]] }
  0xb8   :  { %v3976_v17 = vpop.eup %3975  ;;  %3726 = vpush %v3974_v15  ;;  %4001 = vrcp.f32 %v2576_v16  ;;  %v2600_v18 = vstv %s2599_s8  ;;  %s2663_s24 = smul.f32 %s4657_s3, %s4657_s3  ;;  %s3221_s7 = sld [smem:[#allocation3 + $0x2]] }
  0xb9   :  { %v3978_v19 = vpop.eup %3977  ;;  %3728 = vpush %v3976_v17  ;;  %4003 = vrcp.f32 %v2600_v18  ;;  %v2624_v20 = vstv %s2623_s27  ;;  %s2687_s28 = smul.f32 %s4661_s26, %s4661_s26  ;;  %s3248_s0 = sld [smem:[#allocation8 + $0x2]] }
  0xba   :  { %v3980_v21 = vpop.eup %3979  ;;  %3730 = vpush %v3978_v19  ;;  %4005 = vrcp.f32 %v2624_v20  ;;  %v2664_v22 = vstv %s2663_s24  ;;  %s2711_s10 = smul.f32 %s4665_s18, %s4665_s18  ;;  %s3275_s25 = sld [smem:[#allocation11 + $0x2]] }
  0xbb   :  { %v3982_v23 = vpop.eup %3981  ;;  %3732 = vpush %v3980_v21  ;;  %4007 = vrcp.f32 %v2664_v22  ;;  %v2688_v24 = vstv %s2687_s28  ;;  %v4689_v44 = vstv %s359_s9  ;;  %s1036_s28 = sld [smem:[#allocation8]] }
  0xbc   :  { %v3984_v25 = vpop.eup %3983  ;;  %3734 = vpush %v3982_v23  ;;  %4009 = vrcp.f32 %v2688_v24  ;;  %v2712_v26 = vstv %s2711_s10  ;;  %v4699_v49 = vstv %s3219_s5  ;;  %s3246_s9 = sld [smem:[#allocation8 + $0x1]] }
  0xbd   :  { %v3986_v27 = vpop.eup %3985  ;;  %3736 = vpush %v3984_v25  ;;  %4011 = vrcp.f32 %v2712_v26  ;;  %v4682_v41 = vld [vmem:[%s6361_s29] ss:$0 sm:$0xff]  ;;  %v4687_v42 = vld [vmem:[%s6361_s29 + $0x1] ss:$0 sm:$0xff]  ;;  %6364 = vst [vmem:[#allocation26_spill] sm:$0xff] %v4699_v49  ;;  %s4824_s21 = sld [smem:[#allocation3 + $0x3]] }
  0xbe   :  { %v3988_v28 = vpop.eup %3987  ;;  %3738 = vpush %v3986_v27  ;;  %v4714_v58 = vld [vmem:[%s6361_s29 + $0x2] ss:$0 sm:$0xff]  ;;  %v4730_v6 = vstv %s3221_s7  ;;  %s4826_s16 = sld [smem:[#allocation3 + $0x4]] }
  0xbf   :  { %v3990_v29 = vpop.eup %3989  ;;  %3740 = vpush %v3988_v28  ;;  %6369 = vst [vmem:[#allocation31_spill] sm:$0xff] %v4730_v6  ;;  %v4774_v25 = vstv %s3248_s0  ;;  %s4832_s12 = sld [smem:[#allocation3 + $0x5]] }
  0xc0   :  { %v3992_v30 = vpop.eup %3991  ;;  %3742 = vpush %v3990_v29  ;;  %6376 = vst [vmem:[#allocation38_spill] sm:$0xff] %v4774_v25  ;;  %s4842_s11 = sld [smem:[#allocation3 + $0x7]] }
  0xc1   :  { %v3994_v31 = vpop.eup %3993  ;;  %3744 = vpush %v3992_v30  ;;  %v4766_v21 = vstv %s1036_s28 }
  0xc2   :  { %v3996_v32 = vpop.eup %3995  ;;  %3746 = vpush %v3994_v31  ;;  %6374 = vst [vmem:[#allocation36_spill] sm:$0xff] %v4766_v21  ;;  %v4772_v24 = vstv %s3246_s9  ;;  %s1711_s9 = sld [smem:[#allocation11]] }
  0xc3   :  { %v3998_v33 = vpop.eup %3997  ;;  %3748 = vpush %v3996_v32  ;;  %6375 = vst [vmem:[#allocation37_spill] sm:$0xff] %v4772_v24 }
  0xc4   :  { %v4000_v34 = vpop.eup %3999  ;;  %3750 = vpush %v3998_v33 }
  0xc5   :  { %v4002_v35 = vpop.eup %4001  ;;  %3752 = vpush %v4000_v34 }
  0xc6   :  { %v4004_v36 = vpop.eup %4003  ;;  %3754 = vpush %v4002_v35 }
  0xc7   :  { %v4006_v37 = vpop.eup %4005  ;;  %3756 = vpush %v4004_v36 }
  0xc8   :  { %v4008_v38 = vpop.eup %4007  ;;  %3758 = vpush %v4006_v37 }
  0xc9   :  { %v4010_v39 = vpop.eup %4009  ;;  %3760 = vpush %v4008_v38 }
  0xca   :  { %v4012_v40 = vpop.eup %4011  ;;  %3762 = vpush %v4010_v39 }
  0xcb   :  { %3764 = vpush %v4012_v40 }
  0xcd   :  { %s3671_s30 = spop %3670 }
  0xce   :  { %s3673_s3 = spop %3672  ;;  %v4709_v56 = vstv %s3671_s30 }
  0xcf   :  { %6367 = vst [vmem:[#allocation29_spill] sm:$0xff] %v4709_v56  ;;  %v4720_v61 = vstv %s3673_s3  ;;  %s3675_s17 = spop %3674 }
  0xd0   :  { %6368 = vst [vmem:[#allocation30_spill] sm:$0xff] %v4720_v61  ;;  %s4735_s18 = spop %3676  ;;  %v4742_v14 = vstv %s3675_s17 }
  0xd1   :  { %s4737_s1 = spop %3678  ;;  %6371 = vst [vmem:[#allocation33_spill] sm:$0xff] %v4742_v14 }
  0xd2   :  { %s4745_s8 = spop %3680 }
  0xd3   :  { %s4751_s27 = spop %3682 }
  0xd4   :  { %s4753_s24 = spop %3684 }
  0xd5   :  { %s4756_s10 = spop %3686 }
  0xd6   :  { %s4760_s5 = spop %3688 }
  0xd7   :  { %s4762_s13 = spop %3690 }
  0xd8   :  { %s4764_s29 = spop %3692 }
  0xd9   :  { %s3695_s2 = spop %3694 }
  0xda   :  { %s3697_s6 = spop %3696  ;;  %v4776_v28 = vstv %s3695_s2 }
  0xdb   :  { %6377 = vst [vmem:[#allocation39_spill] sm:$0xff] %v4776_v28  ;;  %v4785_v34 = vstv %s3697_s6  ;;  %s3699_s30 = spop %3698 }
  0xdc   :  { %6378 = vst [vmem:[#allocation40_spill] sm:$0xff] %v4785_v34  ;;  %v4791_v40 = vstv %s3699_s30  ;;  %s4794_s7 = spop %3700  ;;  %s3273_s30 = sld [smem:[#allocation11 + $0x1]] }
  0xdd   :  { %6379 = vst [vmem:[#allocation41_spill] sm:$0xff] %v4791_v40  ;;  %s4798_s3 = spop %3702 }
  0xde   :  { %s4804_s14 = spop %3704 }
  0xdf   :  { %s4806_s26 = spop %3706 }
  0xe0   :  { %s4808_s17 = spop %3708 }
  0xe1   :  { %s4810_s28 = spop %3710 }
  0xe2   :  { %s4812_s0 = spop %3712 }
  0xe3   :  { %s4814_s2 = spop %3714 }
  0xe4   :  { %6382 = sst [smem:[#allocation44_spill]] %s4814_s2  ;;  %s4816_s6 = spop %3716 }
  0xe5   :  { %6383 = sst [smem:[#allocation45_spill]] %s4816_s6  ;;  %s3719_s22 = spop %3718 }
  0xe6   :  { %s3721_s23 = spop %3720  ;;  %s6274_s6 = smov 96  }
  0xe7   :  { %s3723_s20 = spop %3722  ;;  %s6398_s2 = smov 80  }
  0xe8   :  { %s4830_s19 = spop %3724 }
  0xe9   :  { %6386 = sst [smem:[#allocation48_spill]] %s4830_s19  ;;  %s4840_s15 = spop %3726 }
  0xea   :  { %6389 = sst [smem:[#allocation51_spill]] %s4840_s15 }
 0x107   :  { %v198_v43 = vpop.permute.xlu1 %197 }
 0x108   :  { %v221_v45 = vpop.permute.xlu0 %220  ;;  %v4692_v46 = vsub.f32 %v4682_v41, %v198_v43 }
 0x109   :  { %v4695_v47 = vsub.f32 %v4687_v42, %v221_v45 }
 0x10a   :  { %6362 = vst [vmem:[#allocation24_spill] sm:$0xff] %v4692_v46  ;;  %v363_v48 = vsub.f32 %v4692_v46, %v4689_v44  ;;  %v1040_v23 = vsub.f32 %v4692_v46, %v4766_v21 }
 0x10b   :  { %6363 = vst [vmem:[#allocation25_spill] sm:$0xff] %v4695_v47  ;;  %v386_v50 = vsub.f32 %v4695_v47, %v4699_v49  ;;  %v1063_v29 = vsub.f32 %v4695_v47, %v4772_v24 }
 0x10c   :  { %v225_v51 = vpop.permute.xlu1 %224  ;;  %v367_v54 = vmul.f32 %v363_v48, %v363_v48  ;;  %v1044_v27 = vmul.f32 %v1040_v23, %v1040_v23 }
 0x10d   :  { %v193_v52 = vpop.permute.xlu0 %192  ;;  %v4704_v53 = vsub.f32 %v4687_v42, %v225_v51  ;;  %v390_v57 = vmul.f32 %v386_v50, %v386_v50  ;;  %v1067_v33 = vmul.f32 %v1063_v29, %v1063_v29 }
 0x10e   :  { %v4707_v55 = vsub.f32 %v4682_v41, %v193_v52  ;;  %v376_v0 = vmul.f32 %v4709_v56, %v367_v54  ;;  %v1053_v35 = vmul.f32 %v4776_v28, %v1044_v27 }
 0x10f   :  { %6365 = vst [vmem:[#allocation27_spill] sm:$0xff] %v4704_v53  ;;  %v387_v59 = vsub.f32 %v4704_v53, %v4699_v49  ;;  %v399_v4 = vmul.f32 %v4720_v61, %v390_v57  ;;  %v1064_v30 = vsub.f32 %v4704_v53, %v4772_v24  ;;  %v1076_v38 = vmul.f32 %v4785_v34, %v1067_v33 }
 0x110   :  { %6366 = vst [vmem:[#allocation28_spill] sm:$0xff] %v4707_v55  ;;  %v362_v60 = vsub.f32 %v4707_v55, %v4689_v44  ;;  %v1039_v22 = vsub.f32 %v4707_v55, %v4766_v21 }
 0x111   :  { %v4722_v62 = vpop.permute.xlu0 %207  ;;  %v246_v63 = vpop.permute.xlu1 %245  ;;  %v391_v1 = vmul.f32 %v387_v59, %v387_v59  ;;  %v1068_v36 = vmul.f32 %v1064_v30, %v1064_v30  ;;  %v4818_v59 = vstv %s1711_s9  ;;  %s4836_s9 = sld [smem:[#allocation3 + $0x6]] }
 0x112   :  { %v4726_v2 = vsub.f32 %v4714_v58, %v246_v63  ;;  %v366_v3 = vmul.f32 %v362_v60, %v362_v60  ;;  %v1043_v26 = vmul.f32 %v1039_v22, %v1039_v22  ;;  %6384 = vst [vmem:[#allocation46_spill] sm:$0xff] %v4818_v59  ;;  %v1714_v60 = vsub.f32 %v4707_v55, %v4818_v59 }
 0x113   :  { %v400_v5 = vmul.f32 %v4720_v61, %v391_v1  ;;  %v1077_v43 = vmul.f32 %v4785_v34, %v1068_v36  ;;  %v1715_v63 = vsub.f32 %v4692_v46, %v4818_v59 }
 0x114   :  { %v375_v7 = vmul.f32 %v4709_v56, %v366_v3  ;;  %v410_v8 = vsub.f32 %v4726_v2, %v4730_v6  ;;  %v1087_v31 = vsub.f32 %v4726_v2, %v4774_v25  ;;  %v1052_v32 = vmul.f32 %v4776_v28, %v1043_v26 }
 0x115   :  { %v404_v9 = vadd.f32 %v400_v5, %v376_v0  ;;  %v1081_v51 = vadd.f32 %v1077_v43, %v1053_v35  ;;  %v4828_v0 = vstv %s3273_s30  ;;  %v1718_v1 = vmul.f32 %v1714_v60, %v1714_v60  ;;  %s4848_s30 = sld [smem:[#allocation3 + $0x8]] }
 0x116   :  { %v250_v10 = vpop.permute.xlu0 %249  ;;  %v403_v11 = vadd.f32 %v399_v4, %v375_v7  ;;  %v414_v12 = vmul.f32 %v410_v8, %v410_v8  ;;  %v1091_v39 = vmul.f32 %v1087_v31, %v1087_v31  ;;  %v1080_v48 = vadd.f32 %v1076_v38, %v1052_v32  ;;  %6385 = vst [vmem:[#allocation47_spill] sm:$0xff] %v4828_v0 }
 0x117   :  { %v4740_v13 = vsub.f32 %v4714_v58, %v250_v10  ;;  %v4834_v3 = vstv %s3275_s25  ;;  %v1719_v4 = vmul.f32 %v1715_v63, %v1715_v63  ;;  %v4838_v5 = vstv %s3719_s22  ;;  %s4858_s22 = spop %3728  ;;  %s4860_s25 = sld [smem:[#allocation3 + $0x9]] }
 0x118   :  { %v423_v15 = vmul.f32 %v4742_v14, %v414_v12  ;;  %v1100_v50 = vmul.f32 %v4791_v40, %v1091_v39  ;;  %6387 = vst [vmem:[#allocation49_spill] sm:$0xff] %v4834_v3  ;;  %6388 = vst [vmem:[#allocation50_spill] sm:$0xff] %v4838_v5  ;;  %v1738_v7 = vsub.f32 %v4695_v47, %v4828_v0  ;;  %v4856_v12 = vstv %s3723_s20  ;;  %6392 = sst [smem:[#allocation54_spill]] %s4858_s22  ;;  %s4868_s15 = spop %3730 }
 0x119   :  { %6370 = vst [vmem:[#allocation32_spill] sm:$0xff] %v4740_v13  ;;  %v411_v16 = vsub.f32 %v4740_v13, %v4730_v6  ;;  %v1088_v37 = vsub.f32 %v4740_v13, %v4774_v25  ;;  %v1739_v8 = vsub.f32 %v4704_v53, %v4828_v0  ;;  %v1762_v10 = vsub.f32 %v4726_v2, %v4834_v3  ;;  %6394 = sst [smem:[#allocation56_spill]] %s4868_s15  ;;  %s6272_s20 = smov 80  }
 0x11a   :  { %v4749_v17 = vadd.f32 %v423_v15, %v403_v11  ;;  %v4800_v54 = vadd.f32 %v1100_v50, %v1080_v48  ;;  %v1763_v11 = vsub.f32 %v4740_v13, %v4834_v3  ;;  %6391 = vst [vmem:[#allocation53_spill] sm:$0xff] %v4856_v12  ;;  %v1727_v15 = vmul.f32 %v4838_v5, %v1718_v1  ;;  %s4872_s22 = sld [smem:[#allocation3 + $0xb]]  ;;  %s4880_s19 = spop %3732 }
 0x11b   :  { %v415_v18 = vmul.f32 %v411_v16, %v411_v16  ;;  %v1092_v45 = vmul.f32 %v1088_v37, %v1088_v37  ;;  %v1728_v16 = vmul.f32 %v4838_v5, %v1719_v4  ;;  %v1766_v23 = vmul.f32 %v1762_v10, %v1762_v10  ;;  %6395 = sst [smem:[#allocation57_spill]] %s4880_s19 }
 0x11c   :  { %6372 = vst [vmem:[#allocation34_spill] sm:$0xff] %v4749_v17  ;;  %6380 = vst [vmem:[#allocation42_spill] sm:$0xff] %v4800_v54  ;;  %v1767_v26 = vmul.f32 %v1763_v11, %v1763_v11  ;;  %s4886_s15 = sld [smem:[#allocation14]]  ;;  %v4893_v37 = vstv %s4826_s16  ;;  %v4902_v43 = vstv %s4824_s21  ;;  %v4914_v50 = vstv %s4836_s9 }
 0x11d   :  { %v424_v19 = vmul.f32 %v4742_v14, %v415_v18  ;;  %v1101_v52 = vmul.f32 %v4791_v40, %v1092_v45  ;;  %v1742_v18 = vmul.f32 %v1738_v7, %v1738_v7  ;;  %v1775_v31 = vmul.f32 %v4856_v12, %v1766_v23  ;;  %s3264_s9 = sld [smem:[#allocation8 + $0xa]] }
 0x11e   :  { %v1776_v32 = vmul.f32 %v4856_v12, %v1767_v26  ;;  %v4909_v45 = vstv %s4832_s12  ;;  %v474_v48 = vsub.f32 %v4695_v47, %v4893_v37  ;;  %s6402_s12 = smov 96   ;;  %v450_v63 = vsub.f32 %v4707_v55, %v4902_v43 }
 0x11f   :  { %v4758_v20 = vadd.f32 %v424_v19, %v404_v9  ;;  %v4802_v57 = vadd.f32 %v1101_v52, %v1081_v51  ;;  %v4850_v9 = vstv %s3721_s23  ;;  %v1743_v19 = vmul.f32 %v1739_v8, %v1739_v8  ;;  %s4866_s23 = sld [smem:[#allocation3 + $0xa]] }
 0x120   :  { %6390 = vst [vmem:[#allocation52_spill] sm:$0xff] %v4850_v9  ;;  %v1751_v27 = vmul.f32 %v4850_v9, %v1742_v18  ;;  %v4917_v51 = vstv %s4842_s11  ;;  %v4920_v52 = vstv %s4848_s30  ;;  %v4931_v1 = vstv %s4860_s25  ;;  %s3266_s30 = sld [smem:[#allocation8 + $0xb]] }
 0x121   :  { %6373 = vst [vmem:[#allocation35_spill] sm:$0xff] %v4758_v20  ;;  %6381 = vst [vmem:[#allocation43_spill] sm:$0xff] %v4802_v57  ;;  %v1752_v29 = vmul.f32 %v4850_v9, %v1743_v19  ;;  %v4937_v7 = vstv %s4872_s22  ;;  %v4942_v8 = vstv %s4735_s18  ;;  %v4945_v10 = vstv %s4737_s1  ;;  %s4294_s18 = smov 112   ;;  %s3285_s22 = sld [smem:[#allocation11 + $0x7]] }
 0x122   :  { %v1755_v33 = vadd.f32 %v1751_v27, %v1727_v15  ;;  %v4948_v11 = vstv %s4745_s8  ;;  %v4951_v15 = vstv %s4751_s27  ;;  %v4959_v18 = vstv %s4756_s10  ;;  %s3252_s8 = sld [smem:[#allocation8 + $0x4]] }
 0x123   :  { %v1756_v35 = vadd.f32 %v1752_v29, %v1728_v16  ;;  %v4956_v16 = vstv %s4753_s24  ;;  %v4962_v19 = vstv %s4760_s5  ;;  %v4965_v23 = vstv %s4762_s13  ;;  %s6407_s24 = sld [smem:[#allocation70_spill]]  ;;  %s4295_s13 = smov 32  }
 0x124   :  { %v4895_v38 = vadd.f32 %v1775_v31, %v1755_v33  ;;  %v451_v26 = vsub.f32 %v4692_v46, %v4902_v43  ;;  %v478_v27 = vmul.f32 %v474_v48, %v474_v48  ;;  %v562_v29 = vsub.f32 %v4695_v47, %v4917_v51  ;;  %s3254_s27 = sld [smem:[#allocation8 + $0x5]] }
 0x125   :  { %v4897_v39 = vadd.f32 %v1776_v32, %v1756_v35  ;;  %v4934_v4 = vstv %s4866_s23  ;;  %v4972_v31 = vstv %s4764_s29  ;;  %v454_v32 = vmul.f32 %v450_v63, %v450_v63  ;;  %s4296_s29 = smov 64   ;;  %s3256_s10 = sld [smem:[#allocation8 + $0x6]] }
 0x126   :  { %6399 = vst [vmem:[#allocation60_spill] sm:$0xff] %v4895_v38  ;;  %v475_v33 = vsub.f32 %v4704_v53, %v4893_v37  ;;  %v4979_v35 = vstv %s4886_s15  ;;  %v498_v48 = vsub.f32 %v4726_v2, %v4909_v45  ;;  %v538_v38 = vsub.f32 %v4707_v55, %v4914_v50  ;;  %s3260_s5 = sld [smem:[#allocation8 + $0x8]] }
 0x127   :  { %6400 = vst [vmem:[#allocation61_spill] sm:$0xff] %v4897_v39  ;;  %6403 = vst [vmem:[#allocation63_spill] sm:$0xff] %v4979_v35  ;;  %v626_v57 = vsub.f32 %v4707_v55, %v4931_v1  ;;  %v539_v54 = vsub.f32 %v4692_v46, %v4914_v50  ;;  %v627_v20 = vsub.f32 %v4692_v46, %v4931_v1  ;;  %s6447_s25 = sld [smem:[#allocation48_spill]] }
 0x128   :  { %v650_v17 = vsub.f32 %v4695_v47, %v4934_v4  ;;  %v487_v9 = vmul.f32 %v4945_v10, %v478_v27  ;;  %v566_v5 = vmul.f32 %v562_v29, %v562_v29  ;;  %v651_v3 = vsub.f32 %v4704_v53, %v4934_v4  ;;  %s3287_s23 = sld [smem:[#allocation11 + $0x8]] }
 0x129   :  { %v463_v0 = vmul.f32 %v4942_v8, %v454_v32  ;;  %v479_v59 = vmul.f32 %v475_v33, %v475_v33  ;;  %v499_v40 = vsub.f32 %v4740_v13, %v4909_v45  ;;  %v563_v34 = vsub.f32 %v4704_v53, %v4917_v51 }
 0x12a   :  { %v542_v27 = vmul.f32 %v538_v38, %v538_v38  ;;  %v630_v29 = vmul.f32 %v626_v57, %v626_v57  ;;  %v543_v25 = vmul.f32 %v539_v54, %v539_v54  ;;  %v631_v24 = vmul.f32 %v627_v20, %v627_v20 }
 0x12b   :  { %v674_v32 = vsub.f32 %v4726_v2, %v4937_v7  ;;  %v575_v21 = vmul.f32 %v4956_v16, %v566_v5  ;;  %v655_v14 = vmul.f32 %v651_v3, %v651_v3  ;;  %v675_v61 = vsub.f32 %v4740_v13, %v4937_v7 }
 0x12c   :  { %v491_v38 = vadd.f32 %v487_v9, %v463_v0  ;;  %v503_v57 = vmul.f32 %v499_v40, %v499_v40  ;;  %v567_v56 = vmul.f32 %v563_v34, %v563_v34  ;;  %v551_v20 = vmul.f32 %v4951_v15, %v542_v27 }
 0x12d   :  { %v586_v54 = vsub.f32 %v4726_v2, %v4920_v52  ;;  %v639_v3 = vmul.f32 %v4962_v19, %v630_v29  ;;  %v2392_v34 = vsub.f32 %v4692_v46, %v4979_v35  ;;  %v640_v40 = vmul.f32 %v4962_v19, %v631_v24 }
 0x12e   :  { %v664_v0 = vmul.f32 %v4965_v23, %v655_v14  ;;  %v679_v9 = vmul.f32 %v675_v61, %v675_v61  ;;  %v512_v29 = vmul.f32 %v4948_v11, %v503_v57  ;;  %v579_v24 = vadd.f32 %v575_v21, %v551_v20 }
 0x12f   :  { %v590_v14 = vmul.f32 %v586_v54, %v586_v54 }
 0x130   :  { %v688_v57 = vmul.f32 %v4972_v31, %v679_v9 }
 0x14c   :  { %v4864_v22 = vpop.f32.mrf.mxu0 }
 0x14d   :  { %6393 = vst [vmem:[#allocation55_spill] sm:$0xff] %v4864_v22  ;;  %804 = vrot.lane.b32.xlu0 %v4864_v22, %s6272_s20  ;;  %s4884_s20 = spop %3734 }
 0x14e   :  { %v4876_v30 = vpop.f32.mrf.mxu0  ;;  %6397 = sst [smem:[#allocation59_spill]] %s4884_s20  ;;  %s4904_s19 = spop %3736 }
 0x14f   :  { %s4899_s20 = sld [smem:[#allocation14 + $0x1]]  ;;  %s4922_s16 = spop %3738 }
 0x150   :  { %v4882_v36 = vpop.f32.mrf.mxu0  ;;  %s4953_s11 = spop %3740 }
 0x151   :  { %6396 = vst [vmem:[#allocation58_spill] sm:$0xff] %v4882_v36  ;;  %796 = vrot.lane.b32.xlu0 %v4882_v36, %s6274_s6  ;;  %808 = vrot.lane.b32.xlu1 %v4882_v36, %s6398_s2  ;;  %s4906_s6 = sld [smem:[#allocation14 + $0x2]]  ;;  %s3743_s21 = spop %3742 }
 0x152   :  { %v4924_v60 = vpop.f32.mrf.mxu0  ;;  %v5001_v12 = vstv %s3743_s21  ;;  %s3745_s15 = spop %3744  ;;  %s3289_s21 = sld [smem:[#allocation11 + $0x9]] }
 0x153   :  { %6401 = vst [vmem:[#allocation62_spill] sm:$0xff] %v4924_v60  ;;  %v5015_v28 = vstv %s3745_s15  ;;  %s3747_s1 = spop %3746  ;;  %s6437_s15 = sld [smem:[#allocation72_spill]] }
 0x155   :  { %792 = vrot.lane.b32.xlu0 %v4864_v22, %s6402_s12  ;;  %806 = vrot.lane.b32.xlu1 %v4924_v60, %s6398_s2  ;;  %v4982_v39 = vstv %s4899_s20  ;;  %s4297_s20 = smov 16  }
 0x156   :  { %v2416_v49 = vsub.f32 %v4704_v53, %v4982_v39 }
 0x157   :  { %v4993_v63 = vstv %s4906_s6  ;;  %s6436_s6 = sld [smem:[#allocation75_spill]] }
 0x158   :  { %v2440_v21 = vsub.f32 %v4740_v13, %v4993_v63 }
 0x159   :  { %784 = vrot.lane.b32.xlu0 %v4882_v36, %s4294_s18  ;;  %802 = vrot.lane.b32.xlu1 %v4876_v30, %s6398_s2  ;;  %v455_v36 = vmul.f32 %v451_v26, %v451_v26  ;;  %v502_v26 = vmul.f32 %v498_v48, %v498_v48  ;;  %v488_v48 = vmul.f32 %v4945_v10, %v479_v59 }
 0x15a   :  { %v2391_v59 = vsub.f32 %v4707_v55, %v4979_v35  ;;  %v576_v55 = vmul.f32 %v4956_v16, %v567_v56  ;;  %v2439_v56 = vsub.f32 %v4726_v2, %v4993_v63 }
 0x15b   :  { %v464_v33 = vmul.f32 %v4942_v8, %v455_v36  ;;  %v678_v36 = vmul.f32 %v674_v32, %v674_v32  ;;  %v587_v32 = vsub.f32 %v4740_v13, %v4920_v52 }
 0x15c   :  { %v2395_v35 = vmul.f32 %v2391_v59, %v2391_v59  ;;  %v2443_v59 = vmul.f32 %v2439_v56, %v2439_v56 }
 0x15d   :  { %780 = vrot.lane.b32.xlu0 %v4864_v22, %s4294_s18  ;;  %794 = vrot.lane.b32.xlu1 %v4924_v60, %s6402_s12  ;;  %v654_v22 = vmul.f32 %v650_v17, %v650_v17  ;;  %v511_v17 = vmul.f32 %v4948_v11, %v502_v26  ;;  %v5038_v26 = vstv %s3747_s1  ;;  %v492_v27 = vadd.f32 %v488_v48, %v464_v33  ;;  %s3250_s1 = sld [smem:[#allocation8 + $0x3]] }
 0x15e   :  { %v687_v6 = vmul.f32 %v4972_v31, %v678_v36  ;;  %v2396_v33 = vmul.f32 %v2392_v34, %v2392_v34  ;;  %v668_v48 = vadd.f32 %v664_v0, %v640_v40  ;;  %v2444_v34 = vmul.f32 %v2440_v21, %v2440_v21 }
 0x15f   :  { %v663_v5 = vmul.f32 %v4965_v23, %v654_v22  ;;  %v552_v22 = vmul.f32 %v4951_v15, %v543_v25  ;;  %v515_v46 = vadd.f32 %v511_v17, %v491_v38  ;;  %v2415_v25 = vsub.f32 %v4695_v47, %v4982_v39 }
 0x160   :  { %v591_v38 = vmul.f32 %v587_v32, %v587_v32  ;;  %v2404_v17 = vmul.f32 %v5001_v12, %v2395_v35  ;;  %v2405_v20 = vmul.f32 %v5001_v12, %v2396_v33  ;;  %v692_v0 = vadd.f32 %v688_v57, %v668_v48 }
 0x161   :  { %790 = vrot.lane.b32.xlu1 %v4876_v30, %s6402_s12  ;;  %v667_v61 = vadd.f32 %v663_v5, %v639_v3  ;;  %v2419_v54 = vmul.f32 %v2415_v25, %v2415_v25  ;;  %v2420_v3 = vmul.f32 %v2416_v49, %v2416_v49  ;;  %v599_v5 = vmul.f32 %v4959_v18, %v590_v14 }
 0x162   :  { %v580_v40 = vadd.f32 %v576_v55, %v552_v22  ;;  %v600_v32 = vmul.f32 %v4959_v18, %v591_v38  ;;  %v2452_v35 = vmul.f32 %v5038_v26, %v2443_v59  ;;  %v2453_v33 = vmul.f32 %v5038_v26, %v2444_v34  ;;  %v203_v22 = vpop.permute.xlu1 %202 }
 0x163   :  { %v691_v36 = vadd.f32 %v687_v6, %v667_v61  ;;  %v2428_v9 = vmul.f32 %v5015_v28, %v2419_v54  ;;  %v603_v14 = vadd.f32 %v599_v5, %v579_v24  ;;  %v696_v61 = vsub.f32 0.0, %v692_v0  ;;  %v258_v0 = vpop.permute.xlu0 %257 }
 0x164   :  { %v604_v57 = vadd.f32 %v600_v32, %v580_v40  ;;  %v5078_v40 = vsub.f32 %v4682_v41, %v203_v22 }
 0x165   :  { %782 = vrot.lane.b32.xlu1 %v4924_v60, %s4294_s18  ;;  %v516_v60 = vadd.f32 %v512_v29, %v492_v27  ;;  %v2429_v27 = vmul.f32 %v5015_v28, %v2420_v3  ;;  %v519_v29 = vsub.f32 0.0, %v515_v46  ;;  %v2432_v49 = vadd.f32 %v2428_v9, %v2404_v17  ;;  %v5083_v9 = vld [vmem:[%s6407_s24] sm:$0xff] }
 0x166   :  { %v695_v6 = vsub.f32 0.0, %v691_v36  ;;  %v607_v21 = vsub.f32 0.0, %v603_v14  ;;  %v701_v54 = vmul.f32 1.442695, %v696_v61  ;;  %v608_v3 = vsub.f32 0.0, %v604_v57 }
 0x167   :  { %v520_v25 = vsub.f32 0.0, %v516_v60  ;;  %v2433_v13 = vadd.f32 %v2429_v27, %v2405_v20  ;;  %v5067_v56 = vadd.f32 %v2452_v35, %v2432_v49  ;;  %v523_v48 = vmul.f32 1.442695, %v519_v29  ;;  %v229_v60 = vpop.permute.xlu1 %228 }
 0x168   :  { %v699_v38 = vmul.f32 1.442695, %v695_v6  ;;  %v611_v17 = vmul.f32 1.442695, %v607_v21  ;;  %v613_v24 = vmul.f32 1.442695, %v608_v3  ;;  %v5091_v29 = vsub.f32 %v4687_v42, %v229_v60 }
 0x169   :  { %778 = vrot.lane.b32.xlu1 %v4876_v30, %s4294_s18  ;;  %6404 = vst [vmem:[#allocation64_spill] sm:$0xff] %v5067_v56  ;;  %v5069_v55 = vadd.f32 %v2453_v33, %v2433_v13  ;;  %v525_v46 = vmul.f32 1.442695, %v520_v25  ;;  %4013 = vpow2.f32 %v523_v48  ;;  %v5073_v13 = vsub.f32 %v4682_v41, %v4722_v62  ;;  %v5088_v62 = vld [vmem:[%s6407_s24 + $0x8] sm:$0xff] }
 0x16a   :  { %v5104_v14 = vsub.f32 %v4714_v58, %v258_v0  ;;  %v540_v22 = vsub.f32 %v5078_v40, %v4914_v50  ;;  %v564_v21 = vsub.f32 %v5091_v29, %v4917_v51 }
 0x16b   :  { %6405 = vst [vmem:[#allocation65_spill] sm:$0xff] %v5069_v55  ;;  %4015 = vpow2.f32 %v525_v46  ;;  %v233_v20 = vpop.permute.xlu1 %232  ;;  %6406 = vst [vmem:[#allocation66_spill] sm:$0xff] %v5073_v13  ;;  %v541_v5 = vsub.f32 %v5073_v13, %v4914_v50  ;;  %v453_v35 = vsub.f32 %v5073_v13, %v4902_v43  ;;  %v629_v49 = vsub.f32 %v5073_v13, %v4931_v1 }
 0x16c   :  { %4017 = vpow2.f32 %v699_v38  ;;  %v5094_v32 = vsub.f32 %v4687_v42, %v233_v20  ;;  %v544_v3 = vmul.f32 %v540_v22, %v540_v22  ;;  %v568_v50 = vmul.f32 %v564_v21, %v564_v21 }
 0x16d   :  { %4019 = vpow2.f32 %v701_v54  ;;  %v545_v33 = vmul.f32 %v541_v5, %v541_v5  ;;  %v457_v38 = vmul.f32 %v453_v35, %v453_v35  ;;  %v589_v5 = vsub.f32 %v5104_v14, %v4920_v52 }
 0x16e   :  { %4021 = vpow2.f32 %v611_v17 }
 0x16f   :  { %4023 = vpow2.f32 %v613_v24  ;;  %v254_v59 = vpop.permute.xlu1 %253  ;;  %v554_v54 = vmul.f32 %v4951_v15, %v545_v33  ;;  %v633_v24 = vmul.f32 %v629_v49, %v629_v49  ;;  %v593_v35 = vmul.f32 %v589_v5, %v589_v5 }
 0x170   :  { %v5099_v25 = vsub.f32 %v4714_v58, %v254_v59  ;;  %v565_v58 = vsub.f32 %v5094_v32, %v4917_v51  ;;  %v365_v51 = vsub.f32 %v5073_v13, %v4689_v44  ;;  %v466_v33 = vmul.f32 %v4942_v8, %v457_v38 }
 0x171   :  { %v602_v22 = vmul.f32 %v4959_v18, %v593_v35  ;;  %v501_v38 = vsub.f32 %v5104_v14, %v4909_v45  ;;  %v653_v35 = vsub.f32 %v5094_v32, %v4934_v4 }
 0x172   :  { %6408 = vst [vmem:[#allocation67_spill] sm:$0xff] %v5099_v25  ;;  %v588_v60 = vsub.f32 %v5099_v25, %v4920_v52  ;;  %v569_v20 = vmul.f32 %v565_v58, %v565_v58 }
 0x174   :  { %v592_v59 = vmul.f32 %v588_v60, %v588_v60  ;;  %v628_v60 = vsub.f32 %v5078_v40, %v4931_v1 }
 0x176   :  { %v4014_v36 = vpop.eup %4013  ;;  %v601_v49 = vmul.f32 %v4959_v18, %v592_v59 }
 0x177   :  { %v531_v6 = vmul.f32 %v4014_v36, %v5083_v9  ;;  %v553_v36 = vmul.f32 %v4951_v15, %v544_v3  ;;  %v642_v15 = vmul.f32 %v4962_v19, %v633_v24 }
 0x178   :  { %v4016_v34 = vpop.eup %4015 }
 0x179   :  { %v4018_v27 = vpop.eup %4017  ;;  %v532_v61 = vmul.f32 %v4016_v34, %v5088_v62 }
 0x17a   :  { %v4020_v41 = vpop.eup %4019  ;;  %v707_v42 = vmul.f32 %v4018_v27, %v5083_v9  ;;  %v577_v27 = vmul.f32 %v4956_v16, %v568_v50  ;;  %v505_v50 = vmul.f32 %v501_v38, %v501_v38 }
 0x17b   :  { %v4022_v48 = vpop.eup %4021  ;;  %v3797_v57 = vpack.i.bf16 %v532_v61, %v531_v6  ;;  %v708_v46 = vmul.f32 %v4020_v41, %v5088_v62  ;;  %v578_v41 = vmul.f32 %v4956_v16, %v569_v20  ;;  %v452_v6 = vsub.f32 %v5078_v40, %v4902_v43 }
 0x17c   :  { %v4024_v17 = vpop.eup %4023  ;;  %v619_v34 = vmul.f32 %v4022_v48, %v5083_v9  ;;  %v581_v61 = vadd.f32 %v577_v27, %v553_v36  ;;  %v500_v43 = vsub.f32 %v5099_v25, %v4909_v45  ;;  %v632_v36 = vmul.f32 %v628_v60, %v628_v60  ;;  %v6410_v60 = vld [vmem:[#allocation31_spill] sm:$0xff] }
 0x17d   :  { %3798 = vrot.lane.b32.xlu0 %v3797_v57, %s4295_s13  ;;  %v3807_v0 = vpack.i.bf16 %v708_v46, %v707_v42  ;;  %v620_v52 = vmul.f32 %v4024_v17, %v5088_v62  ;;  %v582_v42 = vadd.f32 %v578_v41, %v554_v54  ;;  %v456_v16 = vmul.f32 %v452_v6, %v452_v6 }
 0x17e   :  { %v476_v57 = vsub.f32 %v5091_v29, %v4893_v37  ;;  %v477_v46 = vsub.f32 %v5094_v32, %v4893_v37  ;;  %v605_v21 = vadd.f32 %v601_v49, %v581_v61  ;;  %v504_v24 = vmul.f32 %v500_v43, %v500_v43 }
 0x17f   :  { %v3802_v48 = vpack.i.bf16 %v620_v52, %v619_v34  ;;  %v606_v58 = vadd.f32 %v602_v22, %v582_v42  ;;  %v465_v18 = vmul.f32 %v4942_v8, %v456_v16  ;;  %v652_v45 = vsub.f32 %v5091_v29, %v4934_v4 }
 0x180   :  { %v480_v54 = vmul.f32 %v476_v57, %v476_v57  ;;  %v481_v3 = vmul.f32 %v477_v46, %v477_v46  ;;  %v609_v17 = vsub.f32 0.0, %v605_v21  ;;  %v513_v8 = vmul.f32 %v4948_v11, %v504_v24 }
 0x181   :  { %3808 = vrot.lane.b32.xlu0 %v3807_v0, %s6402_s12  ;;  %3803 = vrot.lane.b32.xlu1 %v3802_v48, %s4296_s29  ;;  %v610_v37 = vsub.f32 0.0, %v606_v58  ;;  %v514_v0 = vmul.f32 %v4948_v11, %v505_v50  ;;  %v641_v41 = vmul.f32 %v4962_v19, %v632_v36  ;;  %v656_v49 = vmul.f32 %v652_v45, %v652_v45  ;;  %v6412_v36 = vld [vmem:[#allocation30_spill] sm:$0xff] }
 0x182   :  { %v489_v20 = vmul.f32 %v4945_v10, %v480_v54  ;;  %v490_v5 = vmul.f32 %v4945_v10, %v481_v3  ;;  %v615_v59 = vmul.f32 1.442695, %v609_v17  ;;  %v676_v10 = vsub.f32 %v5099_v25, %v4937_v7 }
 0x183   :  { %v617_v34 = vmul.f32 1.442695, %v610_v37  ;;  %v677_v52 = vsub.f32 %v5104_v14, %v4937_v7  ;;  %v657_v42 = vmul.f32 %v653_v35, %v653_v35  ;;  %v665_v11 = vmul.f32 %v4965_v23, %v656_v49 }
 0x184   :  { %v493_v27 = vadd.f32 %v489_v20, %v465_v18  ;;  %v494_v1 = vadd.f32 %v490_v5, %v466_v33  ;;  %4025 = vpow2.f32 %v615_v59  ;;  %v680_v33 = vmul.f32 %v676_v10, %v676_v10  ;;  %v6409_v18 = vld [vmem:[#allocation26_spill] sm:$0xff] }
 0x185   :  { %4027 = vpow2.f32 %v617_v34  ;;  %v681_v22 = vmul.f32 %v677_v52, %v677_v52  ;;  %v369_v19 = vmul.f32 %v365_v51, %v365_v51  ;;  %v666_v4 = vmul.f32 %v4965_v23, %v657_v42  ;;  %v5188_v52 = vld [vmem:[%s6407_s24 + $0x18] sm:$0xff] }
 0x186   :  { %v517_v6 = vadd.f32 %v513_v8, %v493_v27  ;;  %v518_v61 = vadd.f32 %v514_v0, %v494_v1  ;;  %v669_v57 = vadd.f32 %v665_v11, %v641_v41  ;;  %v689_v46 = vmul.f32 %v4972_v31, %v680_v33  ;;  %v6413_v27 = vld [vmem:[#allocation33_spill] sm:$0xff] }
 0x187   :  { %v690_v21 = vmul.f32 %v4972_v31, %v681_v22  ;;  %v364_v7 = vsub.f32 %v5078_v40, %v4689_v44  ;;  %v670_v38 = vadd.f32 %v666_v4, %v642_v15  ;;  %v388_v54 = vsub.f32 %v5091_v29, %v6409_v18  ;;  %v6411_v15 = vld [vmem:[#allocation29_spill] sm:$0xff] }
 0x188   :  { %v521_v48 = vsub.f32 0.0, %v517_v6  ;;  %v522_v16 = vsub.f32 0.0, %v518_v61  ;;  %v693_v3 = vadd.f32 %v689_v46, %v669_v57  ;;  %v412_v17 = vsub.f32 %v5099_v25, %v6410_v60  ;;  %v5182_v41 = vld [vmem:[%s6407_s24 + $0x10] sm:$0xff] }
 0x189   :  { %v368_v51 = vmul.f32 %v364_v7, %v364_v7  ;;  %v389_v23 = vsub.f32 %v5094_v32, %v6409_v18  ;;  %v694_v37 = vadd.f32 %v690_v21, %v670_v38  ;;  %v392_v31 = vmul.f32 %v388_v54, %v388_v54  ;;  %v4141_v7 = vld [vmem:[%s6360_s4] sm:$0xff] }
 0x18a   :  { %v527_v58 = vmul.f32 1.442695, %v521_v48  ;;  %v529_v43 = vmul.f32 1.442695, %v522_v16  ;;  %v413_v44 = vsub.f32 %v5104_v14, %v6410_v60  ;;  %v697_v24 = vsub.f32 0.0, %v693_v3  ;;  %v4142_v3 = vld [vmem:[%s6360_s4 + $0x10] sm:$0xff] }
 0x18b   :  { %v377_v50 = vmul.f32 %v6411_v15, %v368_v51  ;;  %v416_v20 = vmul.f32 %v412_v17, %v412_v17  ;;  %v698_v5 = vsub.f32 0.0, %v694_v37  ;;  %v401_v45 = vmul.f32 %v6412_v36, %v392_v31  ;;  %v6414_v60 = vld [vmem:[#allocation36_spill] sm:$0xff] }
 0x18c   :  { %4029 = vpow2.f32 %v527_v58  ;;  %v393_v59 = vmul.f32 %v389_v23, %v389_v23  ;;  %v417_v34 = vmul.f32 %v413_v44, %v413_v44  ;;  %v378_v8 = vmul.f32 %v6411_v15, %v369_v19  ;;  %v4143_v23 = vld [vmem:[%s6360_s4 + $0x8] sm:$0xff] }
 0x18d   :  { %4031 = vpow2.f32 %v529_v43  ;;  %v703_v0 = vmul.f32 1.442695, %v697_v24  ;;  %v425_v1 = vmul.f32 %v6413_v27, %v416_v20  ;;  %v705_v35 = vmul.f32 1.442695, %v698_v5  ;;  %v6415_v24 = vld [vmem:[#allocation37_spill] sm:$0xff] }
 0x18e   :  { %v405_v49 = vadd.f32 %v401_v45, %v377_v50  ;;  %v402_v10 = vmul.f32 %v6412_v36, %v393_v59  ;;  %v426_v6 = vmul.f32 %v6413_v27, %v417_v34  ;;  %v1042_v17 = vsub.f32 %v5073_v13, %v6414_v60  ;;  %v6416_v50 = vld [vmem:[#allocation38_spill] sm:$0xff]  ;;  %v6417_v45 = vld [vmem:[#allocation39_spill] sm:$0xff] }
 0x18f   :  { %4033 = vpow2.f32 %v703_v0  ;;  %v1041_v37 = vsub.f32 %v5078_v40, %v6414_v60  ;;  %v1065_v15 = vsub.f32 %v5091_v29, %v6415_v24  ;;  %v1089_v20 = vsub.f32 %v5099_v25, %v6416_v50  ;;  %v4144_v36 = vld [vmem:[%s6360_s4 + $0x18] sm:$0xff]  ;;  %s3258_s4 = sld [smem:[#allocation8 + $0x7]] }
 0x190   :  { %4035 = vpow2.f32 %v705_v35  ;;  %v5192_v33 = vadd.f32 %v425_v1, %v405_v49  ;;  %v406_v22 = vadd.f32 %v402_v10, %v378_v8  ;;  %v1046_v31 = vmul.f32 %v1042_v17, %v1042_v17  ;;  %v6418_v35 = vld [vmem:[#allocation40_spill] sm:$0xff]  ;;  %v6419_v10 = vld [vmem:[#allocation41_spill] sm:$0xff] }
 0x191   :  { %v4026_v61 = vpop.eup %4025  ;;  %v1045_v44 = vmul.f32 %v1041_v37, %v1041_v37  ;;  %v1066_v5 = vsub.f32 %v5094_v32, %v6415_v24  ;;  %v1069_v34 = vmul.f32 %v1065_v15, %v1065_v15  ;;  %v1093_v8 = vmul.f32 %v1089_v20, %v1089_v20  ;;  %v6422_v24 = vld [vmem:[#allocation49_spill] sm:$0xff] }
 0x192   :  { %v4028_v42 = vpop.eup %4027  ;;  %v621_v11 = vmul.f32 %v4026_v61, %v5182_v41  ;;  %v5195_v48 = vadd.f32 %v426_v6, %v406_v22  ;;  %v1090_v0 = vsub.f32 %v5104_v14, %v6416_v50  ;;  %v1055_v27 = vmul.f32 %v6417_v45, %v1046_v31  ;;  %v6421_v31 = vld [vmem:[#allocation47_spill] sm:$0xff] }
 0x193   :  { %v622_v19 = vmul.f32 %v4028_v42, %v5188_v52  ;;  %v1054_v59 = vmul.f32 %v6417_v45, %v1045_v44  ;;  %v1070_v1 = vmul.f32 %v1066_v5, %v1066_v5  ;;  %v1078_v49 = vmul.f32 %v6418_v35, %v1069_v34 }
 0x194   :  { %v1102_v6 = vmul.f32 %v6419_v10, %v1093_v8  ;;  %v1094_v61 = vmul.f32 %v1090_v0, %v1090_v0  ;;  %v1740_v44 = vsub.f32 %v5091_v29, %v6421_v31  ;;  %v1764_v15 = vsub.f32 %v5099_v25, %v6422_v24 }
 0x195   :  { %v3817_v16 = vpack.i.bf16 %v622_v19, %v621_v11  ;;  %v1079_v42 = vmul.f32 %v6418_v35, %v1070_v1  ;;  %v1082_v22 = vadd.f32 %v1078_v49, %v1054_v59  ;;  %v1741_v50 = vsub.f32 %v5094_v32, %v6421_v31  ;;  %v6423_v59 = vld [vmem:[#allocation50_spill] sm:$0xff]  ;;  %v6424_v1 = vld [vmem:[#allocation52_spill] sm:$0xff] }
 0x196   :  { %v1103_v19 = vmul.f32 %v6419_v10, %v1094_v61  ;;  %v1765_v45 = vsub.f32 %v5104_v14, %v6422_v24  ;;  %v1768_v8 = vmul.f32 %v1764_v15, %v1764_v15  ;;  %v6425_v10 = vld [vmem:[#allocation58_spill] sm:$0xff]  ;;  %v2442_v24 = vsub.f32 %v5104_v14, %v4993_v63 }
 0x197   :  { %3818 = vrot.lane.b32.xlu0 %v3817_v16, %s4296_s29  ;;  %v1745_v0 = vmul.f32 %v1741_v50, %v1741_v50 }
 0x198   :  { %v1769_v49 = vmul.f32 %v1765_v45, %v1765_v45 }
 0x199   :  { %v4030_v4 = vpop.eup %4029 }
 0x19a   :  { %v4032_v57 = vpop.eup %4031  ;;  %v533_v46 = vmul.f32 %v4030_v4, %v5182_v41  ;;  %v1083_v4 = vadd.f32 %v1079_v42, %v1055_v27  ;;  %v1754_v42 = vmul.f32 %v6424_v1, %v1745_v0 }
 0x19b   :  { %v534_v21 = vmul.f32 %v4032_v57, %v5188_v52  ;;  %918 = vrot.lane.b32.xlu0 %v4141_v7, %s4297_s20  ;;  %v5238_v57 = vadd.f32 %v1102_v6, %v1082_v22  ;;  %v6426_v6 = vld [vmem:[#allocation53_spill] sm:$0xff] }
 0x19c   :  { %v4034_v43 = vpop.eup %4033  ;;  %v1777_v61 = vmul.f32 %v6426_v6, %v1768_v8  ;;  %v1778_v22 = vmul.f32 %v6426_v6, %v1769_v49 }
 0x19d   :  { %v3812_v58 = vpack.i.bf16 %v534_v21, %v533_v46  ;;  %v4036_v38 = vpop.eup %4035  ;;  %v709_v18 = vmul.f32 %v4034_v43, %v5182_v41  ;;  %v5240_v46 = vadd.f32 %v1103_v19, %v1083_v4  ;;  %v6427_v19 = vld [vmem:[#allocation62_spill] sm:$0xff] }
 0x19e   :  { %v710_v54 = vmul.f32 %v4036_v38, %v5188_v52 }
 0x19f   :  { %3813 = vrot.lane.b32.xlu1 %v3812_v58, %s4295_s13  ;;  %922 = vrot.lane.b32.xlu0 %v4142_v3, %s4297_s20  ;;  %v6420_v3 = vld [vmem:[#allocation46_spill] sm:$0xff] }
 0x1a0   :  { %v3822_v51 = vpack.i.bf16 %v710_v54, %v709_v18  ;;  %v1716_v37 = vsub.f32 %v5078_v40, %v6420_v3 }
 0x1a2   :  { %v1720_v5 = vmul.f32 %v1716_v37, %v1716_v37  ;;  %v2417_v37 = vsub.f32 %v5091_v29, %v4982_v39 }
 0x1a3   :  { %3823 = vrot.lane.b32.xlu1 %v3822_v51, %s6402_s12  ;;  %v1717_v51 = vsub.f32 %v5073_v13, %v6420_v3 }
 0x1a4   :  { %v1729_v27 = vmul.f32 %v6423_v59, %v1720_v5  ;;  %v2421_v15 = vmul.f32 %v2417_v37, %v2417_v37 }
 0x1a5   :  { %v1721_v17 = vmul.f32 %v1717_v51, %v1717_v51  ;;  %v6433_v51 = vld [vmem:[#allocation63_spill] sm:$0xff] }
 0x1a7   :  { %920 = vrot.lane.b32.xlu1 %v4143_v23, %s4297_s20  ;;  %v1730_v34 = vmul.f32 %v6423_v59, %v1721_v17  ;;  %v2393_v17 = vsub.f32 %v5078_v40, %v6433_v51 }
 0x1a9   :  { %v2397_v31 = vmul.f32 %v2393_v17, %v2393_v17 }
 0x1ab   :  { %924 = vrot.lane.b32.xlu1 %v4144_v36, %s4297_s20  ;;  %v1744_v36 = vmul.f32 %v1740_v44, %v1740_v44  ;;  %v2418_v44 = vsub.f32 %v5094_v32, %v4982_v39 }
 0x1ad   :  { %v1753_v35 = vmul.f32 %v6424_v1, %v1744_v36  ;;  %v2422_v5 = vmul.f32 %v2418_v44, %v2418_v44  ;;  %v2446_v36 = vmul.f32 %v2442_v24, %v2442_v24 }
 0x1af   :  { %v2431_v0 = vmul.f32 %v5015_v28, %v2422_v5  ;;  %v2455_v39 = vmul.f32 %v5038_v26, %v2446_v36 }
 0x1bf   :  { %v805_v11 = vpop.permute.xlu0 %804 }
 0x1c3   :  { %v809_v16 = vpop.permute.xlu1 %808  ;;  %v797_v21 = vpop.permute.xlu0 %796 }
 0x1c4   :  { %3453 = vmatprep.subr.mxu1 %v809_v16 }
 0x1c5   :  { %3454 = vmatpush3.msra.mxu1 %v809_v16  ;;  %v1758_v16 = vadd.f32 %v1754_v42, %v1730_v34  ;;  %v2430_v34 = vmul.f32 %v5015_v28, %v2421_v15 }
 0x1c7   :  { %v807_v7 = vpop.permute.xlu1 %806  ;;  %v793_v43 = vpop.permute.xlu0 %792 }
 0x1c8   :  { %3455 = vmatprep.subr.mxu1 %v807_v7 }
 0x1c9   :  { %3456 = vmatpush3.msra.mxu1 %v807_v7  ;;  %v5267_v7 = vadd.f32 %v1778_v22, %v1758_v16 }
 0x1ca   :  { %3457 = vmatprep.subr.mxu1 %v805_v11 }
 0x1cb   :  { %3458 = vmatpush3.msra.mxu1 %v805_v11  ;;  %v803_v58 = vpop.permute.xlu1 %802  ;;  %v785_v18 = vpop.permute.xlu0 %784  ;;  %v1757_v11 = vadd.f32 %v1753_v35, %v1729_v27  ;;  %6430 = vst [vmem:[#allocation31_spill] sm:$0xff] %v5267_v7 }
 0x1cc   :  { %3459 = vmatprep.subr.mxu1 %v803_v58 }
 0x1cd   :  { %3460 = vmatpush3.msra.mxu1 %v803_v58  ;;  %v5264_v4 = vadd.f32 %v1777_v61, %v1757_v11  ;;  %v6431_v58 = vld [vmem:[#allocation34_spill] sm:$0xff] }
 0x1ce   :  { %3461 = vmatprep.subr.mxu1 %v797_v21 }
 0x1cf   :  { %3462 = vmatpush3.msra.mxu1 %v797_v21  ;;  %v795_v38 = vpop.permute.xlu1 %794  ;;  %v781_v23 = vpop.permute.xlu0 %780  ;;  %6428 = vst [vmem:[#allocation26_spill] sm:$0xff] %v5264_v4  ;;  %v6429_v21 = vld [vmem:[#allocation55_spill] sm:$0xff] }
 0x1d0   :  { %3463 = vmatprep.subr.mxu1 %v795_v38 }
 0x1d1   :  { %3464 = vmatpush3.msra.mxu1 %v795_v38  ;;  %v6432_v38 = vld [vmem:[#allocation35_spill] sm:$0xff] }
 0x1d2   :  { %3465 = vmatprep.subr.mxu1 %v793_v43 }
 0x1d3   :  { %3466 = vmatpush3.msra.mxu1 %v793_v43  ;;  %v791_v54 = vpop.permute.xlu1 %790  ;;  %v431_v43 = vsub.f32 0.0, %v6431_v58 }
 0x1d4   :  { %3467 = vmatprep.subr.mxu1 %v791_v54 }
 0x1d5   :  { %3468 = vmatpush3.msra.mxu1 %v791_v54  ;;  %v435_v54 = vmul.f32 1.442695, %v431_v43 }
 0x1d6   :  { %3469 = vmatprep.subr.mxu1 %v785_v18 }
 0x1d7   :  { %3470 = vmatpush3.msra.mxu1 %v785_v18  ;;  %v783_v60 = vpop.permute.xlu1 %782  ;;  %v432_v18 = vsub.f32 0.0, %v6432_v38  ;;  %4037 = vpow2.f32 %v435_v54  ;;  %v434_v54 = vsub.f32 0.0, %v5195_v48 }
 0x1d8   :  { %3471 = vmatprep.subr.mxu1 %v783_v60 }
 0x1d9   :  { %3472 = vmatpush3.msra.mxu1 %v783_v60  ;;  %v437_v3 = vmul.f32 1.442695, %v432_v18  ;;  %v2394_v60 = vsub.f32 %v5073_v13, %v6433_v51  ;;  %v441_v51 = vmul.f32 1.442695, %v434_v54 }
 0x1da   :  { %3473 = vmatprep.subr.mxu1 %v781_v23 }
 0x1db   :  { %3474 = vmatpush3.msra.mxu1 %v781_v23  ;;  %v779_v20 = vpop.permute.xlu1 %778  ;;  %4039 = vpow2.f32 %v437_v3  ;;  %v2398_v23 = vmul.f32 %v2394_v60, %v2394_v60 }
 0x1dc   :  { %3475 = vmatprep.subr.mxu1 %v779_v20 }
 0x1dd   :  { %3476 = vmatpush3.msra.mxu1 %v779_v20  ;;  %v2406_v20 = vmul.f32 %v5001_v12, %v2397_v31  ;;  %v2407_v45 = vmul.f32 %v5001_v12, %v2398_v23 }
 0x1de   :  { %3477 = vmatprep.subr.mxu1 %v6425_v10 }
 0x1df   :  { %3478 = vmatpush3.msra.mxu1 %v6425_v10  ;;  %v2434_v27 = vadd.f32 %v2430_v34, %v2406_v20  ;;  %v2435_v49 = vadd.f32 %v2431_v0, %v2407_v45  ;;  %v937_v0 = vld [vmem:[%s6436_s6 + $0x10] sm:$0xff] }
 0x1e0   :  { %3479 = vmatprep.subr.mxu1 %v6427_v19  ;;  %3491 = vmatprep.subr.mxu0 %v937_v0 }
 0x1e1   :  { %3480 = vmatpush3.msra.mxu1 %v6427_v19  ;;  %v5294_v12 = vadd.f32 %v2455_v39, %v2435_v49  ;;  %3492 = vmatpush3.msra.mxu0 %v937_v0  ;;  %v935_v39 = vld [vmem:[%s6436_s6] sm:$0xff]  ;;  %v5379_v0 = vstv %s4804_s14  ;;  %s6446_s14 = sld [smem:[#allocation76_spill]] }
 0x1e2   :  { %3481 = vmatprep.subr.mxu1 %v6429_v21 }
 0x1e3   :  { %3482 = vmatpush3.msra.mxu1 %v6429_v21  ;;  %6435 = vst [vmem:[#allocation30_spill] sm:$0xff] %v5294_v12 }
 0x1e4   :  { %3483 = vmatprep.subr.mxu1 %v4876_v30  ;;  %v4038_v1 = vpop.eup %4037 }
 0x1e5   :  { %3484 = vmatpush3.msra.mxu1 %v4876_v30  ;;  %v2441_v30 = vsub.f32 %v5099_v25, %v4993_v63  ;;  %v443_v11 = vmul.f32 %v4038_v1, %v5083_v9  ;;  %v3241_v1 = vld [vmem:[%s6437_s15] ss:$0 sm:$0xff]  ;;  %s3291_s15 = sld [smem:[#allocation11 + $0xa]] }
 0x1e7   :  { %v2445_v50 = vmul.f32 %v2441_v30, %v2441_v30 }
 0x1e8   :  { %v4040_v63 = vpop.eup %4039 }
 0x1e9   :  { %v2454_v8 = vmul.f32 %v5038_v26, %v2445_v50  ;;  %v444_v28 = vmul.f32 %v4040_v63, %v5088_v62  ;;  %v433_v62 = vsub.f32 0.0, %v5192_v33 }
 0x1eb   :  { %v5292_v35 = vadd.f32 %v2454_v8, %v2434_v27  ;;  %v439_v3 = vmul.f32 1.442695, %v433_v62  ;;  %v936_v27 = vld [vmem:[%s6436_s6 + $0x8] sm:$0xff]  ;;  %s3262_s6 = sld [smem:[#allocation8 + $0x9]] }
 0x1ec   :  { %3493 = vmatprep.subr.mxu0 %v936_v27 }
 0x1ed   :  { %6434 = vst [vmem:[#allocation29_spill] sm:$0xff] %v5292_v35  ;;  %4041 = vpow2.f32 %v439_v3  ;;  %3494 = vmatpush3.msra.mxu0 %v936_v27 }
 0x1ee   :  { %4043 = vpow2.f32 %v441_v51  ;;  %3495 = vmatprep.subr.mxu0 %v935_v39 }
 0x1ef   :  { %v3799_v59 = vpop.permute.xlu0 %3798  ;;  %3496 = vmatpush3.msra.mxu0 %v935_v39 }
 0x1f0   :  { %v3801_v10 = vunpack.i.h.bf16 %v3799_v59  ;;  %v3800_v6 = vunpack.i.l.bf16 %v3799_v59 }
 0x1f2   :  { %v760_v16 = vsel %vm759_vm1, %v443_v11, %v3800_v6  ;;  %v761_v21 = vsel %vm759_vm1, %v444_v28, %v3801_v10 }
 0x1f3   :  { %v3809_v61 = vpop.permute.xlu0 %3808  ;;  %v3804_v42 = vpop.permute.xlu1 %3803 }
 0x1f4   :  { %v3806_v22 = vunpack.i.h.bf16 %v3804_v42  ;;  %v3805_v19 = vunpack.i.l.bf16 %v3804_v42  ;;  %v3810_v26 = vunpack.i.l.bf16 %v3809_v61  ;;  %v3811_v58 = vunpack.i.h.bf16 %v3809_v61 }
 0x1f6   :  { %v765_v43 = vsel %vm764_vm2, %v760_v16, %v3805_v19  ;;  %v766_v38 = vsel %vm764_vm2, %v761_v21, %v3806_v22 }
 0x1f7   :  { %v770_v18 = vsel %vm769_vm3, %v765_v43, %v3810_v26  ;;  %v771_v9 = vsel %vm769_vm3, %v766_v38, %v3811_v58 }
 0x1f8   :  { %3485 = vmatprep.mubr.f32.mxu1 %v770_v18 }
 0x1f9   :  { %3486 = vmatmul.mubr.f32.vlgmr.msra.gmra.mxu1 %v771_v9 }
 0x1fa   :  { %v4042_v60 = vpop.eup %4041 }
 0x1fb   :  { %v4044_v17 = vpop.eup %4043  ;;  %v445_v44 = vmul.f32 %v4042_v60, %v5182_v41 }
 0x1fc   :  { %v446_v24 = vmul.f32 %v4044_v17, %v5188_v52 }
 0x209   :  { %v3819_v31 = vpop.permute.xlu0 %3818 }
 0x20a   :  { %v3821_v50 = vunpack.i.h.bf16 %v3819_v31  ;;  %v3820_v48 = vunpack.i.l.bf16 %v3819_v31  ;;  %v5352_v31 = vstv %s3256_s10  ;;  %s6450_s10 = sld [smem:[#allocation56_spill]] }
 0x20d   :  { %v919_v11 = vpop.permute.xlu0 %918 }
 0x211   :  { %v3814_v23 = vpop.permute.xlu1 %3813  ;;  %v923_v62 = vpop.permute.xlu0 %922 }
 0x212   :  { %v3816_v37 = vunpack.i.h.bf16 %v3814_v23  ;;  %v3815_v30 = vunpack.i.l.bf16 %v3814_v23  ;;  %v5346_v23 = vstv %s3250_s1  ;;  %s6445_s1 = sld [smem:[#allocation78_spill]] }
 0x214   :  { %v762_v15 = vsel %vm759_vm1, %v445_v44, %v3815_v30  ;;  %v763_v33 = vsel %vm759_vm1, %v446_v24, %v3816_v37  ;;  %v5348_v37 = vstv %s3252_s8  ;;  %v5350_v30 = vstv %s3254_s27  ;;  %s3293_s8 = sld [smem:[#allocation11 + $0xb]] }
 0x215   :  { %v3824_v20 = vpop.permute.xlu1 %3823  ;;  %v767_v45 = vsel %vm764_vm2, %v762_v15, %v3820_v48  ;;  %v768_v59 = vsel %vm764_vm2, %v763_v33, %v3821_v50  ;;  %v5354_v44 = vstv %s3258_s4  ;;  %v5356_v24 = vstv %s3260_s5  ;;  %v6438_v15 = vld [vmem:[#allocation28_spill] sm:$0xff]  ;;  %s6449_s27 = sld [smem:[#allocation54_spill]] }
 0x216   :  { %v3826_v5 = vunpack.i.h.bf16 %v3824_v20  ;;  %v3825_v36 = vunpack.i.l.bf16 %v3824_v20  ;;  %v1127_v33 = vsub.f32 %v6438_v15, %v5346_v23  ;;  %v1151_v50 = vsub.f32 %v4695_v47, %v5348_v37  ;;  %s6451_s4 = sld [smem:[#allocation57_spill]] }
 0x217   :  { %v5362_v48 = vstv %s3262_s6  ;;  %v5364_v20 = vstv %s3264_s9  ;;  %v1215_v27 = vsub.f32 %v6438_v15, %v5352_v31  ;;  %v1239_v39 = vsub.f32 %v4695_v47, %v5354_v44  ;;  %s6454_s5 = sld [smem:[#allocation59_spill]] }
 0x218   :  { %v772_v34 = vsel %vm769_vm3, %v767_v45, %v3825_v36  ;;  %v773_v8 = vsel %vm769_vm3, %v768_v59, %v3826_v5  ;;  %v6439_v5 = vld [vmem:[#allocation24_spill] sm:$0xff]  ;;  %v5369_v45 = vstv %s4794_s7  ;;  %v1152_v59 = vsub.f32 %v4704_v53, %v5348_v37  ;;  %s6440_s7 = sld [smem:[#allocation44_spill]] }
 0x219   :  { %3488 = vmatprep.mubr.f32.mxu1 %v772_v34  ;;  %v921_v28 = vpop.permute.xlu1 %920  ;;  %v1128_v36 = vsub.f32 %v6439_v5, %v5346_v23  ;;  %v5373_v34 = vstv %s3266_s30 }
 0x21a   :  { %3489 = vmatmul.mubr.f32.gmra.mxu1 %v773_v8  ;;  %v5376_v8 = vstv %s4798_s3  ;;  %s6442_s3 = sld [smem:[#allocation45_spill]] }
 0x21d   :  { %v925_v54 = vpop.permute.xlu1 %924 }
 0x2b9   :  { %v3487_v63 = vpop.f32.mrf.mxu1 }
 0x2ba   :  { %v893_v49 = vadd.f32 %v3487_v63, %v3241_v1  ;;  %v5388_v63 = vstv %s4806_s26  ;;  %s3277_s26 = sld [smem:[#allocation11 + $0x3]] }
 0x2bb   :  { %v887_v10 = vpop.f32.mrf.mxu1 }
 0x2bc   :  { %vm907_vm4 = vcmp.gt.f32.partialorder %v893_v49, 0.0  ;;  %v911_v6 = vmul.f32 0.01, %v893_v49  ;;  %v888_v61 = vadd.f32 %v3241_v1, %v887_v10  ;;  %v5393_v10 = vstv %s4808_s17  ;;  %s3279_s17 = sld [smem:[#allocation11 + $0x4]] }
 0x2be   :  { %vm906_vm5 = vcmp.gt.f32.partialorder %v888_v61, 0.0  ;;  %v910_v42 = vmul.f32 0.01, %v888_v61  ;;  %v915_v22 = vsel %vm907_vm4, %v893_v49, %v911_v6  ;;  %v1240_v49 = vsub.f32 %v4704_v53, %v5354_v44 }
 0x2bf   :  { %v5330_v16 = vsel %vm930_vm6, %v915_v22, %v921_v28  ;;  %v1130_v6 = vsub.f32 %v5073_v13, %v5346_v23  ;;  %v1132_v28 = vmul.f32 %v1128_v36, %v1128_v36  ;;  %v1156_v22 = vmul.f32 %v1152_v59, %v1152_v59 }
 0x2c0   :  { %v914_v19 = vsel %vm906_vm5, %v888_v61, %v910_v42  ;;  %v1131_v61 = vmul.f32 %v1127_v33, %v1127_v33  ;;  %v1155_v42 = vmul.f32 %v1151_v50, %v1151_v50  ;;  %vm2290_vm5 = vcmask 457728  }
 0x2c1   :  { %v5327_v26 = vsel %vm930_vm6, %v914_v19, %v919_v11  ;;  %v1175_v11 = vsub.f32 %v4726_v2, %v5350_v30  ;;  %v6441_v19 = vld [vmem:[#allocation32_spill] sm:$0xff]  ;;  %v1134_v33 = vmul.f32 %v1130_v6, %v1130_v6  ;;  %v1303_v6 = vsub.f32 %v6438_v15, %v5362_v48 }
 0x2c2   :  { %3497 = vmatprep.mubr.msk.f32.mxu0 %vm938_vm7, %v5327_v26  ;;  %v1140_v50 = vmul.f32 %v5369_v45, %v1131_v61  ;;  %v1164_v36 = vmul.f32 %v5376_v8, %v1155_v42 }
 0x2c3   :  { %3498 = vmatmul.mubr.msk.f32.vlgmr.msra.gmra.mxu0 %vm938_vm7, %v5330_v16  ;;  %v1179_v59 = vmul.f32 %v1175_v11, %v1175_v11  ;;  %v1307_v4 = vmul.f32 %v1303_v6, %v1303_v6 }
 0x2da   :  { %v3490_v21 = vpop.f32.mrf.mxu1 }
 0x2db   :  { %v903_v58 = vadd.f32 %v3490_v21, %v3241_v1  ;;  %v1176_v21 = vsub.f32 %v6441_v19, %v5350_v30 }
 0x2dc   :  { %v897_v43 = vpop.f32.mrf.mxu1 }
 0x2dd   :  { %vm909_vm8 = vcmp.gt.f32.partialorder %v903_v58, 0.0  ;;  %v913_v38 = vmul.f32 0.01, %v903_v58  ;;  %v898_v18 = vadd.f32 %v3241_v1, %v897_v43  ;;  %v1216_v1 = vsub.f32 %v6439_v5, %v5352_v31 }
 0x2de   :  { %v1219_v43 = vmul.f32 %v1215_v27, %v1215_v27  ;;  %v1141_v27 = vmul.f32 %v5369_v45, %v1132_v28  ;;  %v1180_v12 = vmul.f32 %v1176_v21, %v1176_v21  ;;  %v1304_v28 = vsub.f32 %v6439_v5, %v5362_v48 }
 0x2df   :  { %vm908_vm9 = vcmp.gt.f32.partialorder %v898_v18, 0.0  ;;  %v912_v9 = vmul.f32 0.01, %v898_v18  ;;  %v917_v3 = vsel %vm909_vm8, %v903_v58, %v913_v38  ;;  %v5402_v58 = vstv %s4810_s28  ;;  %s3281_s28 = sld [smem:[#allocation11 + $0x5]] }
 0x2e0   :  { %v5340_v17 = vsel %vm930_vm6, %v917_v3, %v925_v54  ;;  %v1243_v38 = vmul.f32 %v1239_v39, %v1239_v39  ;;  %v1244_v54 = vmul.f32 %v1240_v49, %v1240_v49  ;;  %v1264_v3 = vsub.f32 %v6441_v19, %v5356_v24 }
 0x2e1   :  { %v916_v51 = vsel %vm908_vm9, %v898_v18, %v912_v9  ;;  %v1263_v18 = vsub.f32 %v4726_v2, %v5356_v24  ;;  %v5407_v9 = vstv %s4812_s0  ;;  %v1165_v39 = vmul.f32 %v5376_v8, %v1156_v22  ;;  %s3283_s0 = sld [smem:[#allocation11 + $0x6]] }
 0x2e2   :  { %v5337_v60 = vsel %vm930_vm6, %v916_v51, %v923_v62  ;;  %v1220_v62 = vmul.f32 %v1216_v1, %v1216_v1  ;;  %v5412_v51 = vstv %s6440_s7  ;;  %v1218_v1 = vsub.f32 %v5073_v13, %v5352_v31 }
 0x2e3   :  { %3500 = vmatprep.mubr.msk.f32.mxu0 %vm938_vm7, %v5337_v60  ;;  %v1228_v49 = vmul.f32 %v5388_v63, %v1219_v43  ;;  %v1252_v35 = vmul.f32 %v5393_v10, %v1243_v38  ;;  %v1267_v55 = vmul.f32 %v1263_v18, %v1263_v18  ;;  %v1253_v42 = vmul.f32 %v5393_v10, %v1244_v54 }
 0x2e4   :  { %3501 = vmatmul.mubr.msk.f32.gmra.mxu0 %vm938_vm7, %v5340_v17  ;;  %v1229_v61 = vmul.f32 %v5388_v63, %v1220_v62  ;;  %v1268_v11 = vmul.f32 %v1264_v3, %v1264_v3  ;;  %v1168_v22 = vadd.f32 %v1164_v36, %v1140_v50  ;;  %v1188_v21 = vmul.f32 %v5379_v0, %v1179_v59 }
 0x2e5   :  { %v1306_v43 = vsub.f32 %v5073_v13, %v5362_v48  ;;  %v1327_v38 = vsub.f32 %v4695_v47, %v5364_v20  ;;  %v1169_v18 = vadd.f32 %v1165_v39, %v1141_v27  ;;  %v1189_v56 = vmul.f32 %v5379_v0, %v1180_v12 }
 0x2e6   :  { %v1222_v7 = vmul.f32 %v1218_v1, %v1218_v1  ;;  %v1328_v62 = vsub.f32 %v4704_v53, %v5364_v20  ;;  %v1256_v54 = vadd.f32 %v1252_v35, %v1228_v49  ;;  %v1276_v3 = vmul.f32 %v5402_v58, %v1267_v55 }
 0x2e7   :  { %v5438_v50 = vstv %s6442_s3  ;;  %v1257_v36 = vadd.f32 %v1253_v42, %v1229_v61  ;;  %v1277_v59 = vmul.f32 %v5402_v58, %v1268_v11  ;;  %v1308_v13 = vmul.f32 %v1304_v28, %v1304_v28 }
 0x2e8   :  { %v1351_v5 = vsub.f32 %v4726_v2, %v5373_v34  ;;  %v1143_v27 = vmul.f32 %v5369_v45, %v1134_v33  ;;  %v5444_v12 = vadd.f32 %v1188_v21, %v1168_v22  ;;  %v1310_v39 = vmul.f32 %v1306_v43, %v1306_v43 }
 0x2e9   :  { %v1331_v1 = vmul.f32 %v1327_v38, %v1327_v38  ;;  %v5446_v53 = vadd.f32 %v1189_v56, %v1169_v18  ;;  %v5449_v55 = vmul.f32 %v5388_v63, %v1222_v7  ;;  %v1332_v35 = vmul.f32 %v1328_v62, %v1328_v62 }
 0x2ea   :  { %v1129_v49 = vsub.f32 %v5078_v40, %v5346_v23  ;;  %v5453_v6 = vadd.f32 %v1276_v3, %v1256_v54  ;;  %v1316_v61 = vmul.f32 %v5407_v9, %v1307_v4  ;;  %v1352_v33 = vsub.f32 %v6441_v19, %v5373_v34 }
 0x2eb   :  { %v1153_v42 = vsub.f32 %v5091_v29, %v5348_v37  ;;  %v5460_v11 = vadd.f32 %v1277_v59, %v1257_v36  ;;  %v1317_v56 = vmul.f32 %v5407_v9, %v1308_v13  ;;  %v1355_v7 = vmul.f32 %v1351_v5, %v1351_v5 }
 0x2ec   :  { %v1154_v28 = vsub.f32 %v5094_v32, %v5348_v37  ;;  %v5466_v23 = vmul.f32 %v5407_v9, %v1310_v39  ;;  %v1340_v22 = vmul.f32 %v5412_v51, %v1331_v1  ;;  %v1217_v4 = vsub.f32 %v5078_v40, %v5352_v31 }
 0x2ed   :  { %v1241_v21 = vsub.f32 %v5091_v29, %v5354_v44  ;;  %v1341_v43 = vmul.f32 %v5412_v51, %v1332_v35  ;;  %v1133_v38 = vmul.f32 %v1129_v49, %v1129_v49  ;;  %v1177_v13 = vsub.f32 %v5099_v25, %v5350_v30 }
 0x2ee   :  { %v1242_v37 = vsub.f32 %v5094_v32, %v5354_v44  ;;  %v1356_v5 = vmul.f32 %v1352_v33, %v1352_v33  ;;  %v1157_v18 = vmul.f32 %v1153_v42, %v1153_v42  ;;  %v1305_v62 = vsub.f32 %v5078_v40, %v5362_v48 }
 0x2ef   :  { %v1329_v31 = vsub.f32 %v5091_v29, %v5364_v20  ;;  %v1364_v54 = vmul.f32 %v5438_v50, %v1355_v7  ;;  %v1158_v3 = vmul.f32 %v1154_v28, %v1154_v28  ;;  %v1178_v36 = vsub.f32 %v5104_v14, %v5350_v30 }
 0x2f0   :  { %v1330_v59 = vsub.f32 %v5094_v32, %v5364_v20  ;;  %v1344_v39 = vadd.f32 %v1340_v22, %v1316_v61  ;;  %v1221_v1 = vmul.f32 %v1217_v4, %v1217_v4  ;;  %v1245_v44 = vmul.f32 %v1241_v21, %v1241_v21 }
 0x2f1   :  { %v1265_v35 = vsub.f32 %v5099_v25, %v5356_v24  ;;  %v1142_v48 = vmul.f32 %v5369_v45, %v1133_v38  ;;  %v1181_v49 = vmul.f32 %v1177_v13, %v1177_v13  ;;  %v1246_v33 = vmul.f32 %v1242_v37, %v1242_v37 }
 0x2f2   :  { %v1266_v42 = vsub.f32 %v5104_v14, %v5356_v24  ;;  %v1166_v7 = vmul.f32 %v5376_v8, %v1157_v18  ;;  %v1309_v28 = vmul.f32 %v1305_v62, %v1305_v62  ;;  %v1333_v30 = vmul.f32 %v1329_v31, %v1329_v31 }
 0x2f3   :  { %v1353_v20 = vsub.f32 %v5099_v25, %v5373_v34  ;;  %v1167_v61 = vmul.f32 %v5376_v8, %v1158_v3  ;;  %v1182_v22 = vmul.f32 %v1178_v36, %v1178_v36  ;;  %v1334_v4 = vmul.f32 %v1330_v59, %v1330_v59 }
 0x2f4   :  { %v1354_v21 = vsub.f32 %v5104_v14, %v5373_v34  ;;  %v1345_v45 = vadd.f32 %v1341_v43, %v1317_v56  ;;  %v1230_v38 = vmul.f32 %v5388_v63, %v1221_v1  ;;  %v1254_v13 = vmul.f32 %v5393_v10, %v1245_v44 }
 0x2f5   :  { %v1269_v24 = vmul.f32 %v1265_v35, %v1265_v35  ;;  %v1365_v37 = vmul.f32 %v5438_v50, %v1356_v5  ;;  %v1190_v18 = vmul.f32 %v5379_v0, %v1181_v49  ;;  %v1255_v62 = vmul.f32 %v5393_v10, %v1246_v33 }
 0x2f6   :  { %v1270_v31 = vmul.f32 %v1266_v42, %v1266_v42  ;;  %v1170_v25 = vadd.f32 %v1166_v7, %v1142_v48  ;;  %v1318_v8 = vmul.f32 %v5407_v9, %v1309_v28  ;;  %v1342_v3 = vmul.f32 %v5412_v51, %v1333_v30 }
 0x2f7   :  { %v1357_v36 = vmul.f32 %v1353_v20, %v1353_v20  ;;  %v1171_v34 = vadd.f32 %v1167_v61, %v1143_v27  ;;  %v1191_v56 = vmul.f32 %v5379_v0, %v1182_v22  ;;  %v1343_v63 = vmul.f32 %v5412_v51, %v1334_v4 }
 0x2f8   :  { %v1358_v43 = vmul.f32 %v1354_v21, %v1354_v21  ;;  %v1196_v59 = vsub.f32 0.0, %v5444_v12  ;;  %v1368_v5 = vadd.f32 %v1364_v54, %v1344_v39  ;;  %v1258_v44 = vadd.f32 %v1254_v13, %v1230_v38 }
 0x2f9   :  { %v1278_v10 = vmul.f32 %v5402_v58, %v1269_v24  ;;  %v1197_v35 = vsub.f32 0.0, %v5446_v53  ;;  %v1369_v9 = vadd.f32 %v1365_v37, %v1345_v45  ;;  %v1259_v48 = vadd.f32 %v1255_v62, %v5449_v55 }
 0x2fa   :  { %v1279_v27 = vmul.f32 %v5402_v58, %v1270_v31  ;;  %v1284_v0 = vsub.f32 0.0, %v5453_v6  ;;  %v1194_v49 = vadd.f32 %v1190_v18, %v1170_v25  ;;  %v1346_v51 = vadd.f32 %v1342_v3, %v1318_v8 }
 0x2fb   :  { %v1366_v33 = vmul.f32 %v5438_v50, %v1357_v36  ;;  %v1285_v12 = vsub.f32 0.0, %v5460_v11  ;;  %v1195_v54 = vadd.f32 %v1191_v56, %v1171_v34  ;;  %v1347_v39 = vadd.f32 %v1343_v63, %v5466_v23 }
 0x2fc   :  { %v1367_v42 = vmul.f32 %v5438_v50, %v1358_v43  ;;  %v1200_v7 = vmul.f32 1.442695, %v1196_v59  ;;  %v1372_v53 = vsub.f32 0.0, %v1368_v5  ;;  %v1282_v55 = vadd.f32 %v1278_v10, %v1258_v44  ;;  %v5548_v5 = vld [vmem:[%s6407_s24] sm:$0xff]  ;;  %v5554_v10 = vld [vmem:[%s6407_s24 + $0x8] sm:$0xff] }
 0x2fd   :  { %v1202_v30 = vmul.f32 1.442695, %v1197_v35  ;;  %v1373_v58 = vsub.f32 0.0, %v1369_v9  ;;  %v1283_v20 = vadd.f32 %v1279_v27, %v1259_v48  ;;  %v1288_v6 = vmul.f32 1.442695, %v1284_v0 }
 0x2fe   :  { %v1198_v61 = vsub.f32 0.0, %v1194_v49  ;;  %v1370_v22 = vadd.f32 %v1366_v33, %v1346_v51  ;;  %v1290_v4 = vmul.f32 1.442695, %v1285_v12  ;;  %v1199_v11 = vsub.f32 0.0, %v1195_v54 }
 0x2ff   :  { %v1371_v23 = vadd.f32 %v1367_v42, %v1347_v39  ;;  %4045 = vpow2.f32 %v1200_v7  ;;  %v1376_v50 = vmul.f32 1.442695, %v1372_v53  ;;  %v1286_v45 = vsub.f32 0.0, %v1282_v55 }
 0x300   :  { %4047 = vpow2.f32 %v1202_v30  ;;  %v1378_v38 = vmul.f32 1.442695, %v1373_v58  ;;  %v1287_v13 = vsub.f32 0.0, %v1283_v20  ;;  %v1204_v24 = vmul.f32 1.442695, %v1198_v61 }
 0x301   :  { %4049 = vpow2.f32 %v1288_v6  ;;  %v1374_v37 = vsub.f32 0.0, %v1370_v22  ;;  %v1206_v18 = vmul.f32 1.442695, %v1199_v11  ;;  %v1375_v62 = vsub.f32 0.0, %v1371_v23 }
 0x302   :  { %4051 = vpow2.f32 %v1290_v4  ;;  %v1292_v31 = vmul.f32 1.442695, %v1286_v45  ;;  %v1294_v8 = vmul.f32 1.442695, %v1287_v13  ;;  %v6444_v45 = vld [vmem:[#allocation43_spill] sm:$0xff] }
 0x303   :  { %4053 = vpow2.f32 %v1376_v50  ;;  %v1380_v3 = vmul.f32 1.442695, %v1374_v37  ;;  %v1382_v36 = vmul.f32 1.442695, %v1375_v62 }
 0x304   :  { %4055 = vpow2.f32 %v1378_v38  ;;  %v1109_v38 = vsub.f32 0.0, %v6444_v45 }
 0x305   :  { %4057 = vpow2.f32 %v1204_v24 }
 0x306   :  { %4059 = vpow2.f32 %v1206_v18  ;;  %v1114_v37 = vmul.f32 1.442695, %v1109_v38 }
 0x307   :  { %4061 = vpow2.f32 %v1292_v31 }
 0x308   :  { %4063 = vpow2.f32 %v1294_v8 }
 0x309   :  { %4065 = vpow2.f32 %v1380_v3 }
 0x30a   :  { %4067 = vpow2.f32 %v1382_v36 }
 0x30c   :  { %v4046_v34 = vpop.eup %4045 }
 0x30d   :  { %v4048_v56 = vpop.eup %4047  ;;  %v1208_v44 = vmul.f32 %v5548_v5, %v4046_v34 }
 0x30e   :  { %v4050_v63 = vpop.eup %4049  ;;  %v1209_v35 = vmul.f32 %v5554_v10, %v4048_v56 }
 0x30f   :  { %v4052_v43 = vpop.eup %4051  ;;  %v1296_v27 = vmul.f32 %v5548_v5, %v4050_v63 }
 0x310   :  { %v4054_v59 = vpop.eup %4053  ;;  %v1297_v0 = vmul.f32 %v5554_v10, %v4052_v43  ;;  %v3827_v33 = vpack.i.bf16 %v1209_v35, %v1208_v44 }
 0x311   :  { %v4056_v9 = vpop.eup %4055  ;;  %v1384_v12 = vmul.f32 %v5548_v5, %v4054_v59 }
 0x312   :  { %v4058_v48 = vpop.eup %4057  ;;  %v1385_v54 = vmul.f32 %v5554_v10, %v4056_v9  ;;  %v3832_v7 = vpack.i.bf16 %v1297_v0, %v1296_v27 }
 0x313   :  { %v4060_v49 = vpop.eup %4059  ;;  %v1210_v53 = vmul.f32 %v4058_v48, %v5182_v41 }
 0x314   :  { %v4062_v51 = vpop.eup %4061  ;;  %v1211_v55 = vmul.f32 %v4060_v49, %v5188_v52  ;;  %v3837_v58 = vpack.i.bf16 %v1385_v54, %v1384_v12 }
 0x315   :  { %v4064_v39 = vpop.eup %4063  ;;  %v1298_v20 = vmul.f32 %v4062_v51, %v5182_v41 }
 0x316   :  { %v4066_v42 = vpop.eup %4065  ;;  %v1299_v6 = vmul.f32 %v4064_v39, %v5188_v52  ;;  %v3842_v61 = vpack.i.bf16 %v1211_v55, %v1210_v53 }
 0x317   :  { %v4068_v30 = vpop.eup %4067  ;;  %v1386_v22 = vmul.f32 %v4066_v42, %v5182_v41  ;;  %v6443_v41 = vld [vmem:[#allocation42_spill] sm:$0xff] }
 0x318   :  { %v1387_v4 = vmul.f32 %v4068_v30, %v5188_v52  ;;  %v3847_v11 = vpack.i.bf16 %v1299_v6, %v1298_v20  ;;  %v1108_v52 = vsub.f32 0.0, %v6443_v41  ;;  %v5604_v30 = vld [vmem:[%s6407_s24 + $0x10] sm:$0xff] }
 0x31a   :  { %v3852_v23 = vpack.i.bf16 %v1387_v4, %v1386_v22  ;;  %v1112_v24 = vmul.f32 1.442695, %v1108_v52 }
 0x31c   :  { %4069 = vpow2.f32 %v1112_v24 }
 0x31d   :  { %4071 = vpow2.f32 %v1114_v37 }
 0x329   :  { %v4070_v56 = vpop.eup %4069 }
 0x32a   :  { %v4072_v63 = vpop.eup %4071  ;;  %v1120_v48 = vmul.f32 %v5548_v5, %v4070_v56 }
 0x32b   :  { %v1121_v44 = vmul.f32 %v5554_v10, %v4072_v63 }
 0x383   :  { %v5508_v1 = vpop.f32.mrf.mxu0 }
 0x385   :  { %v5519_v28 = vpop.f32.mrf.mxu0 }
 0x3a4   :  { %v5521_v25 = vpop.f32.mrf.mxu0 }
 0x3a5   :  { %1482 = vrot.lane.b32.xlu0 %v5521_v25, %s6398_s2 }
 0x3a6   :  { %v5525_v21 = vpop.f32.mrf.mxu0 }
 0x3a7   :  { %1480 = vrot.lane.b32.xlu1 %v5525_v21, %s6398_s2 }
 0x3a9   :  { %1478 = vrot.lane.b32.xlu0 %v5508_v1, %s6398_s2 }
 0x3ab   :  { %1476 = vrot.lane.b32.xlu1 %v5519_v28, %s6398_s2 }
 0x3ad   :  { %1470 = vrot.lane.b32.xlu0 %v5521_v25, %s6402_s12 }
 0x3af   :  { %1468 = vrot.lane.b32.xlu1 %v5525_v21, %s6402_s12 }
 0x3b1   :  { %1466 = vrot.lane.b32.xlu0 %v5508_v1, %s6402_s12 }
 0x3b3   :  { %1464 = vrot.lane.b32.xlu1 %v5519_v28, %s6402_s12 }
 0x3b5   :  { %1458 = vrot.lane.b32.xlu0 %v5521_v25, %s4294_s18 }
 0x3b7   :  { %1456 = vrot.lane.b32.xlu1 %v5525_v21, %s4294_s18 }
 0x3b9   :  { %1454 = vrot.lane.b32.xlu0 %v5508_v1, %s4294_s18 }
 0x3bb   :  { %1452 = vrot.lane.b32.xlu1 %v5519_v28, %s4294_s18 }
 0x3bd   :  { %3828 = vrot.lane.b32.xlu0 %v3827_v33, %s4295_s13 }
 0x3bf   :  { %3833 = vrot.lane.b32.xlu1 %v3832_v7, %s4296_s29 }
 0x3c1   :  { %3838 = vrot.lane.b32.xlu0 %v3837_v58, %s6402_s12 }
 0x3c3   :  { %3843 = vrot.lane.b32.xlu1 %v3842_v61, %s4295_s13 }
 0x3c5   :  { %3848 = vrot.lane.b32.xlu0 %v3847_v11, %s4296_s29 }
 0x3c7   :  { %3853 = vrot.lane.b32.xlu1 %v3852_v23, %s6402_s12 }
 0x3c9   :  { %1592 = vrot.lane.b32.xlu0 %v5327_v26, %s4297_s20 }
 0x3cb   :  { %1594 = vrot.lane.b32.xlu1 %v5330_v16, %s4297_s20  ;;  %v1110_v16 = vsub.f32 0.0, %v5238_v57 }
 0x3cd   :  { %1596 = vrot.lane.b32.xlu0 %v5337_v60, %s4297_s20  ;;  %v1116_v62 = vmul.f32 1.442695, %v1110_v16  ;;  %v1611_v16 = vld [vmem:[%s6445_s1 + $0x18] sm:$0xff] }
 0x3cf   :  { %1598 = vrot.lane.b32.xlu1 %v5340_v17, %s4297_s20  ;;  %v1111_v17 = vsub.f32 0.0, %v5240_v46  ;;  %4073 = vpow2.f32 %v1116_v62  ;;  %v3268_v62 = vld [vmem:[%s6446_s14] ss:$0 sm:$0xff]  ;;  %s4298_s14 = smov 104  }
 0x3d1   :  { %v1118_v8 = vmul.f32 1.442695, %v1111_v17  ;;  %v1609_v17 = vld [vmem:[%s6445_s1 + $0x8] sm:$0xff] }
 0x3d3   :  { %4075 = vpow2.f32 %v1118_v8 }
 0x3dc   :  { %v4074_v27 = vpop.eup %4073 }
 0x3dd   :  { %v1122_v58 = vmul.f32 %v5604_v30, %v4074_v27 }
 0x3e0   :  { %v4076_v49 = vpop.eup %4075 }
 0x417   :  { %v1483_v50 = vpop.permute.xlu0 %1482 }
 0x418   :  { %3503 = vmatprep.subr.mxu0 %v1483_v50 }
 0x419   :  { %3504 = vmatpush3.msra.mxu0 %v1483_v50  ;;  %v1481_v13 = vpop.permute.xlu1 %1480 }
 0x41a   :  { %3505 = vmatprep.subr.mxu0 %v1481_v13 }
 0x41b   :  { %v1479_v26 = vpop.permute.xlu0 %1478  ;;  %3506 = vmatpush3.msra.mxu0 %v1481_v13 }
 0x41c   :  { %3507 = vmatprep.subr.mxu0 %v1479_v26 }
 0x41d   :  { %3508 = vmatpush3.msra.mxu0 %v1479_v26  ;;  %v1477_v60 = vpop.permute.xlu1 %1476 }
 0x41e   :  { %3509 = vmatprep.subr.mxu0 %v1477_v60 }
 0x41f   :  { %v1471_v18 = vpop.permute.xlu0 %1470  ;;  %3510 = vmatpush3.msra.mxu0 %v1477_v60  ;;  %v1610_v60 = vld [vmem:[%s6445_s1 + $0x10] sm:$0xff] }
 0x420   :  { %3511 = vmatprep.subr.mxu0 %v1471_v18 }
 0x421   :  { %3512 = vmatpush3.msra.mxu0 %v1471_v18  ;;  %v1469_v31 = vpop.permute.xlu1 %1468  ;;  %v1608_v18 = vld [vmem:[%s6445_s1] sm:$0xff] }
 0x422   :  { %3513 = vmatprep.subr.mxu0 %v1469_v31 }
 0x423   :  { %v1467_v3 = vpop.permute.xlu0 %1466  ;;  %3514 = vmatpush3.msra.mxu0 %v1469_v31 }
 0x424   :  { %3515 = vmatprep.subr.mxu0 %v1467_v3 }
 0x425   :  { %3516 = vmatpush3.msra.mxu0 %v1467_v3  ;;  %v1465_v57 = vpop.permute.xlu1 %1464 }
 0x426   :  { %3517 = vmatprep.subr.mxu0 %v1465_v57 }
 0x427   :  { %v1459_v46 = vpop.permute.xlu0 %1458  ;;  %3518 = vmatpush3.msra.mxu0 %v1465_v57 }
 0x428   :  { %3519 = vmatprep.subr.mxu0 %v1459_v46 }
 0x429   :  { %3520 = vmatpush3.msra.mxu0 %v1459_v46  ;;  %v1457_v36 = vpop.permute.xlu1 %1456 }
 0x42a   :  { %3521 = vmatprep.subr.mxu0 %v1457_v36 }
 0x42b   :  { %v1455_v34 = vpop.permute.xlu0 %1454  ;;  %3522 = vmatpush3.msra.mxu0 %v1457_v36 }
 0x42c   :  { %3523 = vmatprep.subr.mxu0 %v1455_v34 }
 0x42d   :  { %3524 = vmatpush3.msra.mxu0 %v1455_v34  ;;  %v1453_v43 = vpop.permute.xlu1 %1452 }
 0x42e   :  { %3525 = vmatprep.subr.mxu0 %v1453_v43 }
 0x42f   :  { %v3829_v59 = vpop.permute.xlu0 %3828  ;;  %3526 = vmatpush3.msra.mxu0 %v1453_v43 }
 0x430   :  { %v3831_v35 = vunpack.i.h.bf16 %v3829_v59  ;;  %v3830_v9 = vunpack.i.l.bf16 %v3829_v59  ;;  %3527 = vmatprep.subr.mxu0 %v5521_v25 }
 0x431   :  { %3528 = vmatpush3.msra.mxu0 %v5521_v25  ;;  %v3834_v0 = vpop.permute.xlu1 %3833 }
 0x432   :  { %v1437_v51 = vsel %vm759_vm1, %v1121_v44, %v3831_v35  ;;  %v3836_v33 = vunpack.i.h.bf16 %v3834_v0  ;;  %v3835_v12 = vunpack.i.l.bf16 %v3834_v0  ;;  %3529 = vmatprep.subr.mxu0 %v5525_v21  ;;  %v1436_v54 = vsel %vm759_vm1, %v1120_v48, %v3830_v9 }
 0x433   :  { %v3839_v39 = vpop.permute.xlu0 %3838  ;;  %3530 = vmatpush3.msra.mxu0 %v5525_v21  ;;  %v5610_v21 = vld [vmem:[%s6407_s24 + $0x18] sm:$0xff] }
 0x434   :  { %v1441_v42 = vsel %vm764_vm2, %v1437_v51, %v3836_v33  ;;  %v3841_v7 = vunpack.i.h.bf16 %v3839_v39  ;;  %v3840_v53 = vunpack.i.l.bf16 %v3839_v39  ;;  %3531 = vmatprep.subr.mxu0 %v5508_v1  ;;  %v1440_v25 = vsel %vm764_vm2, %v1436_v54, %v3835_v12 }
 0x435   :  { %3532 = vmatpush3.msra.mxu0 %v5508_v1  ;;  %v3844_v55 = vpop.permute.xlu1 %3843  ;;  %v1123_v20 = vmul.f32 %v5610_v21, %v4076_v49 }
 0x436   :  { %v3846_v6 = vunpack.i.h.bf16 %v3844_v55  ;;  %v3845_v61 = vunpack.i.l.bf16 %v3844_v55  ;;  %3533 = vmatprep.subr.mxu0 %v5519_v28  ;;  %v1444_v1 = vsel %vm769_vm3, %v1440_v25, %v3840_v53  ;;  %v1445_v22 = vsel %vm769_vm3, %v1441_v42, %v3841_v7 }
 0x437   :  { %v3849_v4 = vpop.permute.xlu0 %3848  ;;  %3534 = vmatpush3.msra.mxu0 %v5519_v28  ;;  %3535 = vmatprep.mubr.f32.mxu0 %v1444_v1  ;;  %v1612_v28 = vld [vmem:[%s6445_s1 + $0x20] sm:$0xff]  ;;  %s6448_s1 = sld [smem:[#allocation51_spill]]  ;;  %v5661_v7 = vstv %s3277_s26  ;;  %v5663_v53 = vstv %s3279_s17  ;;  %v5665_v25 = vstv %s3281_s28  ;;  %s4299_s26 = smov 120  }
 0x438   :  { %v3851_v11 = vunpack.i.h.bf16 %v3849_v4  ;;  %v3850_v23 = vunpack.i.l.bf16 %v3849_v4  ;;  %3536 = vmatmul.mubr.f32.vlgmr.msra.gmra.mxu0 %v1445_v22  ;;  %v1438_v41 = vsel %vm759_vm1, %v1122_v58, %v3845_v61  ;;  %v1439_v52 = vsel %vm759_vm1, %v1123_v20, %v3846_v6  ;;  %3541 = vmatprep.subr.mxu1 %v1612_v28  ;;  %v6452_v4 = vld [vmem:[#allocation24_spill] sm:$0xff] }
 0x439   :  { %v3854_v50 = vpop.permute.xlu1 %3853  ;;  %3542 = vmatpush3.msra.mxu1 %v1612_v28  ;;  %v5667_v55 = vstv %s3283_s0  ;;  %v5669_v58 = vstv %s3285_s22  ;;  %v5671_v20 = vstv %s3287_s23  ;;  %v1802_v6 = vsub.f32 %v6438_v15, %v5661_v7  ;;  %s6462_s23 = sld [smem:[#allocation79_spill]] }
 0x43a   :  { %v3856_v45 = vunpack.i.h.bf16 %v3854_v50  ;;  %v3855_v38 = vunpack.i.l.bf16 %v3854_v50  ;;  %v1442_v13 = vsel %vm764_vm2, %v1438_v41, %v3850_v23  ;;  %v1443_v24 = vsel %vm764_vm2, %v1439_v52, %v3851_v11  ;;  %3543 = vmatprep.subr.mxu1 %v1611_v16  ;;  %v6453_v41 = vld [vmem:[#allocation27_spill] sm:$0xff] }
 0x43b   :  { %3544 = vmatpush3.msra.mxu1 %v1611_v16  ;;  %v1593_v63 = vpop.permute.xlu0 %1592  ;;  %v1826_v61 = vsub.f32 %v4695_v47, %v5663_v53  ;;  %v5677_v1 = vstv %s3289_s21  ;;  %v5679_v22 = vstv %s3291_s15  ;;  %v1803_v11 = vsub.f32 %v6452_v4, %v5661_v7  ;;  %s3304_s21 = sld [smem:[#allocation14 + $0x3]] }
 0x43c   :  { %v1446_v26 = vsel %vm769_vm3, %v1442_v13, %v3855_v38  ;;  %v1447_v37 = vsel %vm769_vm3, %v1443_v24, %v3856_v45  ;;  %3545 = vmatprep.subr.mxu1 %v1610_v60  ;;  %v5684_v23 = vstv %s6447_s25  ;;  %v1827_v52 = vsub.f32 %v6453_v41, %v5663_v53  ;;  %s3306_s15 = sld [smem:[#allocation14 + $0x4]] }
 0x43d   :  { %3538 = vmatprep.mubr.f32.mxu0 %v1446_v26  ;;  %3546 = vmatpush3.msra.mxu1 %v1610_v60  ;;  %v1595_v44 = vpop.permute.xlu1 %1594  ;;  %v5688_v50 = vstv %s3293_s8  ;;  %v5691_v45 = vstv %s6448_s1  ;;  %v5694_v38 = vstv %s6449_s27  ;;  %v1890_v13 = vsub.f32 %v6438_v15, %v5667_v55  ;;  %v6455_v60 = vld [vmem:[#allocation66_spill] sm:$0xff]  ;;  %s3310_s1 = sld [smem:[#allocation14 + $0x6]] }
 0x43e   :  { %3539 = vmatmul.mubr.f32.gmra.mxu0 %v1447_v37  ;;  %3547 = vmatprep.subr.mxu1 %v1609_v17  ;;  %v1914_v24 = vsub.f32 %v4695_v47, %v5669_v58  ;;  %v1891_v26 = vsub.f32 %v6452_v4, %v5667_v55  ;;  %v5703_v37 = vstv %s6450_s10  ;;  %v1915_v28 = vsub.f32 %v6453_v41, %v5669_v58  ;;  %s3308_s8 = sld [smem:[#allocation14 + $0x5]]  ;;  %s3749_s10 = spop %3748 }
 0x43f   :  { %3548 = vmatpush3.msra.mxu1 %v1609_v17  ;;  %v1597_v33 = vpop.permute.xlu0 %1596  ;;  %v5708_v16 = vstv %s6451_s4  ;;  %v1805_v17 = vsub.f32 %v6455_v60, %v5661_v7  ;;  %s3312_s27 = sld [smem:[#allocation14 + $0x7]] }
 0x440   :  { %3549 = vmatprep.subr.mxu1 %v1608_v18  ;;  %s3316_s4 = sld [smem:[#allocation14 + $0x9]] }
 0x441   :  { %3550 = vmatpush3.msra.mxu1 %v1608_v18  ;;  %v1599_v54 = vpop.permute.xlu1 %1598  ;;  %v1806_v18 = vmul.f32 %v1802_v6, %v1802_v6  ;;  %v1893_v6 = vsub.f32 %v6455_v60, %v5667_v55 }
 0x4f8   :  { %v3537_v31 = vpop.f32.mrf.mxu0 }
 0x4f9   :  { %v1567_v8 = vadd.f32 %v3537_v31, %v3268_v62  ;;  %v1850_v31 = vsub.f32 %v4726_v2, %v5665_v25 }
 0x4fa   :  { %v1561_v3 = vpop.f32.mrf.mxu0 }
 0x4fb   :  { %vm1581_vm10 = vcmp.gt.f32.partialorder %v1567_v8, 0.0  ;;  %v1585_v57 = vmul.f32 0.01, %v1567_v8  ;;  %v1562_v46 = vadd.f32 %v3268_v62, %v1561_v3  ;;  %v1831_v3 = vmul.f32 %v1827_v52, %v1827_v52 }
 0x4fd   :  { %vm1580_vm11 = vcmp.gt.f32.partialorder %v1562_v46, 0.0  ;;  %v1584_v36 = vmul.f32 0.01, %v1562_v46  ;;  %v1589_v34 = vsel %vm1581_vm10, %v1567_v8, %v1585_v57  ;;  %v1807_v8 = vmul.f32 %v1803_v11, %v1803_v11 }
 0x4fe   :  { %v3540_v56 = vpop.f32.mrf.mxu0  ;;  %v5645_v48 = vsel %vm930_vm6, %v1589_v34, %v1595_v44  ;;  %v1851_v57 = vsub.f32 %v6441_v19, %v5665_v25  ;;  %v1918_v34 = vmul.f32 %v1914_v24, %v1914_v24  ;;  %v1939_v44 = vsub.f32 %v6441_v19, %v5671_v20 }
 0x4ff   :  { %v1588_v43 = vsel %vm1580_vm11, %v1562_v46, %v1584_v36  ;;  %v1577_v59 = vadd.f32 %v3540_v56, %v3268_v62  ;;  %v5717_v46 = vstv %s6454_s5  ;;  %v1894_v36 = vmul.f32 %v1890_v13, %v1890_v13  ;;  %s3751_s5 = spop %3750 }
 0x500   :  { %v1571_v35 = vpop.f32.mrf.mxu0  ;;  %v5642_v9 = vsel %vm930_vm6, %v1588_v43, %v1593_v63  ;;  %v1938_v56 = vsub.f32 %v4726_v2, %v5671_v20  ;;  %v5722_v63 = vstv %s4904_s19  ;;  %v1895_v43 = vmul.f32 %v1891_v26, %v1891_v26  ;;  %s3314_s19 = sld [smem:[#allocation14 + $0x8]] }
 0x501   :  { %vm1583_vm13 = vcmp.gt.f32.partialorder %v1577_v59, 0.0  ;;  %v1587_v27 = vmul.f32 0.01, %v1577_v59  ;;  %v1572_v0 = vadd.f32 %v3268_v62, %v1571_v35  ;;  %3551 = vmatprep.mubr.msk.f32.mxu1 %vm1613_vm12, %v5642_v9  ;;  %v1830_v62 = vmul.f32 %v1826_v61, %v1826_v61 }
 0x502   :  { %3552 = vmatmul.mubr.msk.f32.vlgmr.msra.gmra.mxu1 %vm1613_vm12, %v5645_v48  ;;  %v5727_v35 = vstv %s4922_s16  ;;  %v1903_v61 = vmul.f32 %v5703_v37, %v1894_v36  ;;  %v1927_v11 = vmul.f32 %v5708_v16, %v1918_v34  ;;  %v1942_v52 = vmul.f32 %v1938_v56, %v1938_v56  ;;  %s6457_s16 = sld [smem:[#allocation80_spill]] }
 0x503   :  { %vm1582_vm14 = vcmp.gt.f32.partialorder %v1572_v0, 0.0  ;;  %v1586_v49 = vmul.f32 0.01, %v1572_v0  ;;  %v1591_v51 = vsel %vm1583_vm13, %v1577_v59, %v1587_v27  ;;  %v1919_v59 = vmul.f32 %v1915_v28, %v1915_v28 }
 0x504   :  { %v5657_v42 = vsel %vm930_vm6, %v1591_v51, %v1599_v54  ;;  %v1809_v27 = vmul.f32 %v1805_v17, %v1805_v17  ;;  %v1854_v51 = vmul.f32 %v1850_v31, %v1850_v31  ;;  %v1855_v54 = vmul.f32 %v1851_v57, %v1851_v57 }
 0x505   :  { %v1590_v12 = vsel %vm1582_vm14, %v1572_v0, %v1586_v49  ;;  %v1815_v0 = vmul.f32 %v5684_v23, %v1806_v18  ;;  %v1839_v49 = vmul.f32 %v5691_v45, %v1830_v62  ;;  %v1978_v13 = vsub.f32 %v6438_v15, %v5677_v1 }
 0x506   :  { %v5652_v39 = vsel %vm930_vm6, %v1590_v12, %v1597_v33  ;;  %v1816_v33 = vmul.f32 %v5684_v23, %v1807_v8  ;;  %v1840_v12 = vmul.f32 %v5691_v45, %v1831_v3  ;;  %v1904_v24 = vmul.f32 %v5703_v37, %v1895_v43 }
 0x507   :  { %3554 = vmatprep.mubr.msk.f32.mxu1 %vm1613_vm12, %v5652_v39  ;;  %v1928_v26 = vmul.f32 %v5708_v16, %v1919_v59  ;;  %v1943_v28 = vmul.f32 %v1939_v44, %v1939_v44  ;;  %v1979_v17 = vsub.f32 %v6452_v4, %v5677_v1  ;;  %v1843_v18 = vadd.f32 %v1839_v49, %v1815_v0 }
 0x508   :  { %3555 = vmatmul.mubr.msk.f32.gmra.mxu1 %vm1613_vm12, %v5657_v42  ;;  %v1863_v62 = vmul.f32 %v5694_v38, %v1854_v51  ;;  %v1981_v31 = vsub.f32 %v6455_v60, %v5677_v1  ;;  %v2002_v8 = vsub.f32 %v4695_v47, %v5679_v22  ;;  %v1844_v3 = vadd.f32 %v1840_v12, %v1816_v33 }
 0x509   :  { %v1864_v57 = vmul.f32 %v5694_v38, %v1855_v54  ;;  %v2003_v36 = vsub.f32 %v6453_v41, %v5679_v22  ;;  %v5752_v34 = vstv %s4953_s11  ;;  %v1897_v56 = vmul.f32 %v1893_v6, %v1893_v6 }
 0x50a   :  { %v1931_v43 = vadd.f32 %v1927_v11, %v1903_v61  ;;  %v1951_v59 = vmul.f32 %v5717_v46, %v1942_v52  ;;  %v1982_v44 = vmul.f32 %v1978_v13, %v1978_v13  ;;  %v1932_v0 = vadd.f32 %v1928_v26, %v1904_v24 }
 0x50b   :  { %v1952_v49 = vmul.f32 %v5717_v46, %v1943_v28  ;;  %v1983_v51 = vmul.f32 %v1979_v17, %v1979_v17  ;;  %v2026_v60 = vsub.f32 %v4726_v2, %v5688_v50  ;;  %v1818_v33 = vmul.f32 %v5684_v23, %v1809_v27 }
 0x50c   :  { %v5759_v12 = vadd.f32 %v1863_v62, %v1843_v18  ;;  %v1985_v54 = vmul.f32 %v1981_v31, %v1981_v31  ;;  %v2006_v41 = vmul.f32 %v2002_v8, %v2002_v8  ;;  %v5761_v47 = vadd.f32 %v1864_v57, %v1844_v3 }
 0x50d   :  { %v2007_v6 = vmul.f32 %v2003_v36, %v2003_v36  ;;  %v1804_v61 = vsub.f32 %v5078_v40, %v5661_v7  ;;  %v1828_v11 = vsub.f32 %v5091_v29, %v5663_v53  ;;  %v5768_v52 = vmul.f32 %v5703_v37, %v1897_v56 }
 0x50e   :  { %v5770_v13 = vadd.f32 %v1951_v59, %v1931_v43  ;;  %v1991_v27 = vmul.f32 %v5722_v63, %v1982_v44  ;;  %v2027_v24 = vsub.f32 %v6441_v19, %v5688_v50  ;;  %v5775_v26 = vadd.f32 %v1952_v49, %v1932_v0 }
 0x50f   :  { %v1992_v28 = vmul.f32 %v5722_v63, %v1983_v51  ;;  %v2030_v17 = vmul.f32 %v2026_v60, %v2026_v60  ;;  %v1829_v7 = vsub.f32 %v5094_v32, %v5663_v53  ;;  %v5781_v18 = vmul.f32 %v5722_v63, %v1985_v54  ;;  %v6456_v53 = vld [vmem:[#allocation67_spill] sm:$0xff] }
 0x510   :  { %v2015_v62 = vmul.f32 %v5727_v35, %v2006_v41  ;;  %v1892_v31 = vsub.f32 %v5078_v40, %v5667_v55  ;;  %v1916_v8 = vsub.f32 %v5091_v29, %v5669_v58  ;;  %v2016_v3 = vmul.f32 %v5727_v35, %v2007_v6 }
 0x511   :  { %v1808_v57 = vmul.f32 %v1804_v61, %v1804_v61  ;;  %v1832_v36 = vmul.f32 %v1828_v11, %v1828_v11  ;;  %v1917_v60 = vsub.f32 %v5094_v32, %v5669_v58  ;;  %v2031_v56 = vmul.f32 %v2027_v24, %v2027_v24 }
 0x512   :  { %v1852_v43 = vsub.f32 %v6456_v53, %v5665_v25  ;;  %v1980_v41 = vsub.f32 %v5078_v40, %v5677_v1  ;;  %v2004_v55 = vsub.f32 %v5091_v29, %v5679_v22  ;;  %v2039_v59 = vmul.f32 %v5752_v34, %v2030_v17 }
 0x513   :  { %v1833_v44 = vmul.f32 %v1829_v7, %v1829_v7  ;;  %v1853_v0 = vsub.f32 %v5104_v14, %v5665_v25  ;;  %v2005_v49 = vsub.f32 %v5094_v32, %v5679_v22  ;;  %v2019_v58 = vadd.f32 %v2015_v62, %v1991_v27 }
 0x514   :  { %v1896_v51 = vmul.f32 %v1892_v31, %v1892_v31  ;;  %v1920_v54 = vmul.f32 %v1916_v8, %v1916_v8  ;;  %v1940_v6 = vsub.f32 %v6456_v53, %v5671_v20  ;;  %v1817_v1 = vmul.f32 %v5684_v23, %v1808_v57 }
 0x515   :  { %v1841_v61 = vmul.f32 %v5691_v45, %v1832_v36  ;;  %v1921_v11 = vmul.f32 %v1917_v60, %v1917_v60  ;;  %v1941_v24 = vsub.f32 %v5104_v14, %v5671_v20  ;;  %v1856_v17 = vmul.f32 %v1852_v43, %v1852_v43 }
 0x516   :  { %v1984_v7 = vmul.f32 %v1980_v41, %v1980_v41  ;;  %v2008_v25 = vmul.f32 %v2004_v55, %v2004_v55  ;;  %v2028_v22 = vsub.f32 %v6456_v53, %v5688_v50  ;;  %v1842_v27 = vmul.f32 %v5691_v45, %v1833_v44 }
 0x517   :  { %v1857_v62 = vmul.f32 %v1853_v0, %v1853_v0  ;;  %v2009_v31 = vmul.f32 %v2005_v49, %v2005_v49  ;;  %v2029_v8 = vsub.f32 %v5104_v14, %v5688_v50  ;;  %v2020_v23 = vadd.f32 %v2016_v3, %v1992_v28 }
 0x518   :  { %v1905_v57 = vmul.f32 %v5703_v37, %v1896_v51  ;;  %v1929_v36 = vmul.f32 %v5708_v16, %v1920_v54  ;;  %v1944_v60 = vmul.f32 %v1940_v6, %v1940_v6  ;;  %v2040_v20 = vmul.f32 %v5752_v34, %v2031_v56 }
 0x519   :  { %v1845_v43 = vadd.f32 %v1841_v61, %v1817_v1  ;;  %v1930_v41 = vmul.f32 %v5708_v16, %v1921_v11  ;;  %v1945_v55 = vmul.f32 %v1941_v24, %v1941_v24  ;;  %v1865_v53 = vmul.f32 %v5694_v38, %v1856_v17 }
 0x51a   :  { %v1993_v45 = vmul.f32 %v5722_v63, %v1984_v7  ;;  %v2017_v44 = vmul.f32 %v5727_v35, %v2008_v25  ;;  %v2032_v0 = vmul.f32 %v2028_v22, %v2028_v22  ;;  %v1846_v50 = vadd.f32 %v1842_v27, %v1818_v33 }
 0x51b   :  { %v1866_v28 = vmul.f32 %v5694_v38, %v1857_v62  ;;  %v2018_v37 = vmul.f32 %v5727_v35, %v2009_v31  ;;  %v2033_v3 = vmul.f32 %v2029_v8, %v2029_v8  ;;  %v1871_v49 = vsub.f32 0.0, %v5759_v12 }
 0x51c   :  { %v2043_v56 = vadd.f32 %v2039_v59, %v2019_v58  ;;  %v1933_v16 = vadd.f32 %v1929_v36, %v1905_v57  ;;  %v1953_v54 = vmul.f32 %v5717_v46, %v1944_v60  ;;  %v1872_v6 = vsub.f32 0.0, %v5761_v47 }
 0x51d   :  { %v2044_v63 = vadd.f32 %v2040_v20, %v2020_v23  ;;  %v1934_v1 = vadd.f32 %v1930_v41, %v5768_v52  ;;  %v1954_v33 = vmul.f32 %v5717_v46, %v1945_v55  ;;  %v1959_v38 = vsub.f32 0.0, %v5770_v13 }
 0x51e   :  { %v1869_v61 = vadd.f32 %v1865_v53, %v1845_v43  ;;  %v2021_v35 = vadd.f32 %v2017_v44, %v1993_v45  ;;  %v2041_v11 = vmul.f32 %v5752_v34, %v2032_v0  ;;  %v1960_v12 = vsub.f32 0.0, %v5775_v26 }
 0x51f   :  { %v1870_v59 = vadd.f32 %v1866_v28, %v1846_v50  ;;  %v2022_v58 = vadd.f32 %v2018_v37, %v5781_v18  ;;  %v2042_v24 = vmul.f32 %v5752_v34, %v2033_v3  ;;  %v1875_v17 = vmul.f32 1.442695, %v1871_v49 }
 0x520   :  { %v2047_v47 = vsub.f32 0.0, %v2043_v56  ;;  %v1957_v52 = vadd.f32 %v1953_v54, %v1933_v16  ;;  %v1877_v25 = vmul.f32 1.442695, %v1872_v6  ;;  %v2048_v46 = vsub.f32 0.0, %v2044_v63 }
 0x521   :  { %v1958_v22 = vadd.f32 %v1954_v33, %v1934_v1  ;;  %v1963_v13 = vmul.f32 1.442695, %v1959_v38  ;;  %v1873_v27 = vsub.f32 0.0, %v1869_v61  ;;  %v2045_v62 = vadd.f32 %v2041_v11, %v2021_v35 }
 0x522   :  { %v1965_v31 = vmul.f32 1.442695, %v1960_v12  ;;  %v1874_v26 = vsub.f32 0.0, %v1870_v59  ;;  %v2046_v18 = vadd.f32 %v2042_v24, %v2022_v58  ;;  %4077 = vpow2.f32 %v1875_v17 }
 0x523   :  { %v2051_v34 = vmul.f32 1.442695, %v2047_v47  ;;  %v1961_v23 = vsub.f32 0.0, %v1957_v52  ;;  %4079 = vpow2.f32 %v1877_v25  ;;  %v2053_v57 = vmul.f32 1.442695, %v2048_v46 }
 0x524   :  { %v1962_v36 = vsub.f32 0.0, %v1958_v22  ;;  %4081 = vpow2.f32 %v1963_v13  ;;  %v1879_v60 = vmul.f32 1.442695, %v1873_v27  ;;  %v2049_v20 = vsub.f32 0.0, %v2045_v62  ;;  %v2289_v62 = vld [vmem:[%s6457_s16 + $0x30] sm:$0xff] }
 0x525   :  { %4083 = vpow2.f32 %v1965_v31  ;;  %v1881_v43 = vmul.f32 1.442695, %v1874_v26  ;;  %v2050_v41 = vsub.f32 0.0, %v2046_v18  ;;  %v1967_v55 = vmul.f32 1.442695, %v1961_v23  ;;  %v2288_v31 = vld [vmem:[%s6457_s16 + $0x28] sm:$0xff]  ;;  %3595 = vmatprep.subr.mxu1 %v2289_v62 }
 0x526   :  { %4085 = vpow2.f32 %v2051_v34  ;;  %v1969_v45 = vmul.f32 1.442695, %v1962_v36  ;;  %v2055_v44 = vmul.f32 1.442695, %v2049_v20  ;;  %3596 = vmatpush3.msra.mxu1 %v2289_v62  ;;  %v6458_v34 = vld [vmem:[#allocation60_spill] sm:$0xff]  ;;  %v6459_v36 = vld [vmem:[#allocation61_spill] sm:$0xff] }
 0x527   :  { %4087 = vpow2.f32 %v2053_v57  ;;  %v2057_v0 = vmul.f32 1.442695, %v2050_v41  ;;  %3597 = vmatprep.subr.mxu1 %v2288_v31  ;;  %v1783_v23 = vsub.f32 0.0, %v6458_v34 }
 0x528   :  { %4089 = vpow2.f32 %v1879_v60  ;;  %3598 = vmatpush3.msra.mxu1 %v2288_v31  ;;  %v1784_v60 = vsub.f32 0.0, %v6459_v36 }
 0x529   :  { %4091 = vpow2.f32 %v1881_v43  ;;  %v1787_v43 = vmul.f32 1.442695, %v1783_v23 }
 0x52a   :  { %4093 = vpow2.f32 %v1967_v55  ;;  %v1789_v41 = vmul.f32 1.442695, %v1784_v60 }
 0x52b   :  { %4095 = vpow2.f32 %v1969_v45  ;;  %v6461_v45 = vld [vmem:[#allocation31_spill] sm:$0xff] }
 0x52c   :  { %4097 = vpow2.f32 %v2055_v44 }
 0x52d   :  { %4099 = vpow2.f32 %v2057_v0 }
 0x52e   :  { %4101 = vpow2.f32 %v1787_v43 }
 0x52f   :  { %v4078_v50 = vpop.eup %4077  ;;  %4103 = vpow2.f32 %v1789_v41  ;;  %v2285_v41 = vld [vmem:[%s6457_s16 + $0x10] sm:$0xff] }
 0x530   :  { %v4080_v28 = vpop.eup %4079  ;;  %v1883_v56 = vmul.f32 %v5548_v5, %v4078_v50 }
 0x531   :  { %v4082_v37 = vpop.eup %4081  ;;  %v1884_v16 = vmul.f32 %v5554_v10, %v4080_v28 }
 0x532   :  { %v4084_v3 = vpop.eup %4083  ;;  %v1971_v63 = vmul.f32 %v5548_v5, %v4082_v37 }
 0x533   :  { %v4086_v49 = vpop.eup %4085  ;;  %v1972_v1 = vmul.f32 %v5554_v10, %v4084_v3  ;;  %v3857_v61 = vpack.i.bf16 %v1884_v16, %v1883_v56 }
 0x534   :  { %v4088_v54 = vpop.eup %4087  ;;  %v2059_v35 = vmul.f32 %v5548_v5, %v4086_v49 }
 0x535   :  { %v4090_v6 = vpop.eup %4089  ;;  %v2060_v11 = vmul.f32 %v5554_v10, %v4088_v54  ;;  %v3862_v58 = vpack.i.bf16 %v1972_v1, %v1971_v63 }
 0x536   :  { %v4092_v33 = vpop.eup %4091  ;;  %v1885_v24 = vmul.f32 %v5604_v30, %v4090_v6 }
 0x537   :  { %v4094_v38 = vpop.eup %4093  ;;  %v1886_v17 = vmul.f32 %v5610_v21, %v4092_v33  ;;  %v3867_v52 = vpack.i.bf16 %v2060_v11, %v2059_v35 }
 0x538   :  { %v4096_v12 = vpop.eup %4095  ;;  %v1973_v25 = vmul.f32 %v5604_v30, %v4094_v38 }
 0x539   :  { %v4098_v59 = vpop.eup %4097  ;;  %v1974_v46 = vmul.f32 %v5610_v21, %v4096_v12  ;;  %v3872_v22 = vpack.i.bf16 %v1886_v17, %v1885_v24 }
 0x53a   :  { %v4100_v47 = vpop.eup %4099  ;;  %v2061_v13 = vmul.f32 %v5604_v30, %v4098_v59 }
 0x53b   :  { %v2062_v27 = vmul.f32 %v5610_v21, %v4100_v47  ;;  %v3877_v26 = vpack.i.bf16 %v1974_v46, %v1973_v25  ;;  %v4102_v54 = vpop.eup %4101 }
 0x53c   :  { %v4104_v6 = vpop.eup %4103  ;;  %v1795_v35 = vmul.f32 %v5548_v5, %v4102_v54 }
 0x53d   :  { %v3882_v18 = vpack.i.bf16 %v2062_v27, %v2061_v13  ;;  %v1796_v33 = vmul.f32 %v5554_v10, %v4104_v6 }
 0x5c2   :  { %v5823_v51 = vpop.f32.mrf.mxu1 }
 0x5c4   :  { %v5834_v7 = vpop.f32.mrf.mxu1 }
 0x5c8   :  { %v5836_v53 = vpop.f32.mrf.mxu1 }
 0x5c9   :  { %2157 = vrot.lane.b32.xlu0 %v5836_v53, %s6398_s2 }
 0x5ca   :  { %v5840_v8 = vpop.f32.mrf.mxu1 }
 0x5cb   :  { %2155 = vrot.lane.b32.xlu1 %v5840_v8, %s6398_s2 }
 0x5cd   :  { %2153 = vrot.lane.b32.xlu0 %v5823_v51, %s6398_s2 }
 0x5cf   :  { %2151 = vrot.lane.b32.xlu1 %v5834_v7, %s6398_s2  ;;  %s3318_s2 = sld [smem:[#allocation14 + $0xa]] }
 0x5d1   :  { %2145 = vrot.lane.b32.xlu0 %v5836_v53, %s6402_s12 }
 0x5d3   :  { %2143 = vrot.lane.b32.xlu1 %v5840_v8, %s6402_s12 }
 0x5d5   :  { %2141 = vrot.lane.b32.xlu0 %v5823_v51, %s6402_s12 }
 0x5d7   :  { %2139 = vrot.lane.b32.xlu1 %v5834_v7, %s6402_s12 }
 0x5d9   :  { %2133 = vrot.lane.b32.xlu0 %v5836_v53, %s4294_s18 }
 0x5db   :  { %2131 = vrot.lane.b32.xlu1 %v5840_v8, %s4294_s18 }
 0x5dd   :  { %2129 = vrot.lane.b32.xlu0 %v5823_v51, %s4294_s18 }
 0x5df   :  { %2127 = vrot.lane.b32.xlu1 %v5834_v7, %s4294_s18 }
 0x5e1   :  { %3858 = vrot.lane.b32.xlu0 %v3857_v61, %s4295_s13 }
 0x5e3   :  { %3863 = vrot.lane.b32.xlu1 %v3862_v58, %s4296_s29 }
 0x5e5   :  { %3868 = vrot.lane.b32.xlu0 %v3867_v52, %s6402_s12 }
 0x5e7   :  { %3873 = vrot.lane.b32.xlu1 %v3872_v22, %s4295_s13 }
 0x5e9   :  { %3878 = vrot.lane.b32.xlu0 %v3877_v26, %s4296_s29 }
 0x5eb   :  { %3883 = vrot.lane.b32.xlu1 %v3882_v18, %s6402_s12 }
 0x5ed   :  { %2267 = vrot.lane.b32.xlu0 %v5642_v9, %s4297_s20 }
 0x5ef   :  { %2269 = vrot.lane.b32.xlu1 %v5645_v48, %s4297_s20  ;;  %v6460_v48 = vld [vmem:[#allocation26_spill] sm:$0xff] }
 0x5f0   :  { %v1785_v55 = vsub.f32 0.0, %v6460_v48  ;;  %v2284_v48 = vld [vmem:[%s6457_s16 + $0x8] sm:$0xff] }
 0x5f1   :  { %2271 = vrot.lane.b32.xlu0 %v5652_v39, %s4297_s20 }
 0x5f2   :  { %v1791_v0 = vmul.f32 1.442695, %v1785_v55  ;;  %v2283_v55 = vld [vmem:[%s6457_s16] sm:$0xff] }
 0x5f3   :  { %2273 = vrot.lane.b32.xlu1 %v5657_v42, %s4297_s20  ;;  %v1786_v42 = vsub.f32 0.0, %v6461_v45  ;;  %s5962_s20 = sld [smem:[#allocation14 + $0xb]] }
 0x5f4   :  { %4105 = vpow2.f32 %v1791_v0 }
 0x5f5   :  { %v1793_v28 = vmul.f32 1.442695, %v1786_v42 }
 0x5f7   :  { %4107 = vpow2.f32 %v1793_v28 }
 0x601   :  { %v4106_v11 = vpop.eup %4105 }
 0x602   :  { %v1797_v22 = vmul.f32 %v5604_v30, %v4106_v11 }
 0x604   :  { %v4108_v59 = vpop.eup %4107 }
 0x605   :  { %v1798_v13 = vmul.f32 %v5610_v21, %v4108_v59 }
 0x63b   :  { %v2158_v57 = vpop.permute.xlu0 %2157 }
 0x63c   :  { %3557 = vmatprep.subr.mxu0 %v2158_v57 }
 0x63d   :  { %3558 = vmatpush3.msra.mxu0 %v2158_v57  ;;  %v2156_v20 = vpop.permute.xlu1 %2155 }
 0x63e   :  { %3559 = vmatprep.subr.mxu0 %v2156_v20 }
 0x63f   :  { %v2154_v9 = vpop.permute.xlu0 %2153  ;;  %3560 = vmatpush3.msra.mxu0 %v2156_v20 }
 0x640   :  { %3561 = vmatprep.subr.mxu0 %v2154_v9 }
 0x641   :  { %3562 = vmatpush3.msra.mxu0 %v2154_v9  ;;  %v2152_v39 = vpop.permute.xlu1 %2151  ;;  %v2286_v9 = vld [vmem:[%s6457_s16 + $0x18] sm:$0xff] }
 0x642   :  { %3563 = vmatprep.subr.mxu0 %v2152_v39 }
 0x643   :  { %v2146_v44 = vpop.permute.xlu0 %2145  ;;  %3564 = vmatpush3.msra.mxu0 %v2152_v39  ;;  %v3295_v39 = vld [vmem:[%s6462_s23] ss:$0 sm:$0xff] }
 0x644   :  { %3565 = vmatprep.subr.mxu0 %v2146_v44 }
 0x645   :  { %3566 = vmatpush3.msra.mxu0 %v2146_v44  ;;  %v2144_v50 = vpop.permute.xlu1 %2143 }
 0x646   :  { %3567 = vmatprep.subr.mxu0 %v2144_v50 }
 0x647   :  { %v2142_v37 = vpop.permute.xlu0 %2141  ;;  %3568 = vmatpush3.msra.mxu0 %v2144_v50 }
 0x648   :  { %3569 = vmatprep.subr.mxu0 %v2142_v37 }
 0x649   :  { %3570 = vmatpush3.msra.mxu0 %v2142_v37  ;;  %v2140_v3 = vpop.permute.xlu1 %2139 }
 0x64a   :  { %3571 = vmatprep.subr.mxu0 %v2140_v3 }
 0x64b   :  { %v2134_v49 = vpop.permute.xlu0 %2133  ;;  %3572 = vmatpush3.msra.mxu0 %v2140_v3 }
 0x64c   :  { %3573 = vmatprep.subr.mxu0 %v2134_v49 }
 0x64d   :  { %3574 = vmatpush3.msra.mxu0 %v2134_v49  ;;  %v2132_v56 = vpop.permute.xlu1 %2131 }
 0x64e   :  { %3575 = vmatprep.subr.mxu0 %v2132_v56 }
 0x64f   :  { %v2130_v16 = vpop.permute.xlu0 %2129  ;;  %3576 = vmatpush3.msra.mxu0 %v2132_v56 }
 0x650   :  { %3577 = vmatprep.subr.mxu0 %v2130_v16 }
 0x651   :  { %3578 = vmatpush3.msra.mxu0 %v2130_v16  ;;  %v2128_v63 = vpop.permute.xlu1 %2127 }
 0x652   :  { %3579 = vmatprep.subr.mxu0 %v2128_v63 }
 0x653   :  { %v3859_v1 = vpop.permute.xlu0 %3858  ;;  %3580 = vmatpush3.msra.mxu0 %v2128_v63 }
 0x654   :  { %v3861_v38 = vunpack.i.h.bf16 %v3859_v1  ;;  %v3860_v61 = vunpack.i.l.bf16 %v3859_v1  ;;  %3581 = vmatprep.subr.mxu0 %v5836_v53 }
 0x655   :  { %3582 = vmatpush3.msra.mxu0 %v5836_v53  ;;  %v3864_v12 = vpop.permute.xlu1 %3863 }
 0x656   :  { %v2112_v58 = vsel %vm759_vm1, %v1796_v33, %v3861_v38  ;;  %v3866_v24 = vunpack.i.h.bf16 %v3864_v12  ;;  %v3865_v17 = vunpack.i.l.bf16 %v3864_v12  ;;  %3583 = vmatprep.subr.mxu0 %v5840_v8  ;;  %v2111_v47 = vsel %vm759_vm1, %v1795_v35, %v3860_v61 }
 0x657   :  { %v3869_v10 = vpop.permute.xlu0 %3868  ;;  %3584 = vmatpush3.msra.mxu0 %v5840_v8 }
 0x658   :  { %v2116_v52 = vsel %vm764_vm2, %v2112_v58, %v3866_v24  ;;  %v3871_v25 = vunpack.i.h.bf16 %v3869_v10  ;;  %v3870_v5 = vunpack.i.l.bf16 %v3869_v10  ;;  %3585 = vmatprep.subr.mxu0 %v5823_v51  ;;  %v2115_v53 = vsel %vm764_vm2, %v2111_v47, %v3865_v17 }
 0x659   :  { %3586 = vmatpush3.msra.mxu0 %v5823_v51  ;;  %v3874_v46 = vpop.permute.xlu1 %3873  ;;  %v5950_v17 = vstv %s3304_s21  ;;  %v5952_v47 = vstv %s3306_s15  ;;  %v5954_v10 = vstv %s3310_s1  ;;  %s6472_s1 = sld [smem:[#allocation81_spill]] }
 0x65a   :  { %v3876_v27 = vunpack.i.h.bf16 %v3874_v46  ;;  %v3875_v62 = vunpack.i.l.bf16 %v3874_v46  ;;  %3587 = vmatprep.subr.mxu0 %v5834_v7  ;;  %v2119_v8 = vsel %vm769_vm3, %v2115_v53, %v3870_v5  ;;  %v2120_v31 = vsel %vm769_vm3, %v2116_v52, %v3871_v25 }
 0x65b   :  { %v3879_v26 = vpop.permute.xlu0 %3878  ;;  %3588 = vmatpush3.msra.mxu0 %v5834_v7  ;;  %3589 = vmatprep.mubr.f32.mxu0 %v2119_v8  ;;  %v2287_v7 = vld [vmem:[%s6457_s16 + $0x20] sm:$0xff]  ;;  %s3753_s16 = spop %3752  ;;  %v5956_v52 = vstv %s3308_s8  ;;  %v5958_v25 = vstv %s3312_s27  ;;  %v5960_v5 = vstv %s3316_s4  ;;  %v2479_v53 = vsub.f32 %v6438_v15, %v5950_v17 }
 0x65c   :  { %v3881_v18 = vunpack.i.h.bf16 %v3879_v26  ;;  %v3880_v34 = vunpack.i.l.bf16 %v3879_v26  ;;  %3590 = vmatmul.mubr.f32.vlgmr.msra.gmra.mxu0 %v2120_v31  ;;  %v2113_v51 = vsel %vm759_vm1, %v1797_v22, %v3875_v62  ;;  %v2114_v30 = vsel %vm759_vm1, %v1798_v13, %v3876_v27  ;;  %3599 = vmatprep.subr.mxu1 %v2287_v7  ;;  %s3755_s11 = spop %3754  ;;  %v6463_v13 = vld [vmem:[#allocation25_spill] sm:$0xff]  ;;  %v6464_v62 = vld [vmem:[#allocation27_spill] sm:$0xff] }
 0x65d   :  { %v3884_v21 = vpop.permute.xlu1 %3883  ;;  %3600 = vmatpush3.msra.mxu1 %v2287_v7  ;;  %s3757_s6 = spop %3756  ;;  %v2480_v46 = vsub.f32 %v6452_v4, %v5950_v17  ;;  %v5968_v22 = vstv %s3749_s10  ;;  %v2503_v27 = vsub.f32 %v6463_v13, %v5952_v47  ;;  %v2504_v8 = vsub.f32 %v6464_v62, %v5952_v47  ;;  %s6473_s10 = sld [smem:[#allocation84_spill]] }
 0x65e   :  { %v3886_v23 = vunpack.i.h.bf16 %v3884_v21  ;;  %v3885_v57 = vunpack.i.l.bf16 %v3884_v21  ;;  %v2117_v36 = vsel %vm764_vm2, %v2113_v51, %v3880_v34  ;;  %v2118_v60 = vsel %vm764_vm2, %v2114_v30, %v3881_v18  ;;  %3601 = vmatprep.subr.mxu1 %v2286_v9  ;;  %s3759_s9 = spop %3758 }
 0x65f   :  { %3602 = vmatpush3.msra.mxu1 %v2286_v9  ;;  %v2268_v49 = vpop.permute.xlu0 %2267  ;;  %v5974_v31 = vstv %s3751_s5  ;;  %v2567_v26 = vsub.f32 %v6438_v15, %v5954_v10  ;;  %v5978_v18 = vstv %s3314_s19  ;;  %v5980_v34 = vstv %s3753_s16  ;;  %s3761_s30 = spop %3760  ;;  %s6474_s16 = sld [smem:[#allocation83_spill]] }
 0x660   :  { %v2121_v20 = vsel %vm769_vm3, %v2117_v36, %v3885_v57  ;;  %v2122_v43 = vsel %vm769_vm3, %v2118_v60, %v3886_v23  ;;  %3603 = vmatprep.subr.mxu1 %v2285_v41  ;;  %v2568_v51 = vsub.f32 %v6452_v4, %v5954_v10  ;;  %v2591_v30 = vsub.f32 %v6463_v13, %v5958_v25  ;;  %v6465_v23 = vld [vmem:[#allocation66_spill] sm:$0xff]  ;;  %s3763_s7 = spop %3762 }
 0x661   :  { %3592 = vmatprep.mubr.f32.mxu0 %v2121_v20  ;;  %3604 = vmatpush3.msra.mxu1 %v2285_v41  ;;  %v2270_v54 = vpop.permute.xlu1 %2269  ;;  %v5986_v21 = vstv %s3318_s2  ;;  %v2482_v57 = vsub.f32 %v6465_v23, %v5950_v17  ;;  %v5990_v36 = vstv %s3755_s11  ;;  %v2592_v60 = vsub.f32 %v6464_v62, %v5958_v25  ;;  %s3765_s3 = spop %3764 }
 0x662   :  { %3593 = vmatmul.mubr.f32.gmra.mxu0 %v2122_v43  ;;  %3605 = vmatprep.subr.mxu1 %v2284_v48  ;;  %v5994_v20 = vstv %s3757_s6  ;;  %v2483_v43 = vmul.f32 %v2479_v53, %v2479_v53  ;;  %v2484_v7 = vmul.f32 %v2480_v46, %v2480_v46  ;;  %v2507_v9 = vmul.f32 %v2503_v27, %v2503_v27 }
 0x663   :  { %3606 = vmatpush3.msra.mxu1 %v2284_v48  ;;  %v2272_v11 = vpop.permute.xlu0 %2271  ;;  %v2527_v41 = vsub.f32 %v4726_v2, %v5956_v52  ;;  %v2508_v48 = vmul.f32 %v2504_v8, %v2504_v8  ;;  %v2679_v53 = vsub.f32 %v6463_v13, %v5986_v21  ;;  %v2658_v8 = vsub.f32 %v6465_v23, %v5960_v5 }
 0x664   :  { %3607 = vmatprep.subr.mxu1 %v2283_v55 }
 0x665   :  { %3608 = vmatpush3.msra.mxu1 %v2283_v55  ;;  %v2274_v59 = vpop.permute.xlu1 %2273  ;;  %v2528_v55 = vsub.f32 %v6441_v19, %v5956_v52 }
 0x71c   :  { %v3591_v45 = vpop.f32.mrf.mxu0 }
 0x71d   :  { %v2242_v42 = vadd.f32 %v3591_v45, %v3295_v39  ;;  %v6000_v45 = vstv %s3759_s9 }
 0x71e   :  { %v2236_v44 = vpop.f32.mrf.mxu0 }
 0x71f   :  { %vm2256_vm15 = vcmp.gt.f32.partialorder %v2242_v42, 0.0  ;;  %v2260_v0 = vmul.f32 0.01, %v2242_v42  ;;  %v2237_v50 = vadd.f32 %v3295_v39, %v2236_v44  ;;  %v2595_v44 = vmul.f32 %v2591_v30, %v2591_v30 }
 0x720   :  { %v6033_v30 = vstv %s3763_s7  ;;  %s6476_s7 = sld [smem:[#allocation85_spill]] }
 0x721   :  { %vm2255_vm4 = vcmp.gt.f32.partialorder %v2237_v50, 0.0  ;;  %v2259_v28 = vmul.f32 0.01, %v2237_v50  ;;  %v2264_v37 = vsel %vm2256_vm15, %v2242_v42, %v2260_v0  ;;  %v2572_v42 = vmul.f32 %v2568_v51, %v2568_v51 }
 0x722   :  { %v3594_v3 = vpop.f32.mrf.mxu0  ;;  %v2280_v1 = vsel %vm930_vm6, %v2264_v37, %v2270_v54  ;;  %v2615_v0 = vsub.f32 %v4726_v2, %v5978_v18  ;;  %v2596_v37 = vmul.f32 %v2592_v60, %v2592_v60  ;;  %v2516_v54 = vmul.f32 %v5974_v31, %v2507_v9 }
 0x723   :  { %v2263_v56 = vsel %vm2255_vm4, %v2237_v50, %v2259_v28  ;;  %v2252_v16 = vadd.f32 %v3594_v3, %v3295_v39  ;;  %v6004_v50 = vstv %s3761_s30  ;;  %v2486_v28 = vmul.f32 %v2482_v57, %v2482_v57 }
 0x724   :  { %v2246_v6 = vpop.f32.mrf.mxu0  ;;  %v2279_v63 = vsel %vm930_vm6, %v2263_v56, %v2268_v49  ;;  %v2616_v3 = vsub.f32 %v6441_v19, %v5978_v18  ;;  %v6009_v49 = vstv %s5962_s20  ;;  %v2492_v56 = vmul.f32 %v5968_v22, %v2483_v43  ;;  %s6475_s20 = sld [smem:[#allocation86_spill]] }
 0x725   :  { %vm2258_vm7 = vcmp.gt.f32.partialorder %v2252_v16, 0.0  ;;  %v2262_v33 = vmul.f32 0.01, %v2252_v16  ;;  %v2247_v38 = vadd.f32 %v3295_v39, %v2246_v6  ;;  %3609 = vmatprep.mubr.msk.f32.mxu1 %vm2290_vm5, %v2279_v63  ;;  %v2571_v39 = vmul.f32 %v2567_v26, %v2567_v26 }
 0x726   :  { %3610 = vmatmul.mubr.msk.f32.vlgmr.msra.gmra.mxu1 %vm2290_vm5, %v2280_v1  ;;  %v2531_v6 = vmul.f32 %v2527_v41, %v2527_v41  ;;  %v2517_v63 = vmul.f32 %v5974_v31, %v2508_v48  ;;  %v2532_v1 = vmul.f32 %v2528_v55, %v2528_v55  ;;  %v2520_v46 = vadd.f32 %v2516_v54, %v2492_v56 }
 0x727   :  { %vm2257_vm8 = vcmp.gt.f32.partialorder %v2247_v38, 0.0  ;;  %v2261_v61 = vmul.f32 0.01, %v2247_v38  ;;  %v2266_v35 = vsel %vm2258_vm7, %v2252_v16, %v2262_v33  ;;  %v2493_v16 = vmul.f32 %v5968_v22, %v2484_v7 }
 0x728   :  { %v2282_v24 = vsel %vm930_vm6, %v2266_v35, %v2274_v59  ;;  %v2570_v33 = vsub.f32 %v6465_v23, %v5954_v10  ;;  %v2604_v35 = vmul.f32 %v5994_v20, %v2595_v44  ;;  %v2605_v59 = vmul.f32 %v5994_v20, %v2596_v37 }
 0x729   :  { %v2265_v12 = vsel %vm2257_vm8, %v2247_v38, %v2261_v61  ;;  %v2580_v38 = vmul.f32 %v5990_v36, %v2571_v39  ;;  %v2581_v61 = vmul.f32 %v5990_v36, %v2572_v42  ;;  %v2540_v27 = vmul.f32 %v5980_v34, %v2531_v6 }
 0x72a   :  { %v2281_v58 = vsel %vm930_vm6, %v2265_v12, %v2272_v11  ;;  %v2619_v11 = vmul.f32 %v2615_v0, %v2615_v0  ;;  %v2655_v12 = vsub.f32 %v6438_v15, %v5960_v5  ;;  %v2680_v26 = vsub.f32 %v6464_v62, %v5986_v21 }
 0x72b   :  { %3612 = vmatprep.mubr.msk.f32.mxu1 %vm2290_vm5, %v2281_v58  ;;  %v2620_v58 = vmul.f32 %v2616_v3, %v2616_v3  ;;  %v2521_v15 = vadd.f32 %v2517_v63, %v2493_v16  ;;  %v2541_v51 = vmul.f32 %v5980_v34, %v2532_v1  ;;  %v6035_v57 = vstv %s3765_s3  ;;  %s4302_s3 = smov [#allocation17]  }
 0x72c   :  { %3613 = vmatmul.mubr.msk.f32.gmra.mxu1 %vm2290_vm5, %v2282_v24  ;;  %v2656_v24 = vsub.f32 %v6452_v4, %v5960_v5  ;;  %v2574_v4 = vmul.f32 %v2570_v33, %v2570_v33  ;;  %v2608_v60 = vadd.f32 %v2604_v35, %v2580_v38  ;;  %v2628_v13 = vmul.f32 %v6000_v45, %v2619_v11 }
 0x72d   :  { %v2659_v43 = vmul.f32 %v2655_v12, %v2655_v12  ;;  %v2609_v7 = vadd.f32 %v2605_v59, %v2581_v61  ;;  %v2629_v9 = vmul.f32 %v6000_v45, %v2620_v58  ;;  %v2683_v23 = vmul.f32 %v2679_v53, %v2679_v53 }
 0x72e   :  { %v2660_v41 = vmul.f32 %v2656_v24, %v2656_v24  ;;  %v2495_v48 = vmul.f32 %v5968_v22, %v2486_v28  ;;  %v6040_v62 = vadd.f32 %v2540_v27, %v2520_v46  ;;  %v2662_v55 = vmul.f32 %v2658_v8, %v2658_v8 }
 0x72f   :  { %v2684_v39 = vmul.f32 %v2680_v26, %v2680_v26  ;;  %v6042_v42 = vadd.f32 %v2541_v51, %v2521_v15  ;;  %v2703_v44 = vsub.f32 %v4726_v2, %v6009_v49  ;;  %v2481_v0 = vsub.f32 %v5078_v40, %v5950_v17 }
 0x730   :  { %v2505_v37 = vsub.f32 %v5091_v29, %v5952_v47  ;;  %v6051_v3 = vmul.f32 %v5990_v36, %v2574_v4  ;;  %v6053_v56 = vadd.f32 %v2628_v13, %v2608_v60  ;;  %v2668_v28 = vmul.f32 %v6004_v50, %v2659_v43 }
 0x731   :  { %v2704_v16 = vsub.f32 %v6441_v19, %v6009_v49  ;;  %v6058_v54 = vadd.f32 %v2629_v9, %v2609_v7  ;;  %v2669_v2 = vmul.f32 %v6004_v50, %v2660_v41  ;;  %v2692_v6 = vmul.f32 %v6033_v30, %v2683_v23 }
 0x732   :  { %v2506_v17 = vsub.f32 %v5094_v32, %v5952_v47  ;;  %v6065_v63 = vmul.f32 %v6004_v50, %v2662_v55  ;;  %v2693_v1 = vmul.f32 %v6033_v30, %v2684_v39  ;;  %v2569_v33 = vsub.f32 %v5078_v40, %v5954_v10  ;;  %v6466_v47 = vld [vmem:[#allocation67_spill] sm:$0xff] }
 0x733   :  { %v2593_v19 = vsub.f32 %v5091_v29, %v5958_v25  ;;  %v2707_v38 = vmul.f32 %v2703_v44, %v2703_v44  ;;  %v2485_v61 = vmul.f32 %v2481_v0, %v2481_v0  ;;  %v2509_v35 = vmul.f32 %v2505_v37, %v2505_v37 }
 0x734   :  { %v2594_v11 = vsub.f32 %v5094_v32, %v5958_v25  ;;  %v2708_v12 = vmul.f32 %v2704_v16, %v2704_v16  ;;  %v2529_v59 = vsub.f32 %v6466_v47, %v5956_v52  ;;  %v2657_v58 = vsub.f32 %v5078_v40, %v5960_v5 }
 0x735   :  { %v2681_v24 = vsub.f32 %v5091_v29, %v5986_v21  ;;  %v2696_v10 = vadd.f32 %v2692_v6, %v2668_v28  ;;  %v2510_v53 = vmul.f32 %v2506_v17, %v2506_v17  ;;  %v2530_v46 = vsub.f32 %v5104_v14, %v5956_v52 }
 0x736   :  { %v2682_v27 = vsub.f32 %v5094_v32, %v5986_v21  ;;  %v2697_v8 = vadd.f32 %v2693_v1, %v2669_v2  ;;  %v2573_v25 = vmul.f32 %v2569_v33, %v2569_v33  ;;  %v2597_v26 = vmul.f32 %v2593_v19, %v2593_v19 }
 0x737   :  { %v2617_v15 = vsub.f32 %v6466_v47, %v5978_v18  ;;  %v2494_v51 = vmul.f32 %v5968_v22, %v2485_v61  ;;  %v2518_v40 = vmul.f32 %v5974_v31, %v2509_v35  ;;  %v2598_v5 = vmul.f32 %v2594_v11, %v2594_v11 }
 0x738   :  { %v2618_v29 = vsub.f32 %v5104_v14, %v5978_v18  ;;  %v2533_v4 = vmul.f32 %v2529_v59, %v2529_v59  ;;  %v2661_v60 = vmul.f32 %v2657_v58, %v2657_v58  ;;  %v2685_v52 = vmul.f32 %v2681_v24, %v2681_v24 }
 0x739   :  { %v2705_v32 = vsub.f32 %v6466_v47, %v6009_v49  ;;  %v2519_v21 = vmul.f32 %v5974_v31, %v2510_v53  ;;  %v2534_v13 = vmul.f32 %v2530_v46, %v2530_v46  ;;  %v2686_v43 = vmul.f32 %v2682_v27, %v2682_v27 }
 0x73a   :  { %v2706_v7 = vsub.f32 %v5104_v14, %v6009_v49  ;;  %v2716_v22 = vmul.f32 %v6035_v57, %v2707_v38  ;;  %v2582_v9 = vmul.f32 %v5990_v36, %v2573_v25  ;;  %v2606_v41 = vmul.f32 %v5994_v20, %v2597_v26 }
 0x73b   :  { %v2621_v18 = vmul.f32 %v2617_v15, %v2617_v15  ;;  %v2717_v23 = vmul.f32 %v6035_v57, %v2708_v12  ;;  %v2522_v55 = vadd.f32 %v2518_v40, %v2494_v51  ;;  %v2607_v39 = vmul.f32 %v5994_v20, %v2598_v5 }
 0x73c   :  { %v2622_v44 = vmul.f32 %v2618_v29, %v2618_v29  ;;  %v2542_v31 = vmul.f32 %v5980_v34, %v2533_v4  ;;  %v2670_v0 = vmul.f32 %v6004_v50, %v2661_v60  ;;  %v2694_v37 = vmul.f32 %v6033_v30, %v2685_v52 }
 0x73d   :  { %v2709_v14 = vmul.f32 %v2705_v32, %v2705_v32  ;;  %v2523_v49 = vadd.f32 %v2519_v21, %v2495_v48  ;;  %v2543_v28 = vmul.f32 %v5980_v34, %v2534_v13  ;;  %v2695_v36 = vmul.f32 %v6033_v30, %v2686_v43 }
 0x73e   :  { %v2710_v16 = vmul.f32 %v2706_v7, %v2706_v7  ;;  %v2548_v2 = vsub.f32 0.0, %v6040_v62  ;;  %v2720_v6 = vadd.f32 %v2716_v22, %v2696_v10  ;;  %v2610_v20 = vadd.f32 %v2606_v41, %v2582_v9  ;;  %v6140_v9 = vld [vmem:[%s6407_s24] sm:$0xff] }
 0x73f   :  { %v2630_v1 = vmul.f32 %v6000_v45, %v2621_v18  ;;  %v2549_v33 = vsub.f32 0.0, %v6042_v42  ;;  %v2721_v50 = vadd.f32 %v2717_v23, %v2697_v8  ;;  %v2611_v19 = vadd.f32 %v2607_v39, %v6051_v3  ;;  %v6146_v18 = vld [vmem:[%s6407_s24 + $0x8] sm:$0xff] }
 0x740   :  { %v2631_v48 = vmul.f32 %v6000_v45, %v2622_v44  ;;  %v2636_v34 = vsub.f32 0.0, %v6053_v56  ;;  %v2546_v38 = vadd.f32 %v2542_v31, %v2522_v55  ;;  %v2698_v30 = vadd.f32 %v2694_v37, %v2670_v0 }
 0x741   :  { %v2718_v61 = vmul.f32 %v6035_v57, %v2709_v14  ;;  %v2637_v62 = vsub.f32 0.0, %v6058_v54  ;;  %v2547_v35 = vadd.f32 %v2543_v28, %v2523_v49  ;;  %v2699_v11 = vadd.f32 %v2695_v36, %v6065_v63 }
 0x742   :  { %v2719_v12 = vmul.f32 %v6035_v57, %v2710_v16  ;;  %v2552_v47 = vmul.f32 1.442695, %v2548_v2  ;;  %v2724_v42 = vsub.f32 0.0, %v2720_v6  ;;  %v2634_v3 = vadd.f32 %v2630_v1, %v2610_v20  ;;  %v6159_v6 = vld [vmem:[%s6407_s24 + $0x10] sm:$0xff]  ;;  %v6165_v1 = vld [vmem:[%s6407_s24 + $0x18] sm:$0xff] }
 0x743   :  { %v2554_v58 = vmul.f32 1.442695, %v2549_v33  ;;  %v2725_v45 = vsub.f32 0.0, %v2721_v50  ;;  %v2635_v24 = vadd.f32 %v2631_v48, %v2611_v19  ;;  %v2640_v56 = vmul.f32 1.442695, %v2636_v34 }
 0x744   :  { %v2550_v53 = vsub.f32 0.0, %v2546_v38  ;;  %v2722_v46 = vadd.f32 %v2718_v61, %v2698_v30  ;;  %v2642_v27 = vmul.f32 1.442695, %v2637_v62  ;;  %v2551_v54 = vsub.f32 0.0, %v2547_v35 }
 0x745   :  { %v2723_v63 = vadd.f32 %v2719_v12, %v2699_v11  ;;  %4109 = vpow2.f32 %v2552_v47  ;;  %v2728_v57 = vmul.f32 1.442695, %v2724_v42  ;;  %v2638_v25 = vsub.f32 0.0, %v2634_v3  ;;  %v6467_v11 = vld [vmem:[#allocation64_spill] sm:$0xff]  ;;  %v6468_v42 = vld [vmem:[#allocation65_spill] sm:$0xff] }
 0x746   :  { %4111 = vpow2.f32 %v2554_v58  ;;  %v2730_v26 = vmul.f32 1.442695, %v2725_v45  ;;  %v2639_v15 = vsub.f32 0.0, %v2635_v24  ;;  %v2556_v51 = vmul.f32 1.442695, %v2550_v53  ;;  %v6469_v53 = vld [vmem:[#allocation29_spill] sm:$0xff] }
 0x747   :  { %4113 = vpow2.f32 %v2640_v56  ;;  %v2726_v40 = vsub.f32 0.0, %v2722_v46  ;;  %v2558_v5 = vmul.f32 1.442695, %v2551_v54  ;;  %v2727_v29 = vsub.f32 0.0, %v2723_v63  ;;  %v6470_v54 = vld [vmem:[#allocation30_spill] sm:$0xff] }
 0x748   :  { %4115 = vpow2.f32 %v2642_v27  ;;  %v2644_v4 = vmul.f32 1.442695, %v2638_v25  ;;  %v2646_v60 = vmul.f32 1.442695, %v2639_v15  ;;  %v2460_v12 = vsub.f32 0.0, %v6467_v11 }
 0x749   :  { %4117 = vpow2.f32 %v2728_v57  ;;  %v2732_v52 = vmul.f32 1.442695, %v2726_v40  ;;  %v2734_v32 = vmul.f32 1.442695, %v2727_v29  ;;  %v2461_v3 = vsub.f32 0.0, %v6468_v42 }
 0x74a   :  { %4119 = vpow2.f32 %v2730_v26  ;;  %v2464_v45 = vmul.f32 1.442695, %v2460_v12  ;;  %v2462_v46 = vsub.f32 0.0, %v6469_v53  ;;  %v2463_v63 = vsub.f32 0.0, %v6470_v54  ;;  %v3322_v11 = vld [vmem:[%s6472_s1] ss:$0 sm:$0xff] }
 0x74b   :  { %4121 = vpow2.f32 %v2556_v51  ;;  %v2466_v56 = vmul.f32 1.442695, %v2461_v3 }
 0x74c   :  { %4123 = vpow2.f32 %v2558_v5  ;;  %v2468_v25 = vmul.f32 1.442695, %v2462_v46  ;;  %v2470_v15 = vmul.f32 1.442695, %v2463_v63 }
 0x74d   :  { %4125 = vpow2.f32 %v2644_v4 }
 0x74e   :  { %4127 = vpow2.f32 %v2646_v60 }
 0x74f   :  { %4129 = vpow2.f32 %v2732_v52 }
 0x750   :  { %4131 = vpow2.f32 %v2734_v32 }
 0x751   :  { %4133 = vpow2.f32 %v2464_v45 }
 0x752   :  { %v4110_v21 = vpop.eup %4109  ;;  %4135 = vpow2.f32 %v2466_v56 }
 0x753   :  { %v4112_v13 = vpop.eup %4111  ;;  %v2560_v41 = vmul.f32 %v6140_v9, %v4110_v21  ;;  %4137 = vpow2.f32 %v2468_v25 }
 0x754   :  { %v4114_v43 = vpop.eup %4113  ;;  %v2561_v23 = vmul.f32 %v6146_v18, %v4112_v13  ;;  %4139 = vpow2.f32 %v2470_v15 }
 0x755   :  { %v4116_v7 = vpop.eup %4115  ;;  %v2648_v44 = vmul.f32 %v6140_v9, %v4114_v43 }
 0x756   :  { %v4118_v22 = vpop.eup %4117  ;;  %v2649_v31 = vmul.f32 %v6146_v18, %v4116_v7  ;;  %v3887_v14 = vpack.i.bf16 %v2561_v23, %v2560_v41 }
 0x757   :  { %v4120_v55 = vpop.eup %4119  ;;  %v2736_v49 = vmul.f32 %v6140_v9, %v4118_v22 }
 0x758   :  { %v4122_v39 = vpop.eup %4121  ;;  %v2737_v28 = vmul.f32 %v6146_v18, %v4120_v55  ;;  %v3892_v2 = vpack.i.bf16 %v2649_v31, %v2648_v44 }
 0x759   :  { %v4124_v0 = vpop.eup %4123  ;;  %v2562_v20 = vmul.f32 %v6159_v6, %v4122_v39 }
 0x75a   :  { %v4126_v37 = vpop.eup %4125  ;;  %v2563_v33 = vmul.f32 %v6165_v1, %v4124_v0  ;;  %v3897_v19 = vpack.i.bf16 %v2737_v28, %v2736_v49 }
 0x75b   :  { %v4128_v36 = vpop.eup %4127  ;;  %v2650_v48 = vmul.f32 %v6159_v6, %v4126_v37 }
 0x75c   :  { %v4130_v16 = vpop.eup %4129  ;;  %v2651_v34 = vmul.f32 %v6165_v1, %v4128_v36  ;;  %v3902_v38 = vpack.i.bf16 %v2563_v33, %v2562_v20 }
 0x75d   :  { %v4132_v50 = vpop.eup %4131  ;;  %v2738_v30 = vmul.f32 %v6159_v6, %v4130_v16 }
 0x75e   :  { %v2739_v61 = vmul.f32 %v6165_v1, %v4132_v50  ;;  %v3907_v62 = vpack.i.bf16 %v2651_v34, %v2650_v48  ;;  %v4134_v60 = vpop.eup %4133 }
 0x75f   :  { %v4136_v52 = vpop.eup %4135  ;;  %v2472_v22 = vmul.f32 %v6140_v9, %v4134_v60 }
 0x760   :  { %v3912_v35 = vpack.i.bf16 %v2739_v61, %v2738_v30  ;;  %v2473_v13 = vmul.f32 %v6146_v18, %v4136_v52  ;;  %v4138_v41 = vpop.eup %4137 }
 0x761   :  { %v4140_v55 = vpop.eup %4139  ;;  %v2474_v28 = vmul.f32 %v6159_v6, %v4138_v41  ;;  %v3038_v41 = vld [vmem:[%s6473_s10 + $0x8] sm:$0xff] }
 0x762   :  { %v2475_v36 = vmul.f32 %v6165_v1, %v4140_v55  ;;  %v2960_v55 = vld [vmem:[%s6474_s16] sm:$0x1] }
 0x7e6   :  { %v6106_v17 = vpop.f32.mrf.mxu1 }
 0x7e8   :  { %v6117_v59 = vpop.f32.mrf.mxu1 }
 0x7ec   :  { %v6119_v10 = vpop.f32.mrf.mxu1 }
 0x7ed   :  { %2834 = vrot.lane.b32.xlu0 %v6119_v10, %s4298_s14 }
 0x7ee   :  { %v6122_v8 = vpop.f32.mrf.mxu1 }
 0x7ef   :  { %2832 = vrot.lane.b32.xlu1 %v6122_v8, %s4298_s14 }
 0x7f1   :  { %2830 = vrot.lane.b32.xlu0 %v6106_v17, %s4298_s14 }
 0x7f3   :  { %2828 = vrot.lane.b32.xlu1 %v6117_v59, %s4298_s14  ;;  %s3199_s14 = sshll.u32 %s4302_s3, 4  ;;  %s3200_s14 = int_to_ptr.vmem [resolvable:$true] %s3199_s14 }
 0x7f4   :  { %s4253_s17 = scalar_lea.vmem %s3200_s14, 32  ;;  %p4254_p13 = scmp.lt.s32.totalorder %s3200_s14, %s3200_s14 }
 0x7f5   :  { %2822 = vrot.lane.b32.xlu0 %v6119_v10, %s4294_s18 }
 0x7f7   :  { %2820 = vrot.lane.b32.xlu1 %v6122_v8, %s4294_s18 }
 0x7f9   :  { %2818 = vrot.lane.b32.xlu0 %v6106_v17, %s4294_s18 }
 0x7fb   :  { %2816 = vrot.lane.b32.xlu1 %v6117_v59, %s4294_s18 }
 0x7fd   :  { %2810 = vrot.lane.b32.xlu0 %v6119_v10, %s4299_s26 }
 0x7ff   :  { %2808 = vrot.lane.b32.xlu1 %v6122_v8, %s4299_s26 }
 0x801   :  { %2806 = vrot.lane.b32.xlu0 %v6106_v17, %s4299_s26 }
 0x803   :  { %2804 = vrot.lane.b32.xlu1 %v6117_v59, %s4299_s26  ;;  %s4249_s26 = scalar_lea.vmem %s3200_s14, 16 }
 0x804   :  { %p4250_p12 = scmp.ne.s32.totalorder %s3200_s14, %s4249_s26  ;;  %p4255_p0 = scmp.lt.s32.totalorder %s4253_s17, %s4249_s26 }
 0x805   :  { %3888 = vrot.lane.b32.xlu0 %v3887_v14, %s4295_s13 }
 0x806   :  { %p4256_p1 = por %p4255_p0, %p4254_p13 }
 0x807   :  { %3893 = vrot.lane.b32.xlu1 %v3892_v2, %s4296_s29 }
 0x808   :  { %p4257_p2 = pnand %p4256_p1, %p4250_p12 }
 0x809   :  { %3898 = vrot.lane.b32.xlu0 %v3897_v19, %s6402_s12 }
 0x80b   :  { %3903 = vrot.lane.b32.xlu1 %v3902_v38, %s4295_s13  ;;  %s6471_s13 = sld [smem:[#allocation82_spill]] }
 0x80d   :  { %3908 = vrot.lane.b32.xlu0 %v3907_v62, %s4296_s29 }
 0x80f   :  { %3913 = vrot.lane.b32.xlu1 %v3912_v35, %s6402_s12  ;;  %v4300_v35 = vmov 0.0  }
 0x810   :  { %3653 = vmatprep.subr.mxu0 %v4300_v35 }
 0x85f   :  { %v2835_v47 = vpop.permute.xlu0 %2834 }
 0x860   :  { %3615 = vmatprep.subr.mxu1 %v2835_v47 }
 0x861   :  { %3616 = vmatpush3.msra.mxu1 %v2835_v47  ;;  %v2833_v58 = vpop.permute.xlu1 %2832 }
 0x862   :  { %3617 = vmatprep.subr.mxu1 %v2833_v58 }
 0x863   :  { %v2831_v24 = vpop.permute.xlu0 %2830  ;;  %3618 = vmatpush3.msra.mxu1 %v2833_v58 }
 0x864   :  { %3619 = vmatprep.subr.mxu1 %v2831_v24 }
 0x865   :  { %3620 = vmatpush3.msra.mxu1 %v2831_v24  ;;  %v2829_v27 = vpop.permute.xlu1 %2828 }
 0x866   :  { %3621 = vmatprep.subr.mxu1 %v2829_v27 }
 0x867   :  { %v2823_v57 = vpop.permute.xlu0 %2822  ;;  %3622 = vmatpush3.msra.mxu1 %v2829_v27 }
 0x868   :  { %3623 = vmatprep.subr.mxu1 %v2823_v57 }
 0x869   :  { %3624 = vmatpush3.msra.mxu1 %v2823_v57  ;;  %v2821_v26 = vpop.permute.xlu1 %2820 }
 0x86a   :  { %3625 = vmatprep.subr.mxu1 %v2821_v26 }
 0x86b   :  { %v2819_v51 = vpop.permute.xlu0 %2818  ;;  %3626 = vmatpush3.msra.mxu1 %v2821_v26 }
 0x86c   :  { %3627 = vmatprep.subr.mxu1 %v2819_v51 }
 0x86d   :  { %3628 = vmatpush3.msra.mxu1 %v2819_v51  ;;  %v2817_v40 = vpop.permute.xlu1 %2816 }
 0x86e   :  { %3629 = vmatprep.subr.mxu1 %v2817_v40 }
 0x86f   :  { %v2811_v5 = vpop.permute.xlu0 %2810  ;;  %3630 = vmatpush3.msra.mxu1 %v2817_v40 }
 0x870   :  { %3631 = vmatprep.subr.mxu1 %v2811_v5 }
 0x871   :  { %3632 = vmatpush3.msra.mxu1 %v2811_v5  ;;  %v2809_v29 = vpop.permute.xlu1 %2808 }
 0x872   :  { %3633 = vmatprep.subr.mxu1 %v2809_v29 }
 0x873   :  { %v2807_v4 = vpop.permute.xlu0 %2806  ;;  %3634 = vmatpush3.msra.mxu1 %v2809_v29 }
 0x874   :  { %3635 = vmatprep.subr.mxu1 %v2807_v4 }
 0x875   :  { %3636 = vmatpush3.msra.mxu1 %v2807_v4  ;;  %v2805_v32 = vpop.permute.xlu1 %2804 }
 0x876   :  { %3637 = vmatprep.subr.mxu1 %v2805_v32 }
 0x877   :  { %v3889_v21 = vpop.permute.xlu0 %3888  ;;  %3638 = vmatpush3.msra.mxu1 %v2805_v32 }
 0x878   :  { %v3891_v43 = vunpack.i.h.bf16 %v3889_v21  ;;  %v3890_v7 = vunpack.i.l.bf16 %v3889_v21  ;;  %3639 = vmatprep.subr.mxu1 %v6119_v10 }
 0x879   :  { %3640 = vmatpush3.msra.mxu1 %v6119_v10  ;;  %v3894_v23 = vpop.permute.xlu1 %3893 }
 0x87a   :  { %v2789_v39 = vsel %vm759_vm1, %v2473_v13, %v3891_v43  ;;  %v3896_v44 = vunpack.i.h.bf16 %v3894_v23  ;;  %v3895_v31 = vunpack.i.l.bf16 %v3894_v23  ;;  %3641 = vmatprep.subr.mxu1 %v6122_v8  ;;  %v2788_v0 = vsel %vm759_vm1, %v2472_v22, %v3890_v7  ;;  %v3037_v23 = vld [vmem:[%s6473_s10] sm:$0xff] }
 0x87b   :  { %v3899_v18 = vpop.permute.xlu0 %3898  ;;  %3642 = vmatpush3.msra.mxu1 %v6122_v8 }
 0x87c   :  { %v2793_v37 = vsel %vm764_vm2, %v2789_v39, %v3896_v44  ;;  %v3901_v14 = vunpack.i.h.bf16 %v3899_v18  ;;  %v3900_v9 = vunpack.i.l.bf16 %v3899_v18  ;;  %3643 = vmatprep.subr.mxu1 %v6106_v17  ;;  %v2792_v10 = vsel %vm764_vm2, %v2788_v0, %v3895_v31 }
 0x87d   :  { %3644 = vmatpush3.msra.mxu1 %v6106_v17  ;;  %v3904_v49 = vpop.permute.xlu1 %3903 }
 0x87e   :  { %v3906_v16 = vunpack.i.h.bf16 %v3904_v49  ;;  %v3905_v2 = vunpack.i.l.bf16 %v3904_v49  ;;  %3645 = vmatprep.subr.mxu1 %v6117_v59  ;;  %v2796_v8 = vsel %vm769_vm3, %v2792_v10, %v3900_v9  ;;  %v2797_v20 = vsel %vm769_vm3, %v2793_v37, %v3901_v14  ;;  %v3116_v37 = vld [vmem:[%s6475_s20] sm:$0xff] }
 0x87f   :  { %v3909_v33 = vpop.permute.xlu0 %3908  ;;  %3646 = vmatpush3.msra.mxu1 %v6117_v59  ;;  %3647 = vmatprep.mubr.f32.mxu1 %v2796_v8  ;;  %v2959_v59 = vld [vmem:[%s6471_s13] sm:$0xff] }
 0x880   :  { %v3911_v50 = vunpack.i.h.bf16 %v3909_v33  ;;  %v3910_v19 = vunpack.i.l.bf16 %v3909_v33  ;;  %3648 = vmatmul.mubr.f32.vlgmr.msra.gmra.mxu1 %v2797_v20  ;;  %v2790_v17 = vsel %vm759_vm1, %v2474_v28, %v3905_v2  ;;  %v2791_v6 = vsel %vm759_vm1, %v2475_v36, %v3906_v16  ;;  %3654 = vmatpush3.msra.mxu0 %v2959_v59  ;;  %v3039_v14 = vld [vmem:[%s6476_s7] sm:$0x1] }
 0x881   :  { %v3914_v1 = vpop.permute.xlu1 %3913  ;;  %vm4301_vm1 = vmmov 0   ;;  %3658 = vmatprep.subr.mxu0 %v4300_v35  ;;  %v3117_v16 = vld [vmem:[#allocation2] sm:$0x1] }
 0x882   :  { %v3916_v48 = vunpack.i.h.bf16 %v3914_v1  ;;  %v3915_v34 = vunpack.i.l.bf16 %v3914_v1  ;;  %v2794_v38 = vsel %vm764_vm2, %v2790_v17, %v3910_v19  ;;  %v2795_v30 = vsel %vm764_vm2, %v2791_v6, %v3911_v50  ;;  %3655 = vmatprep.mubr.msk.f32.mxu0 %vm4301_vm1, %v4300_v35 }
 0x884   :  { %v2798_v61 = vsel %vm769_vm3, %v2794_v38, %v3915_v34  ;;  %v2799_v62 = vsel %vm769_vm3, %v2795_v30, %v3916_v48 }
 0x885   :  { %3650 = vmatprep.mubr.f32.mxu1 %v2798_v61 }
 0x886   :  { %3651 = vmatmul.mubr.f32.gmra.mxu1 %v2799_v62 }
 0x940   :  { %v3649_v12 = vpop.f32.mrf.mxu1 }
 0x941   :  { %v2919_v47 = vadd.f32 %v3649_v12, %v3322_v11 }
 0x942   :  { %v2913_v42 = vpop.f32.mrf.mxu1 }
 0x943   :  { %v2914_v3 = vadd.f32 %v3322_v11, %v2913_v42  ;;  %v2937_v58 = vmul.f32 0.01, %v2919_v47  ;;  %vm2933_vm3 = vcmp.gt.f32.partialorder %v2919_v47, 0.0 }
 0x945   :  { %vm2932_vm2 = vcmp.gt.f32.partialorder %v2914_v3, 0.0  ;;  %v2936_v45 = vmul.f32 0.01, %v2914_v3  ;;  %v2941_v27 = vsel %vm2933_vm3, %v2919_v47, %v2937_v58 }
 0x946   :  { %v3652_v24 = vpop.f32.mrf.mxu1  ;;  %v2945_v26 = vsel %vm265_vm0, %v2941_v27, 0.0 }
 0x947   :  { %v2940_v56 = vsel %vm2932_vm2, %v2914_v3, %v2936_v45  ;;  %v2929_v53 = vadd.f32 %v3652_v24, %v3322_v11 }
 0x948   :  { %v2923_v46 = vpop.f32.mrf.mxu1  ;;  %v2944_v57 = vsel %vm265_vm0, %v2940_v56, 0.0 }
 0x949   :  { %v2939_v54 = vmul.f32 0.01, %v2929_v53  ;;  %v2924_v63 = vadd.f32 %v3322_v11, %v2923_v46  ;;  %vm2935_vm9 = vcmp.gt.f32.partialorder %v2929_v53, 0.0  ;;  %v2946_v15 = vadd.f32 %v2945_v26, %v2944_v57 }
 0x94b   :  { %vm2934_vm10 = vcmp.gt.f32.partialorder %v2924_v63, 0.0  ;;  %v2938_v25 = vmul.f32 0.01, %v2924_v63  ;;  %v2943_v51 = vsel %vm2935_vm9, %v2929_v53, %v2939_v54 }
 0x94c   :  { %v2949_v4 = vsel %vm265_vm0, %v2943_v51, 0.0 }
 0x94d   :  { %v2942_v40 = vsel %vm2934_vm10, %v2924_v63, %v2938_v25 }
 0x94e   :  { %v2947_v5 = vsel %vm265_vm0, %v2942_v40, 0.0 }
 0x94f   :  { %v2948_v29 = vadd.f32 %v2947_v5, %v2946_v15 }
 0x951   :  { %v2950_v60 = vadd.f32 %v2949_v4, %v2948_v29 }
 0x953   :  { %v2951_v52 = vrot.slane %v2950_v60, 4 }
 0x955   :  { %v2952_v32 = vadd.f32 %v2951_v52, %v2950_v60 }
 0x957   :  { %v2953_v21 = vrot.slane %v2952_v32, 2 }
 0x959   :  { %v2954_v13 = vadd.f32 %v2953_v21, %v2952_v32 }
 0x95b   :  { %v2955_v43 = vrot.slane %v2954_v13, 1 }
 0x95d   :  { %v2956_v7 = vadd.f32 %v2955_v43, %v2954_v13 }
 0x95f   :  { %v2958_v22 = vmul.f32 0.03125, %v2956_v7 }
 0x961   :  { %3656 = vmatmul.mubr.msk.f32.vlgmr.msra.gmra.mxu0 %vm265_vm0, %v2958_v22 }
 0x962   :  { %3662 = vmatprep.mubr.msk.f32.mxu0 %vm4301_vm1, %v4300_v35  ;;  %3659 = vmatpush3.msra.mxu0 %v3038_v41 }
 0x963   :  { %3660 = vmatprep.subr.mxu0 %v4300_v35 }
 0x964   :  { %3661 = vmatpush3.msra.mxu0 %v3037_v23 }
 0x965   :  { %3665 = vmatprep.subr.mxu0 %v4300_v35 }
 0xa21   :  { %v3030_v39 = vpop.f32.mrf.mxu0 }
 0xa22   :  { %v3031_v44 = vadd.f32 %v3030_v39, %v2960_v55 }
 0xa23   :  { %v3657_v31 = vpop.f32.mrf.mxu0 }
 0xa24   :  { %vm3034_vm11 = vcmp.gt.f32.partialorder %v3031_v44, 0.0  ;;  %v3035_v0 = vmul.f32 0.01, %v3031_v44 }
 0xa26   :  { %v3036_v18 = vsel %vm3034_vm11, %v3031_v44, %v3035_v0 }
 0xa27   :  { %3663 = vmatmul.mubr.msk.f32.vlgmr.msra.gmra.mxu0 %vm930_vm6, %v3036_v18  ;;  %vm3191_vm6 = vcmask 0  }
 0xa28   :  { %3667 = vmatprep.mubr.msk.f32.mxu0 %vm4301_vm1, %v4300_v35  ;;  %3666 = vmatpush3.msra.mxu0 %v3116_v37 }
 0xae7   :  { %v3109_v9 = vpop.f32.mrf.mxu0 }
 0xae8   :  { %v3110_v10 = vadd.f32 %v3109_v9, %v3039_v14 }
 0xae9   :  { %v3664_v49 = vpop.f32.mrf.mxu0 }
 0xaea   :  { %vm3113_vm12 = vcmp.gt.f32.partialorder %v3110_v10, 0.0  ;;  %v3114_v28 = vmul.f32 0.01, %v3110_v10 }
 0xaec   :  { %v3115_v36 = vsel %vm3113_vm12, %v3110_v10, %v3114_v28 }
 0xaed   :  { %3668 = vmatmul.mubr.msk.f32.vlgmr.msra.gmra.mxu0 %vm265_vm0, %v3115_v36 }
 0xbad   :  { %v3187_v2 = vpop.f32.mrf.mxu0 }
 0xbae   :  { %v3188_v8 = vadd.f32 %v3187_v2, %v3117_v16 }
 0xbaf   :  { %v3669_v20 = vpop.f32.mrf.mxu0 }
 0xbb0   :  { %3192 = vst.msk [vmem:[#allocation17] sm:$0x1] %vm3191_vm6, %v3188_v8 }
 0xbb1   :  { %4260 = shalt.err (!%p4257_p2)
}
 0xbb2   :  { %s6477_s22 = sld [smem:[#allocation87_spill]] }
 0xbb8   :  { %3202 = dma.vmem_to_hbm [thread:$0]  %s3200_s14, 16, %s6477_s22, [#allocation4]  }
 0xbb9   :  { %4279 = dma.done.wait [#allocation4], 16  }
 0xbba   :  { %4280 = vsyncadd [#allocation4], 4294967280 }
 0xbbb   :  { %3206 = vsyncpa [#allocation4], 1 }
 0xbbc   :  { %3207 = vsyncpa [#allocation5], 1 }
 0xbbd   :  { %3208 = vsyncpa [#allocation7], 1 }
 0xbbe   :  { %3209 = vsyncpa [#allocation10], 1 }
 0xbbf   :  { %3210 = vsyncpa [#allocation13], 1 }
 0xbc0   :  { %3211 = vsyncpa [#allocation16], 1 }

</bundles_post_ra>
